<compile_context>
chip_gen: v7x
topology: tpu7x:2x2x1
jax: 0.10.0
libtpu: 0.0.40
codegen_flags: <defaults>
</compile_context>

<pallas_src>
import jax
import jax.numpy as jnp
from jax import lax
from jax.experimental import pallas as pl
from jax.experimental.pallas import tpu as pltpu

_C = 128  # padded channel width (lane-dense)


# ---------------------------------------------------------------------------
# In-kernel building blocks (traced inside the fused kernel body)
# ---------------------------------------------------------------------------
def _conv1_relu_vpu(x_ref, w_ref, b_ref, dst_ref, out_h, out_w):
    """Cin=1 3x3 conv + bias + ReLU on the VPU. x_ref block: [1, H, W, 1]."""
    bias = b_ref[...]  # [1, C]

    def row(oh, c):
        acc = jnp.broadcast_to(bias, (out_w, _C))
        for dy in range(3):
            for dx in range(3):
                xs = x_ref[0, oh + dy, dx:dx + out_w, :]       # [out_w, 1]
                acc = acc + xs * w_ref[dy, dx]                 # [out_w,1]*[1,C]
        dst_ref[oh] = jnp.maximum(acc, 0.0)
        return c

    lax.fori_loop(0, out_h, row, 0)


def _conv3x3_relu_mxu(src_ref, w_ref, b_ref, dst_ref, out_h, out_w):
    """3x3 conv (128->128 zero-padded channels) + bias + ReLU, row-wise MXU dots."""
    bias = b_ref[...]  # [1, C]

    def init_row(oh, c):
        dst_ref[oh] = jnp.broadcast_to(bias, (out_w, _C))
        return c

    lax.fori_loop(0, out_h, init_row, 0)

    for dy in range(3):
        for dx in range(3):
            w = w_ref[dy, dx]  # [C, C] -- hoisted across the row loop

            def acc_row(oh, c):
                dst_ref[oh] += jnp.dot(
                    src_ref[oh + dy, dx:dx + out_w, :], w,
                    preferred_element_type=jnp.float32)
                return c

            lax.fori_loop(0, out_h, acc_row, 0)

    def relu_row(oh, c):
        dst_ref[oh] = jnp.maximum(dst_ref[oh], 0.0)
        return c

    lax.fori_loop(0, out_h, relu_row, 0)


def _maxpool2x2(src_ref, dst_ref, out_h, out_w):
    """2x2 / stride-2 (floor mode) max pool via stride-2 VMEM reads."""
    def row(i, c):
        r0 = 2 * i
        c00 = src_ref[r0,     pl.ds(0, out_w, stride=2), :]
        c01 = src_ref[r0,     pl.ds(1, out_w, stride=2), :]
        c10 = src_ref[r0 + 1, pl.ds(0, out_w, stride=2), :]
        c11 = src_ref[r0 + 1, pl.ds(1, out_w, stride=2), :]
        dst_ref[i] = jnp.maximum(jnp.maximum(c00, c01), jnp.maximum(c10, c11))
        return c

    lax.fori_loop(0, out_h, row, 0)


# ---------------------------------------------------------------------------
# Fused kernel: conv1+pool1 + conv2+pool2 + conv3+pool3 + classification head
# ---------------------------------------------------------------------------
def _fused_cnn_kernel(x_ref, w1_ref, b1_ref, w2_ref, b2_ref, w3_ref, b3_ref,
                      hw1_ref, hb1_ref, hw2_ref, hb2_ref,
                      out_ref,
                      a1_ref, p1_ref, a2_ref, p2_ref, a3_ref, p3_ref):
    # Stage 1: Conv(1->32) + ReLU + MaxPool   28x28 -> 26x26 -> 13x13
    _conv1_relu_vpu(x_ref, w1_ref, b1_ref, a1_ref, 26, 26)
    _maxpool2x2(a1_ref, p1_ref, 13, 13)
    # Stage 2: Conv(32->64) + ReLU + MaxPool  13x13 -> 11x11 -> 5x5
    _conv3x3_relu_mxu(p1_ref, w2_ref, b2_ref, a2_ref, 11, 11)
    _maxpool2x2(a2_ref, p2_ref, 5, 5)
    # Stage 3: Conv(64->32) + ReLU + MaxPool  5x5 -> 3x3 -> 1x1
    _conv3x3_relu_mxu(p2_ref, w3_ref, b3_ref, a3_ref, 3, 3)
    _maxpool2x2(a3_ref, p3_ref, 1, 1)
    # Head: Linear(32,10) -> ReLU -> Linear(10,10); features are already in VMEM.
    feat = p3_ref[0]                                              # [1, C]
    h = jnp.dot(feat, hw1_ref[...], preferred_element_type=jnp.float32) + hb1_ref[...]
    h = jnp.maximum(h, 0.0)
    out_ref[0] = (jnp.dot(h, hw2_ref[...], preferred_element_type=jnp.float32)
                  + hb2_ref[...])


# ---------------------------------------------------------------------------
# Host-side wrapper
# ---------------------------------------------------------------------------
def _pad_to(a, shape):
    return jnp.pad(a, [(0, t - s) for s, t in zip(a.shape, shape)])


def reduced_filters_cnn_forward(x_nchw, params):
    """x_nchw: [B, 1, 28, 28] (PyTorch layout) -> logits [B, 10]."""
    x = jnp.transpose(x_nchw, (0, 2, 3, 1)).astype(jnp.float32)   # [B, 28, 28, 1]
    B = x.shape[0]

    # Zero-pad all channel dims to 128 lanes (padding is inert, see header).
    w1p = _pad_to(params["cw1"], (3, 3, 1, _C))
    w2p = _pad_to(params["cw2"], (3, 3, _C, _C))
    w3p = _pad_to(params["cw3"], (3, 3, _C, _C))
    hw1p = _pad_to(params["hw1"], (_C, _C))
    hw2p = _pad_to(params["hw2"], (_C, _C))
    b1p = _pad_to(params["cb1"].reshape(1, -1), (1, _C))
    b2p = _pad_to(params["cb2"].reshape(1, -1), (1, _C))
    b3p = _pad_to(params["cb3"].reshape(1, -1), (1, _C))
    hb1p = _pad_to(params["hb1"].reshape(1, -1), (1, _C))
    hb2p = _pad_to(params["hb2"].reshape(1, -1), (1, _C))

    const4 = lambda b: (0, 0, 0, 0)
    const2 = lambda b: (0, 0)

    out = pl.pallas_call(
        _fused_cnn_kernel,
        out_shape=jax.ShapeDtypeStruct((B, 1, _C), jnp.float32),
        grid_spec=pltpu.PrefetchScalarGridSpec(
            num_scalar_prefetch=0,
            grid=(B,),
            in_specs=[
                pl.BlockSpec((1, 28, 28, 1), lambda b: (b, 0, 0, 0)),  # x
                pl.BlockSpec((3, 3, 1, _C), const4),                   # w1
                pl.BlockSpec((1, _C), const2),                         # b1
                pl.BlockSpec((3, 3, _C, _C), const4),                  # w2
                pl.BlockSpec((1, _C), const2),                         # b2
                pl.BlockSpec((3, 3, _C, _C), const4),                  # w3
                pl.BlockSpec((1, _C), const2),                         # b3
                pl.BlockSpec((_C, _C), const2),                        # head w1
                pl.BlockSpec((1, _C), const2),                         # head b1
                pl.BlockSpec((_C, _C), const2),                        # head w2
                pl.BlockSpec((1, _C), const2),                         # head b2
            ],
            out_specs=pl.BlockSpec((1, 1, _C), lambda b: (b, 0, 0)),
            scratch_shapes=[
                pltpu.VMEM((26, 26, _C), jnp.float32),   # conv1 out
                pltpu.VMEM((13, 13, _C), jnp.float32),   # pool1 out
                pltpu.VMEM((11, 11, _C), jnp.float32),   # conv2 out
                pltpu.VMEM((5, 5, _C), jnp.float32),     # pool2 out
                pltpu.VMEM((3, 3, _C), jnp.float32),     # conv3 out
                pltpu.VMEM((1, 1, _C), jnp.float32),     # pool3 out (features)
            ],
        ),
        compiler_params=pltpu.CompilerParams(
            dimension_semantics=("parallel",),
            vmem_limit_bytes=32 * 1024 * 1024,
        ),
    )(x, w1p, b1p, w2p, b2p, w3p, b3p, hw1p, hb1p, hw2p, hb2p)

    return out.reshape(B, _C)[:, :10]


# ---------------------------------------------------------------------------
# Params + pure-JAX reference (correctness check)
# ---------------------------------------------------------------------------
def init_params(key):
    ks = jax.random.split(key, 10)

    def w_init(k, shape, fan_in):
        return jax.random.normal(k, shape, jnp.float32) / jnp.sqrt(jnp.float32(fan_in))

    def b_init(k, n):
        return 0.01 * jax.random.normal(k, (n,), jnp.float32)

    return {
        "cw1": w_init(ks[0], (3, 3, 1, 32), 9),        # Conv2d(1, 32, 3), HWIO
        "cb1": b_init(ks[1], 32),
        "cw2": w_init(ks[2], (3, 3, 32, 64), 9 * 32),  # Conv2d(32, 64, 3)
        "cb2": b_init(ks[3], 64),
        "cw3": w_init(ks[4], (3, 3, 64, 32), 9 * 64),  # Conv2d(64, 32, 3)
        "cb3": b_init(ks[5], 32),
        "hw1": w_init(ks[6], (32, 10), 32),            # Linear(32, 10), [in, out]
        "hb1": b_init(ks[7], 10),
        "hw2": w_init(ks[8], (10, 10), 10),            # Linear(10, 10)
        "hb2": b_init(ks[9], 10),
    }


def _reference_forward(x_nchw, params):
    x = jnp.transpose(x_nchw, (0, 2, 3, 1)).astype(jnp.float32)

    def block(x, w, b):
        y = lax.conv_general_dilated(
            x, w, window_strides=(1, 1), padding="VALID",
            dimension_numbers=("NHWC", "HWIO", "NHWC")) + b
        y = jnp.maximum(y, 0.0)
        return lax.reduce_window(y, -jnp.inf, lax.max,
                                 (1, 2, 2, 1), (1, 2, 2, 1), "VALID")

    x = block(x, params["cw1"], params["cb1"])
    x = block(x, params["cw2"], params["cb2"])
    x = block(x, params["cw3"], params["cb3"])
    feats = x.reshape(x.shape[0], -1)
    h = jnp.maximum(feats @ params["hw1"] + params["hb1"], 0.0)
    return h @ params["hw2"] + params["hb2"]


if __name__ == "__main__":
    key = jax.random.PRNGKey(0)
    kx, kp = jax.random.split(key)
    # Forward implies 28x28 single-channel input so the flattened feature
    # vector has exactly 32 elements (matching Linear(32, 10)).
    x = jax.random.normal(kx, (2, 1, 28, 28), jnp.float32)
    params = init_params(kp)

    fwd = jax.jit(reduced_filters_cnn_forward)
    logits = fwd(x, params)
    jax.block_until_ready(logits)
    assert logits.shape == (2, 10), logits.shape

    ref = _reference_forward(x, params)
    err = float(jnp.max(jnp.abs(logits - ref)))
    assert err < 1e-3, f"max abs err vs pure-JAX reference: {err}"

    print("KERNEL_OK")
</pallas_src>

<mosaic_0001>
module attributes {stable_mosaic.version = 11 : i64} {
  func.func @_fused_cnn_kernel(%arg0: i32, %arg1: memref<1x28x28x1xf32, #tpu.memory_space<vmem>>, %arg2: memref<3x3x1x128xf32, #tpu.memory_space<vmem>>, %arg3: memref<1x128xf32, #tpu.memory_space<vmem>>, %arg4: memref<3x3x128x128xf32, #tpu.memory_space<vmem>>, %arg5: memref<1x128xf32, #tpu.memory_space<vmem>>, %arg6: memref<3x3x128x128xf32, #tpu.memory_space<vmem>>, %arg7: memref<1x128xf32, #tpu.memory_space<vmem>>, %arg8: memref<128x128xf32, #tpu.memory_space<vmem>>, %arg9: memref<1x128xf32, #tpu.memory_space<vmem>>, %arg10: memref<128x128xf32, #tpu.memory_space<vmem>>, %arg11: memref<1x128xf32, #tpu.memory_space<vmem>>, %arg12: memref<1x1x128xf32, #tpu.memory_space<vmem>>, %arg13: memref<26x26x128xf32, #tpu.memory_space<vmem>>, %arg14: memref<13x13x128xf32, #tpu.memory_space<vmem>>, %arg15: memref<11x11x128xf32, #tpu.memory_space<vmem>>, %arg16: memref<5x5x128xf32, #tpu.memory_space<vmem>>, %arg17: memref<3x3x128xf32, #tpu.memory_space<vmem>>, %arg18: memref<1x1x128xf32, #tpu.memory_space<vmem>>) attributes {dimension_semantics = [#tpu.dimension_semantics<parallel>], iteration_bounds = array<i64: 2>, scalar_prefetch = 0 : i64, scratch_operands = 6 : i64, tpu.core_type = #tpu.core_type<tc>, window_params = [{transform_indices = @transform_0, window_bounds = array<i64: 1, 28, 28, 1>}, {pipeline_mode = #tpu.pipeline_mode<synchronous>, transform_indices = @transform_1, window_bounds = array<i64: 3, 3, 1, 128>}, {pipeline_mode = #tpu.pipeline_mode<synchronous>, transform_indices = @transform_2, window_bounds = array<i64: 1, 128>}, {pipeline_mode = #tpu.pipeline_mode<synchronous>, transform_indices = @transform_3, window_bounds = array<i64: 3, 3, 128, 128>}, {pipeline_mode = #tpu.pipeline_mode<synchronous>, transform_indices = @transform_4, window_bounds = array<i64: 1, 128>}, {pipeline_mode = #tpu.pipeline_mode<synchronous>, transform_indices = @transform_5, window_bounds = array<i64: 3, 3, 128, 128>}, {pipeline_mode = #tpu.pipeline_mode<synchronous>, transform_indices = @transform_6, window_bounds = array<i64: 1, 128>}, {pipeline_mode = #tpu.pipeline_mode<synchronous>, transform_indices = @transform_7, window_bounds = array<i64: 128, 128>}, {pipeline_mode = #tpu.pipeline_mode<synchronous>, transform_indices = @transform_8, window_bounds = array<i64: 1, 128>}, {pipeline_mode = #tpu.pipeline_mode<synchronous>, transform_indices = @transform_9, window_bounds = array<i64: 128, 128>}, {pipeline_mode = #tpu.pipeline_mode<synchronous>, transform_indices = @transform_10, window_bounds = array<i64: 1, 128>}, {transform_indices = @transform_11, window_bounds = array<i64: 1, 1, 128>}]} {
    %c0 = arith.constant 0 : index
    %c0_0 = arith.constant 0 : index
    %0 = vector.load %arg3[%c0, %c0_0] : memref<1x128xf32, #tpu.memory_space<vmem>>, vector<1x128xf32>
    %c0_i32 = arith.constant 0 : i32
    %c26_i32 = arith.constant 26 : i32
    %1 = arith.addi %c0_i32, %c26_i32 : i32
    %c1_i32 = arith.constant 1 : i32
    scf.for %arg19 = %c0_i32 to %1 step %c1_i32  : i32 {
      %101 = vector.shape_cast %0 : vector<1x128xf32> to vector<1x128xf32>
      %102 = vector.broadcast %101 : vector<1x128xf32> to vector<26x128xf32>
      %c0_i32_198 = arith.constant 0 : i32
      %103 = arith.addi %arg19, %c0_i32_198 : i32
      %c0_199 = arith.constant 0 : index
      %104 = arith.index_cast %103 : i32 to index
      %c0_200 = arith.constant 0 : index
      %c0_201 = arith.constant 0 : index
      %105 = vector.load %arg1[%c0_199, %104, %c0_200, %c0_201] : memref<1x28x28x1xf32, #tpu.memory_space<vmem>>, vector<1x1x26x1xf32>
      %106 = vector.shape_cast %105 : vector<1x1x26x1xf32> to vector<26x1xf32>
      %c0_202 = arith.constant 0 : index
      %c0_203 = arith.constant 0 : index
      %c0_204 = arith.constant 0 : index
      %c0_205 = arith.constant 0 : index
      %107 = vector.load %arg2[%c0_202, %c0_203, %c0_204, %c0_205] : memref<3x3x1x128xf32, #tpu.memory_space<vmem>>, vector<1x1x1x128xf32>
      %108 = vector.shape_cast %107 : vector<1x1x1x128xf32> to vector<1x128xf32>
      %109 = vector.broadcast %106 : vector<26x1xf32> to vector<26x128xf32>
      %110 = vector.broadcast %108 : vector<1x128xf32> to vector<26x128xf32>
      %111 = arith.mulf %109, %110 : vector<26x128xf32>
      %112 = arith.addf %102, %111 : vector<26x128xf32>
      %c0_i32_206 = arith.constant 0 : i32
      %113 = arith.addi %arg19, %c0_i32_206 : i32
      %c0_207 = arith.constant 0 : index
      %114 = arith.index_cast %113 : i32 to index
      %c1_208 = arith.constant 1 : index
      %c0_209 = arith.constant 0 : index
      %115 = vector.load %arg1[%c0_207, %114, %c1_208, %c0_209] : memref<1x28x28x1xf32, #tpu.memory_space<vmem>>, vector<1x1x26x1xf32>
      %116 = vector.shape_cast %115 : vector<1x1x26x1xf32> to vector<26x1xf32>
      %c0_210 = arith.constant 0 : index
      %c1_211 = arith.constant 1 : index
      %c0_212 = arith.constant 0 : index
      %c0_213 = arith.constant 0 : index
      %117 = vector.load %arg2[%c0_210, %c1_211, %c0_212, %c0_213] : memref<3x3x1x128xf32, #tpu.memory_space<vmem>>, vector<1x1x1x128xf32>
      %118 = vector.shape_cast %117 : vector<1x1x1x128xf32> to vector<1x128xf32>
      %119 = vector.broadcast %116 : vector<26x1xf32> to vector<26x128xf32>
      %120 = vector.broadcast %118 : vector<1x128xf32> to vector<26x128xf32>
      %121 = arith.mulf %119, %120 : vector<26x128xf32>
      %122 = arith.addf %112, %121 : vector<26x128xf32>
      %c0_i32_214 = arith.constant 0 : i32
      %123 = arith.addi %arg19, %c0_i32_214 : i32
      %c0_215 = arith.constant 0 : index
      %124 = arith.index_cast %123 : i32 to index
      %c2_216 = arith.constant 2 : index
      %c0_217 = arith.constant 0 : index
      %125 = vector.load %arg1[%c0_215, %124, %c2_216, %c0_217] : memref<1x28x28x1xf32, #tpu.memory_space<vmem>>, vector<1x1x26x1xf32>
      %126 = vector.shape_cast %125 : vector<1x1x26x1xf32> to vector<26x1xf32>
      %c0_218 = arith.constant 0 : index
      %c2_219 = arith.constant 2 : index
      %c0_220 = arith.constant 0 : index
      %c0_221 = arith.constant 0 : index
      %127 = vector.load %arg2[%c0_218, %c2_219, %c0_220, %c0_221] : memref<3x3x1x128xf32, #tpu.memory_space<vmem>>, vector<1x1x1x128xf32>
      %128 = vector.shape_cast %127 : vector<1x1x1x128xf32> to vector<1x128xf32>
      %129 = vector.broadcast %126 : vector<26x1xf32> to vector<26x128xf32>
      %130 = vector.broadcast %128 : vector<1x128xf32> to vector<26x128xf32>
      %131 = arith.mulf %129, %130 : vector<26x128xf32>
      %132 = arith.addf %122, %131 : vector<26x128xf32>
      %c1_i32_222 = arith.constant 1 : i32
      %133 = arith.addi %arg19, %c1_i32_222 : i32
      %c0_223 = arith.constant 0 : index
      %134 = arith.index_cast %133 : i32 to index
      %c0_224 = arith.constant 0 : index
      %c0_225 = arith.constant 0 : index
      %135 = vector.load %arg1[%c0_223, %134, %c0_224, %c0_225] : memref<1x28x28x1xf32, #tpu.memory_space<vmem>>, vector<1x1x26x1xf32>
      %136 = vector.shape_cast %135 : vector<1x1x26x1xf32> to vector<26x1xf32>
      %c1_226 = arith.constant 1 : index
      %c0_227 = arith.constant 0 : index
      %c0_228 = arith.constant 0 : index
      %c0_229 = arith.constant 0 : index
      %137 = vector.load %arg2[%c1_226, %c0_227, %c0_228, %c0_229] : memref<3x3x1x128xf32, #tpu.memory_space<vmem>>, vector<1x1x1x128xf32>
      %138 = vector.shape_cast %137 : vector<1x1x1x128xf32> to vector<1x128xf32>
      %139 = vector.broadcast %136 : vector<26x1xf32> to vector<26x128xf32>
      %140 = vector.broadcast %138 : vector<1x128xf32> to vector<26x128xf32>
      %141 = arith.mulf %139, %140 : vector<26x128xf32>
      %142 = arith.addf %132, %141 : vector<26x128xf32>
      %c1_i32_230 = arith.constant 1 : i32
      %143 = arith.addi %arg19, %c1_i32_230 : i32
      %c0_231 = arith.constant 0 : index
      %144 = arith.index_cast %143 : i32 to index
      %c1_232 = arith.constant 1 : index
      %c0_233 = arith.constant 0 : index
      %145 = vector.load %arg1[%c0_231, %144, %c1_232, %c0_233] : memref<1x28x28x1xf32, #tpu.memory_space<vmem>>, vector<1x1x26x1xf32>
      %146 = vector.shape_cast %145 : vector<1x1x26x1xf32> to vector<26x1xf32>
      %c1_234 = arith.constant 1 : index
      %c1_235 = arith.constant 1 : index
      %c0_236 = arith.constant 0 : index
      %c0_237 = arith.constant 0 : index
      %147 = vector.load %arg2[%c1_234, %c1_235, %c0_236, %c0_237] : memref<3x3x1x128xf32, #tpu.memory_space<vmem>>, vector<1x1x1x128xf32>
      %148 = vector.shape_cast %147 : vector<1x1x1x128xf32> to vector<1x128xf32>
      %149 = vector.broadcast %146 : vector<26x1xf32> to vector<26x128xf32>
      %150 = vector.broadcast %148 : vector<1x128xf32> to vector<26x128xf32>
      %151 = arith.mulf %149, %150 : vector<26x128xf32>
      %152 = arith.addf %142, %151 : vector<26x128xf32>
      %c1_i32_238 = arith.constant 1 : i32
      %153 = arith.addi %arg19, %c1_i32_238 : i32
      %c0_239 = arith.constant 0 : index
      %154 = arith.index_cast %153 : i32 to index
      %c2_240 = arith.constant 2 : index
      %c0_241 = arith.constant 0 : index
      %155 = vector.load %arg1[%c0_239, %154, %c2_240, %c0_241] : memref<1x28x28x1xf32, #tpu.memory_space<vmem>>, vector<1x1x26x1xf32>
      %156 = vector.shape_cast %155 : vector<1x1x26x1xf32> to vector<26x1xf32>
      %c1_242 = arith.constant 1 : index
      %c2_243 = arith.constant 2 : index
      %c0_244 = arith.constant 0 : index
      %c0_245 = arith.constant 0 : index
      %157 = vector.load %arg2[%c1_242, %c2_243, %c0_244, %c0_245] : memref<3x3x1x128xf32, #tpu.memory_space<vmem>>, vector<1x1x1x128xf32>
      %158 = vector.shape_cast %157 : vector<1x1x1x128xf32> to vector<1x128xf32>
      %159 = vector.broadcast %156 : vector<26x1xf32> to vector<26x128xf32>
      %160 = vector.broadcast %158 : vector<1x128xf32> to vector<26x128xf32>
      %161 = arith.mulf %159, %160 : vector<26x128xf32>
      %162 = arith.addf %152, %161 : vector<26x128xf32>
      %c2_i32_246 = arith.constant 2 : i32
      %163 = arith.addi %arg19, %c2_i32_246 : i32
      %c0_247 = arith.constant 0 : index
      %164 = arith.index_cast %163 : i32 to index
      %c0_248 = arith.constant 0 : index
      %c0_249 = arith.constant 0 : index
      %165 = vector.load %arg1[%c0_247, %164, %c0_248, %c0_249] : memref<1x28x28x1xf32, #tpu.memory_space<vmem>>, vector<1x1x26x1xf32>
      %166 = vector.shape_cast %165 : vector<1x1x26x1xf32> to vector<26x1xf32>
      %c2_250 = arith.constant 2 : index
      %c0_251 = arith.constant 0 : index
      %c0_252 = arith.constant 0 : index
      %c0_253 = arith.constant 0 : index
      %167 = vector.load %arg2[%c2_250, %c0_251, %c0_252, %c0_253] : memref<3x3x1x128xf32, #tpu.memory_space<vmem>>, vector<1x1x1x128xf32>
      %168 = vector.shape_cast %167 : vector<1x1x1x128xf32> to vector<1x128xf32>
      %169 = vector.broadcast %166 : vector<26x1xf32> to vector<26x128xf32>
      %170 = vector.broadcast %168 : vector<1x128xf32> to vector<26x128xf32>
      %171 = arith.mulf %169, %170 : vector<26x128xf32>
      %172 = arith.addf %162, %171 : vector<26x128xf32>
      %c2_i32_254 = arith.constant 2 : i32
      %173 = arith.addi %arg19, %c2_i32_254 : i32
      %c0_255 = arith.constant 0 : index
      %174 = arith.index_cast %173 : i32 to index
      %c1_256 = arith.constant 1 : index
      %c0_257 = arith.constant 0 : index
      %175 = vector.load %arg1[%c0_255, %174, %c1_256, %c0_257] : memref<1x28x28x1xf32, #tpu.memory_space<vmem>>, vector<1x1x26x1xf32>
      %176 = vector.shape_cast %175 : vector<1x1x26x1xf32> to vector<26x1xf32>
      %c2_258 = arith.constant 2 : index
      %c1_259 = arith.constant 1 : index
      %c0_260 = arith.constant 0 : index
      %c0_261 = arith.constant 0 : index
      %177 = vector.load %arg2[%c2_258, %c1_259, %c0_260, %c0_261] : memref<3x3x1x128xf32, #tpu.memory_space<vmem>>, vector<1x1x1x128xf32>
      %178 = vector.shape_cast %177 : vector<1x1x1x128xf32> to vector<1x128xf32>
      %179 = vector.broadcast %176 : vector<26x1xf32> to vector<26x128xf32>
      %180 = vector.broadcast %178 : vector<1x128xf32> to vector<26x128xf32>
      %181 = arith.mulf %179, %180 : vector<26x128xf32>
      %182 = arith.addf %172, %181 : vector<26x128xf32>
      %c2_i32_262 = arith.constant 2 : i32
      %183 = arith.addi %arg19, %c2_i32_262 : i32
      %c0_263 = arith.constant 0 : index
      %184 = arith.index_cast %183 : i32 to index
      %c2_264 = arith.constant 2 : index
      %c0_265 = arith.constant 0 : index
      %185 = vector.load %arg1[%c0_263, %184, %c2_264, %c0_265] : memref<1x28x28x1xf32, #tpu.memory_space<vmem>>, vector<1x1x26x1xf32>
      %186 = vector.shape_cast %185 : vector<1x1x26x1xf32> to vector<26x1xf32>
      %c2_266 = arith.constant 2 : index
      %c2_267 = arith.constant 2 : index
      %c0_268 = arith.constant 0 : index
      %c0_269 = arith.constant 0 : index
      %187 = vector.load %arg2[%c2_266, %c2_267, %c0_268, %c0_269] : memref<3x3x1x128xf32, #tpu.memory_space<vmem>>, vector<1x1x1x128xf32>
      %188 = vector.shape_cast %187 : vector<1x1x1x128xf32> to vector<1x128xf32>
      %189 = vector.broadcast %186 : vector<26x1xf32> to vector<26x128xf32>
      %190 = vector.broadcast %188 : vector<1x128xf32> to vector<26x128xf32>
      %191 = arith.mulf %189, %190 : vector<26x128xf32>
      %192 = arith.addf %182, %191 : vector<26x128xf32>
      %cst_270 = arith.constant 0.000000e+00 : f32
      %193 = vector.broadcast %cst_270 : f32 to vector<26x128xf32>
      %194 = arith.maximumf %192, %193 : vector<26x128xf32>
      %195 = arith.index_cast %arg19 : i32 to index
      %c0_271 = arith.constant 0 : index
      %c0_272 = arith.constant 0 : index
      %196 = vector.load %arg13[%195, %c0_271, %c0_272] : memref<26x26x128xf32, #tpu.memory_space<vmem>>, vector<1x26x128xf32>
      %197 = vector.shape_cast %196 : vector<1x26x128xf32> to vector<26x128xf32>
      %198 = vector.shape_cast %194 : vector<26x128xf32> to vector<1x26x128xf32>
      tpu.vector_store %arg13[%195, %c0_271, %c0_272], %198 {strides = array<i32>} : memref<26x26x128xf32, #tpu.memory_space<vmem>>, vector<1x26x128xf32>,
    }
    %c26_i32_1 = arith.constant 26 : i32
    %c0_i32_2 = arith.constant 0 : i32
    %c13_i32 = arith.constant 13 : i32
    %2 = arith.addi %c0_i32_2, %c13_i32 : i32
    %c1_i32_3 = arith.constant 1 : i32
    scf.for %arg19 = %c0_i32_2 to %2 step %c1_i32_3  : i32 {
      %c2_i32_198 = arith.constant 2 : i32
      %101 = arith.muli %c2_i32_198, %arg19 : i32
      %102 = arith.index_cast %101 : i32 to index
      %c0_199 = arith.constant 0 : index
      %c0_200 = arith.constant 0 : index
      %103 = tpu.strided_load %arg13[%102, %c0_199, %c0_200] {strides = array<i32: 1, 2, 1>} : memref<26x26x128xf32, #tpu.memory_space<vmem>>, vector<1x13x128xf32>
      %104 = vector.shape_cast %103 : vector<1x13x128xf32> to vector<13x128xf32>
      %105 = arith.index_cast %101 : i32 to index
      %c1_201 = arith.constant 1 : index
      %c0_202 = arith.constant 0 : index
      %106 = tpu.strided_load %arg13[%105, %c1_201, %c0_202] {strides = array<i32: 1, 2, 1>} : memref<26x26x128xf32, #tpu.memory_space<vmem>>, vector<1x13x128xf32>
      %107 = vector.shape_cast %106 : vector<1x13x128xf32> to vector<13x128xf32>
      %c1_i32_203 = arith.constant 1 : i32
      %108 = arith.addi %101, %c1_i32_203 : i32
      %109 = arith.index_cast %108 : i32 to index
      %c0_204 = arith.constant 0 : index
      %c0_205 = arith.constant 0 : index
      %110 = tpu.strided_load %arg13[%109, %c0_204, %c0_205] {strides = array<i32: 1, 2, 1>} : memref<26x26x128xf32, #tpu.memory_space<vmem>>, vector<1x13x128xf32>
      %111 = vector.shape_cast %110 : vector<1x13x128xf32> to vector<13x128xf32>
      %c1_i32_206 = arith.constant 1 : i32
      %112 = arith.addi %101, %c1_i32_206 : i32
      %113 = arith.index_cast %112 : i32 to index
      %c1_207 = arith.constant 1 : index
      %c0_208 = arith.constant 0 : index
      %114 = tpu.strided_load %arg13[%113, %c1_207, %c0_208] {strides = array<i32: 1, 2, 1>} : memref<26x26x128xf32, #tpu.memory_space<vmem>>, vector<1x13x128xf32>
      %115 = vector.shape_cast %114 : vector<1x13x128xf32> to vector<13x128xf32>
      %116 = arith.maximumf %104, %107 : vector<13x128xf32>
      %117 = arith.maximumf %111, %115 : vector<13x128xf32>
      %118 = arith.maximumf %116, %117 : vector<13x128xf32>
      %119 = arith.index_cast %arg19 : i32 to index
      %c0_209 = arith.constant 0 : index
      %c0_210 = arith.constant 0 : index
      %120 = vector.load %arg14[%119, %c0_209, %c0_210] : memref<13x13x128xf32, #tpu.memory_space<vmem>>, vector<1x13x128xf32>
      %121 = vector.shape_cast %120 : vector<1x13x128xf32> to vector<13x128xf32>
      %122 = vector.shape_cast %118 : vector<13x128xf32> to vector<1x13x128xf32>
      tpu.vector_store %arg14[%119, %c0_209, %c0_210], %122 {strides = array<i32>} : memref<13x13x128xf32, #tpu.memory_space<vmem>>, vector<1x13x128xf32>,
    }
    %c13_i32_4 = arith.constant 13 : i32
    %c0_5 = arith.constant 0 : index
    %c0_6 = arith.constant 0 : index
    %3 = vector.load %arg5[%c0_5, %c0_6] : memref<1x128xf32, #tpu.memory_space<vmem>>, vector<1x128xf32>
    %c0_i32_7 = arith.constant 0 : i32
    %c11_i32 = arith.constant 11 : i32
    %4 = arith.addi %c0_i32_7, %c11_i32 : i32
    %c1_i32_8 = arith.constant 1 : i32
    scf.for %arg19 = %c0_i32_7 to %4 step %c1_i32_8  : i32 {
      %101 = vector.shape_cast %3 : vector<1x128xf32> to vector<1x128xf32>
      %102 = vector.broadcast %101 : vector<1x128xf32> to vector<11x128xf32>
      %103 = arith.index_cast %arg19 : i32 to index
      %c0_198 = arith.constant 0 : index
      %c0_199 = arith.constant 0 : index
      %104 = vector.load %arg15[%103, %c0_198, %c0_199] : memref<11x11x128xf32, #tpu.memory_space<vmem>>, vector<1x11x128xf32>
      %105 = vector.shape_cast %104 : vector<1x11x128xf32> to vector<11x128xf32>
      %106 = vector.shape_cast %102 : vector<11x128xf32> to vector<1x11x128xf32>
      tpu.vector_store %arg15[%103, %c0_198, %c0_199], %106 {strides = array<i32>} : memref<11x11x128xf32, #tpu.memory_space<vmem>>, vector<1x11x128xf32>,
    }
    %c11_i32_9 = arith.constant 11 : i32
    %c0_10 = arith.constant 0 : index
    %c0_11 = arith.constant 0 : index
    %c0_12 = arith.constant 0 : index
    %c0_13 = arith.constant 0 : index
    %5 = vector.load %arg4[%c0_10, %c0_11, %c0_12, %c0_13] : memref<3x3x128x128xf32, #tpu.memory_space<vmem>>, vector<1x1x128x128xf32>
    %6 = vector.shape_cast %5 : vector<1x1x128x128xf32> to vector<128x128xf32>
    %c0_i32_14 = arith.constant 0 : i32
    %c11_i32_15 = arith.constant 11 : i32
    %7 = arith.addi %c0_i32_14, %c11_i32_15 : i32
    %c1_i32_16 = arith.constant 1 : i32
    scf.for %arg19 = %c0_i32_14 to %7 step %c1_i32_16  : i32 {
      %101 = arith.index_cast %arg19 : i32 to index
      %c0_198 = arith.constant 0 : index
      %c0_199 = arith.constant 0 : index
      %102 = vector.load %arg15[%101, %c0_198, %c0_199] : memref<11x11x128xf32, #tpu.memory_space<vmem>>, vector<1x11x128xf32>
      %103 = vector.shape_cast %102 : vector<1x11x128xf32> to vector<11x128xf32>
      %c0_i32_200 = arith.constant 0 : i32
      %104 = arith.addi %arg19, %c0_i32_200 : i32
      %105 = arith.index_cast %104 : i32 to index
      %c0_201 = arith.constant 0 : index
      %c0_202 = arith.constant 0 : index
      %106 = vector.load %arg14[%105, %c0_201, %c0_202] : memref<13x13x128xf32, #tpu.memory_space<vmem>>, vector<1x11x128xf32>
      %107 = vector.shape_cast %106 : vector<1x11x128xf32> to vector<11x128xf32>
      %cst_203 = arith.constant dense<0.000000e+00> : vector<11x128xf32>
      %108 = tpu.matmul %107, %6, %cst_203 {dimension_numbers = #tpu.dot_dimension_numbers<[1], [0], [0], [1], [0, 0, 1, 1], [], []>} : vector<11x128xf32>, vector<128x128xf32>, vector<11x128xf32> -> vector<11x128xf32>
      %109 = arith.addf %103, %108 : vector<11x128xf32>
      %110 = arith.index_cast %arg19 : i32 to index
      %c0_204 = arith.constant 0 : index
      %c0_205 = arith.constant 0 : index
      %111 = vector.load %arg15[%110, %c0_204, %c0_205] : memref<11x11x128xf32, #tpu.memory_space<vmem>>, vector<1x11x128xf32>
      %112 = vector.shape_cast %111 : vector<1x11x128xf32> to vector<11x128xf32>
      %113 = vector.shape_cast %109 : vector<11x128xf32> to vector<1x11x128xf32>
      tpu.vector_store %arg15[%110, %c0_204, %c0_205], %113 {strides = array<i32>} : memref<11x11x128xf32, #tpu.memory_space<vmem>>, vector<1x11x128xf32>,
    }
    %c11_i32_17 = arith.constant 11 : i32
    %c0_18 = arith.constant 0 : index
    %c1 = arith.constant 1 : index
    %c0_19 = arith.constant 0 : index
    %c0_20 = arith.constant 0 : index
    %8 = vector.load %arg4[%c0_18, %c1, %c0_19, %c0_20] : memref<3x3x128x128xf32, #tpu.memory_space<vmem>>, vector<1x1x128x128xf32>
    %9 = vector.shape_cast %8 : vector<1x1x128x128xf32> to vector<128x128xf32>
    %c0_i32_21 = arith.constant 0 : i32
    %c11_i32_22 = arith.constant 11 : i32
    %10 = arith.addi %c0_i32_21, %c11_i32_22 : i32
    %c1_i32_23 = arith.constant 1 : i32
    scf.for %arg19 = %c0_i32_21 to %10 step %c1_i32_23  : i32 {
      %101 = arith.index_cast %arg19 : i32 to index
      %c0_198 = arith.constant 0 : index
      %c0_199 = arith.constant 0 : index
      %102 = vector.load %arg15[%101, %c0_198, %c0_199] : memref<11x11x128xf32, #tpu.memory_space<vmem>>, vector<1x11x128xf32>
      %103 = vector.shape_cast %102 : vector<1x11x128xf32> to vector<11x128xf32>
      %c0_i32_200 = arith.constant 0 : i32
      %104 = arith.addi %arg19, %c0_i32_200 : i32
      %105 = arith.index_cast %104 : i32 to index
      %c1_201 = arith.constant 1 : index
      %c0_202 = arith.constant 0 : index
      %106 = vector.load %arg14[%105, %c1_201, %c0_202] : memref<13x13x128xf32, #tpu.memory_space<vmem>>, vector<1x11x128xf32>
      %107 = vector.shape_cast %106 : vector<1x11x128xf32> to vector<11x128xf32>
      %cst_203 = arith.constant dense<0.000000e+00> : vector<11x128xf32>
      %108 = tpu.matmul %107, %9, %cst_203 {dimension_numbers = #tpu.dot_dimension_numbers<[1], [0], [0], [1], [0, 0, 1, 1], [], []>} : vector<11x128xf32>, vector<128x128xf32>, vector<11x128xf32> -> vector<11x128xf32>
      %109 = arith.addf %103, %108 : vector<11x128xf32>
      %110 = arith.index_cast %arg19 : i32 to index
      %c0_204 = arith.constant 0 : index
      %c0_205 = arith.constant 0 : index
      %111 = vector.load %arg15[%110, %c0_204, %c0_205] : memref<11x11x128xf32, #tpu.memory_space<vmem>>, vector<1x11x128xf32>
      %112 = vector.shape_cast %111 : vector<1x11x128xf32> to vector<11x128xf32>
      %113 = vector.shape_cast %109 : vector<11x128xf32> to vector<1x11x128xf32>
      tpu.vector_store %arg15[%110, %c0_204, %c0_205], %113 {strides = array<i32>} : memref<11x11x128xf32, #tpu.memory_space<vmem>>, vector<1x11x128xf32>,
    }
    %c11_i32_24 = arith.constant 11 : i32
    %c0_25 = arith.constant 0 : index
    %c2 = arith.constant 2 : index
    %c0_26 = arith.constant 0 : index
    %c0_27 = arith.constant 0 : index
    %11 = vector.load %arg4[%c0_25, %c2, %c0_26, %c0_27] : memref<3x3x128x128xf32, #tpu.memory_space<vmem>>, vector<1x1x128x128xf32>
    %12 = vector.shape_cast %11 : vector<1x1x128x128xf32> to vector<128x128xf32>
    %c0_i32_28 = arith.constant 0 : i32
    %c11_i32_29 = arith.constant 11 : i32
    %13 = arith.addi %c0_i32_28, %c11_i32_29 : i32
    %c1_i32_30 = arith.constant 1 : i32
    scf.for %arg19 = %c0_i32_28 to %13 step %c1_i32_30  : i32 {
      %101 = arith.index_cast %arg19 : i32 to index
      %c0_198 = arith.constant 0 : index
      %c0_199 = arith.constant 0 : index
      %102 = vector.load %arg15[%101, %c0_198, %c0_199] : memref<11x11x128xf32, #tpu.memory_space<vmem>>, vector<1x11x128xf32>
      %103 = vector.shape_cast %102 : vector<1x11x128xf32> to vector<11x128xf32>
      %c0_i32_200 = arith.constant 0 : i32
      %104 = arith.addi %arg19, %c0_i32_200 : i32
      %105 = arith.index_cast %104 : i32 to index
      %c2_201 = arith.constant 2 : index
      %c0_202 = arith.constant 0 : index
      %106 = vector.load %arg14[%105, %c2_201, %c0_202] : memref<13x13x128xf32, #tpu.memory_space<vmem>>, vector<1x11x128xf32>
      %107 = vector.shape_cast %106 : vector<1x11x128xf32> to vector<11x128xf32>
      %cst_203 = arith.constant dense<0.000000e+00> : vector<11x128xf32>
      %108 = tpu.matmul %107, %12, %cst_203 {dimension_numbers = #tpu.dot_dimension_numbers<[1], [0], [0], [1], [0, 0, 1, 1], [], []>} : vector<11x128xf32>, vector<128x128xf32>, vector<11x128xf32> -> vector<11x128xf32>
      %109 = arith.addf %103, %108 : vector<11x128xf32>
      %110 = arith.index_cast %arg19 : i32 to index
      %c0_204 = arith.constant 0 : index
      %c0_205 = arith.constant 0 : index
      %111 = vector.load %arg15[%110, %c0_204, %c0_205] : memref<11x11x128xf32, #tpu.memory_space<vmem>>, vector<1x11x128xf32>
      %112 = vector.shape_cast %111 : vector<1x11x128xf32> to vector<11x128xf32>
      %113 = vector.shape_cast %109 : vector<11x128xf32> to vector<1x11x128xf32>
      tpu.vector_store %arg15[%110, %c0_204, %c0_205], %113 {strides = array<i32>} : memref<11x11x128xf32, #tpu.memory_space<vmem>>, vector<1x11x128xf32>,
    }
    %c11_i32_31 = arith.constant 11 : i32
    %c1_32 = arith.constant 1 : index
    %c0_33 = arith.constant 0 : index
    %c0_34 = arith.constant 0 : index
    %c0_35 = arith.constant 0 : index
    %14 = vector.load %arg4[%c1_32, %c0_33, %c0_34, %c0_35] : memref<3x3x128x128xf32, #tpu.memory_space<vmem>>, vector<1x1x128x128xf32>
    %15 = vector.shape_cast %14 : vector<1x1x128x128xf32> to vector<128x128xf32>
    %c0_i32_36 = arith.constant 0 : i32
    %c11_i32_37 = arith.constant 11 : i32
    %16 = arith.addi %c0_i32_36, %c11_i32_37 : i32
    %c1_i32_38 = arith.constant 1 : i32
    scf.for %arg19 = %c0_i32_36 to %16 step %c1_i32_38  : i32 {
      %101 = arith.index_cast %arg19 : i32 to index
      %c0_198 = arith.constant 0 : index
      %c0_199 = arith.constant 0 : index
      %102 = vector.load %arg15[%101, %c0_198, %c0_199] : memref<11x11x128xf32, #tpu.memory_space<vmem>>, vector<1x11x128xf32>
      %103 = vector.shape_cast %102 : vector<1x11x128xf32> to vector<11x128xf32>
      %c1_i32_200 = arith.constant 1 : i32
      %104 = arith.addi %arg19, %c1_i32_200 : i32
      %105 = arith.index_cast %104 : i32 to index
      %c0_201 = arith.constant 0 : index
      %c0_202 = arith.constant 0 : index
      %106 = vector.load %arg14[%105, %c0_201, %c0_202] : memref<13x13x128xf32, #tpu.memory_space<vmem>>, vector<1x11x128xf32>
      %107 = vector.shape_cast %106 : vector<1x11x128xf32> to vector<11x128xf32>
      %cst_203 = arith.constant dense<0.000000e+00> : vector<11x128xf32>
      %108 = tpu.matmul %107, %15, %cst_203 {dimension_numbers = #tpu.dot_dimension_numbers<[1], [0], [0], [1], [0, 0, 1, 1], [], []>} : vector<11x128xf32>, vector<128x128xf32>, vector<11x128xf32> -> vector<11x128xf32>
      %109 = arith.addf %103, %108 : vector<11x128xf32>
      %110 = arith.index_cast %arg19 : i32 to index
      %c0_204 = arith.constant 0 : index
      %c0_205 = arith.constant 0 : index
      %111 = vector.load %arg15[%110, %c0_204, %c0_205] : memref<11x11x128xf32, #tpu.memory_space<vmem>>, vector<1x11x128xf32>
      %112 = vector.shape_cast %111 : vector<1x11x128xf32> to vector<11x128xf32>
      %113 = vector.shape_cast %109 : vector<11x128xf32> to vector<1x11x128xf32>
      tpu.vector_store %arg15[%110, %c0_204, %c0_205], %113 {strides = array<i32>} : memref<11x11x128xf32, #tpu.memory_space<vmem>>, vector<1x11x128xf32>,
    }
    %c11_i32_39 = arith.constant 11 : i32
    %c1_40 = arith.constant 1 : index
    %c1_41 = arith.constant 1 : index
    %c0_42 = arith.constant 0 : index
    %c0_43 = arith.constant 0 : index
    %17 = vector.load %arg4[%c1_40, %c1_41, %c0_42, %c0_43] : memref<3x3x128x128xf32, #tpu.memory_space<vmem>>, vector<1x1x128x128xf32>
    %18 = vector.shape_cast %17 : vector<1x1x128x128xf32> to vector<128x128xf32>
    %c0_i32_44 = arith.constant 0 : i32
    %c11_i32_45 = arith.constant 11 : i32
    %19 = arith.addi %c0_i32_44, %c11_i32_45 : i32
    %c1_i32_46 = arith.constant 1 : i32
    scf.for %arg19 = %c0_i32_44 to %19 step %c1_i32_46  : i32 {
      %101 = arith.index_cast %arg19 : i32 to index
      %c0_198 = arith.constant 0 : index
      %c0_199 = arith.constant 0 : index
      %102 = vector.load %arg15[%101, %c0_198, %c0_199] : memref<11x11x128xf32, #tpu.memory_space<vmem>>, vector<1x11x128xf32>
      %103 = vector.shape_cast %102 : vector<1x11x128xf32> to vector<11x128xf32>
      %c1_i32_200 = arith.constant 1 : i32
      %104 = arith.addi %arg19, %c1_i32_200 : i32
      %105 = arith.index_cast %104 : i32 to index
      %c1_201 = arith.constant 1 : index
      %c0_202 = arith.constant 0 : index
      %106 = vector.load %arg14[%105, %c1_201, %c0_202] : memref<13x13x128xf32, #tpu.memory_space<vmem>>, vector<1x11x128xf32>
      %107 = vector.shape_cast %106 : vector<1x11x128xf32> to vector<11x128xf32>
      %cst_203 = arith.constant dense<0.000000e+00> : vector<11x128xf32>
      %108 = tpu.matmul %107, %18, %cst_203 {dimension_numbers = #tpu.dot_dimension_numbers<[1], [0], [0], [1], [0, 0, 1, 1], [], []>} : vector<11x128xf32>, vector<128x128xf32>, vector<11x128xf32> -> vector<11x128xf32>
      %109 = arith.addf %103, %108 : vector<11x128xf32>
      %110 = arith.index_cast %arg19 : i32 to index
      %c0_204 = arith.constant 0 : index
      %c0_205 = arith.constant 0 : index
      %111 = vector.load %arg15[%110, %c0_204, %c0_205] : memref<11x11x128xf32, #tpu.memory_space<vmem>>, vector<1x11x128xf32>
      %112 = vector.shape_cast %111 : vector<1x11x128xf32> to vector<11x128xf32>
      %113 = vector.shape_cast %109 : vector<11x128xf32> to vector<1x11x128xf32>
      tpu.vector_store %arg15[%110, %c0_204, %c0_205], %113 {strides = array<i32>} : memref<11x11x128xf32, #tpu.memory_space<vmem>>, vector<1x11x128xf32>,
    }
    %c11_i32_47 = arith.constant 11 : i32
    %c1_48 = arith.constant 1 : index
    %c2_49 = arith.constant 2 : index
    %c0_50 = arith.constant 0 : index
    %c0_51 = arith.constant 0 : index
    %20 = vector.load %arg4[%c1_48, %c2_49, %c0_50, %c0_51] : memref<3x3x128x128xf32, #tpu.memory_space<vmem>>, vector<1x1x128x128xf32>
    %21 = vector.shape_cast %20 : vector<1x1x128x128xf32> to vector<128x128xf32>
    %c0_i32_52 = arith.constant 0 : i32
    %c11_i32_53 = arith.constant 11 : i32
    %22 = arith.addi %c0_i32_52, %c11_i32_53 : i32
    %c1_i32_54 = arith.constant 1 : i32
    scf.for %arg19 = %c0_i32_52 to %22 step %c1_i32_54  : i32 {
      %101 = arith.index_cast %arg19 : i32 to index
      %c0_198 = arith.constant 0 : index
      %c0_199 = arith.constant 0 : index
      %102 = vector.load %arg15[%101, %c0_198, %c0_199] : memref<11x11x128xf32, #tpu.memory_space<vmem>>, vector<1x11x128xf32>
      %103 = vector.shape_cast %102 : vector<1x11x128xf32> to vector<11x128xf32>
      %c1_i32_200 = arith.constant 1 : i32
      %104 = arith.addi %arg19, %c1_i32_200 : i32
      %105 = arith.index_cast %104 : i32 to index
      %c2_201 = arith.constant 2 : index
      %c0_202 = arith.constant 0 : index
      %106 = vector.load %arg14[%105, %c2_201, %c0_202] : memref<13x13x128xf32, #tpu.memory_space<vmem>>, vector<1x11x128xf32>
      %107 = vector.shape_cast %106 : vector<1x11x128xf32> to vector<11x128xf32>
      %cst_203 = arith.constant dense<0.000000e+00> : vector<11x128xf32>
      %108 = tpu.matmul %107, %21, %cst_203 {dimension_numbers = #tpu.dot_dimension_numbers<[1], [0], [0], [1], [0, 0, 1, 1], [], []>} : vector<11x128xf32>, vector<128x128xf32>, vector<11x128xf32> -> vector<11x128xf32>
      %109 = arith.addf %103, %108 : vector<11x128xf32>
      %110 = arith.index_cast %arg19 : i32 to index
      %c0_204 = arith.constant 0 : index
      %c0_205 = arith.constant 0 : index
      %111 = vector.load %arg15[%110, %c0_204, %c0_205] : memref<11x11x128xf32, #tpu.memory_space<vmem>>, vector<1x11x128xf32>
      %112 = vector.shape_cast %111 : vector<1x11x128xf32> to vector<11x128xf32>
      %113 = vector.shape_cast %109 : vector<11x128xf32> to vector<1x11x128xf32>
      tpu.vector_store %arg15[%110, %c0_204, %c0_205], %113 {strides = array<i32>} : memref<11x11x128xf32, #tpu.memory_space<vmem>>, vector<1x11x128xf32>,
    }
    %c11_i32_55 = arith.constant 11 : i32
    %c2_56 = arith.constant 2 : index
    %c0_57 = arith.constant 0 : index
    %c0_58 = arith.constant 0 : index
    %c0_59 = arith.constant 0 : index
    %23 = vector.load %arg4[%c2_56, %c0_57, %c0_58, %c0_59] : memref<3x3x128x128xf32, #tpu.memory_space<vmem>>, vector<1x1x128x128xf32>
    %24 = vector.shape_cast %23 : vector<1x1x128x128xf32> to vector<128x128xf32>
    %c0_i32_60 = arith.constant 0 : i32
    %c11_i32_61 = arith.constant 11 : i32
    %25 = arith.addi %c0_i32_60, %c11_i32_61 : i32
    %c1_i32_62 = arith.constant 1 : i32
    scf.for %arg19 = %c0_i32_60 to %25 step %c1_i32_62  : i32 {
      %101 = arith.index_cast %arg19 : i32 to index
      %c0_198 = arith.constant 0 : index
      %c0_199 = arith.constant 0 : index
      %102 = vector.load %arg15[%101, %c0_198, %c0_199] : memref<11x11x128xf32, #tpu.memory_space<vmem>>, vector<1x11x128xf32>
      %103 = vector.shape_cast %102 : vector<1x11x128xf32> to vector<11x128xf32>
      %c2_i32_200 = arith.constant 2 : i32
      %104 = arith.addi %arg19, %c2_i32_200 : i32
      %105 = arith.index_cast %104 : i32 to index
      %c0_201 = arith.constant 0 : index
      %c0_202 = arith.constant 0 : index
      %106 = vector.load %arg14[%105, %c0_201, %c0_202] : memref<13x13x128xf32, #tpu.memory_space<vmem>>, vector<1x11x128xf32>
      %107 = vector.shape_cast %106 : vector<1x11x128xf32> to vector<11x128xf32>
      %cst_203 = arith.constant dense<0.000000e+00> : vector<11x128xf32>
      %108 = tpu.matmul %107, %24, %cst_203 {dimension_numbers = #tpu.dot_dimension_numbers<[1], [0], [0], [1], [0, 0, 1, 1], [], []>} : vector<11x128xf32>, vector<128x128xf32>, vector<11x128xf32> -> vector<11x128xf32>
      %109 = arith.addf %103, %108 : vector<11x128xf32>
      %110 = arith.index_cast %arg19 : i32 to index
      %c0_204 = arith.constant 0 : index
      %c0_205 = arith.constant 0 : index
      %111 = vector.load %arg15[%110, %c0_204, %c0_205] : memref<11x11x128xf32, #tpu.memory_space<vmem>>, vector<1x11x128xf32>
      %112 = vector.shape_cast %111 : vector<1x11x128xf32> to vector<11x128xf32>
      %113 = vector.shape_cast %109 : vector<11x128xf32> to vector<1x11x128xf32>
      tpu.vector_store %arg15[%110, %c0_204, %c0_205], %113 {strides = array<i32>} : memref<11x11x128xf32, #tpu.memory_space<vmem>>, vector<1x11x128xf32>,
    }
    %c11_i32_63 = arith.constant 11 : i32
    %c2_64 = arith.constant 2 : index
    %c1_65 = arith.constant 1 : index
    %c0_66 = arith.constant 0 : index
    %c0_67 = arith.constant 0 : index
    %26 = vector.load %arg4[%c2_64, %c1_65, %c0_66, %c0_67] : memref<3x3x128x128xf32, #tpu.memory_space<vmem>>, vector<1x1x128x128xf32>
    %27 = vector.shape_cast %26 : vector<1x1x128x128xf32> to vector<128x128xf32>
    %c0_i32_68 = arith.constant 0 : i32
    %c11_i32_69 = arith.constant 11 : i32
    %28 = arith.addi %c0_i32_68, %c11_i32_69 : i32
    %c1_i32_70 = arith.constant 1 : i32
    scf.for %arg19 = %c0_i32_68 to %28 step %c1_i32_70  : i32 {
      %101 = arith.index_cast %arg19 : i32 to index
      %c0_198 = arith.constant 0 : index
      %c0_199 = arith.constant 0 : index
      %102 = vector.load %arg15[%101, %c0_198, %c0_199] : memref<11x11x128xf32, #tpu.memory_space<vmem>>, vector<1x11x128xf32>
      %103 = vector.shape_cast %102 : vector<1x11x128xf32> to vector<11x128xf32>
      %c2_i32_200 = arith.constant 2 : i32
      %104 = arith.addi %arg19, %c2_i32_200 : i32
      %105 = arith.index_cast %104 : i32 to index
      %c1_201 = arith.constant 1 : index
      %c0_202 = arith.constant 0 : index
      %106 = vector.load %arg14[%105, %c1_201, %c0_202] : memref<13x13x128xf32, #tpu.memory_space<vmem>>, vector<1x11x128xf32>
      %107 = vector.shape_cast %106 : vector<1x11x128xf32> to vector<11x128xf32>
      %cst_203 = arith.constant dense<0.000000e+00> : vector<11x128xf32>
      %108 = tpu.matmul %107, %27, %cst_203 {dimension_numbers = #tpu.dot_dimension_numbers<[1], [0], [0], [1], [0, 0, 1, 1], [], []>} : vector<11x128xf32>, vector<128x128xf32>, vector<11x128xf32> -> vector<11x128xf32>
      %109 = arith.addf %103, %108 : vector<11x128xf32>
      %110 = arith.index_cast %arg19 : i32 to index
      %c0_204 = arith.constant 0 : index
      %c0_205 = arith.constant 0 : index
      %111 = vector.load %arg15[%110, %c0_204, %c0_205] : memref<11x11x128xf32, #tpu.memory_space<vmem>>, vector<1x11x128xf32>
      %112 = vector.shape_cast %111 : vector<1x11x128xf32> to vector<11x128xf32>
      %113 = vector.shape_cast %109 : vector<11x128xf32> to vector<1x11x128xf32>
      tpu.vector_store %arg15[%110, %c0_204, %c0_205], %113 {strides = array<i32>} : memref<11x11x128xf32, #tpu.memory_space<vmem>>, vector<1x11x128xf32>,
    }
    %c11_i32_71 = arith.constant 11 : i32
    %c2_72 = arith.constant 2 : index
    %c2_73 = arith.constant 2 : index
    %c0_74 = arith.constant 0 : index
    %c0_75 = arith.constant 0 : index
    %29 = vector.load %arg4[%c2_72, %c2_73, %c0_74, %c0_75] : memref<3x3x128x128xf32, #tpu.memory_space<vmem>>, vector<1x1x128x128xf32>
    %30 = vector.shape_cast %29 : vector<1x1x128x128xf32> to vector<128x128xf32>
    %c0_i32_76 = arith.constant 0 : i32
    %c11_i32_77 = arith.constant 11 : i32
    %31 = arith.addi %c0_i32_76, %c11_i32_77 : i32
    %c1_i32_78 = arith.constant 1 : i32
    scf.for %arg19 = %c0_i32_76 to %31 step %c1_i32_78  : i32 {
      %101 = arith.index_cast %arg19 : i32 to index
      %c0_198 = arith.constant 0 : index
      %c0_199 = arith.constant 0 : index
      %102 = vector.load %arg15[%101, %c0_198, %c0_199] : memref<11x11x128xf32, #tpu.memory_space<vmem>>, vector<1x11x128xf32>
      %103 = vector.shape_cast %102 : vector<1x11x128xf32> to vector<11x128xf32>
      %c2_i32_200 = arith.constant 2 : i32
      %104 = arith.addi %arg19, %c2_i32_200 : i32
      %105 = arith.index_cast %104 : i32 to index
      %c2_201 = arith.constant 2 : index
      %c0_202 = arith.constant 0 : index
      %106 = vector.load %arg14[%105, %c2_201, %c0_202] : memref<13x13x128xf32, #tpu.memory_space<vmem>>, vector<1x11x128xf32>
      %107 = vector.shape_cast %106 : vector<1x11x128xf32> to vector<11x128xf32>
      %cst_203 = arith.constant dense<0.000000e+00> : vector<11x128xf32>
      %108 = tpu.matmul %107, %30, %cst_203 {dimension_numbers = #tpu.dot_dimension_numbers<[1], [0], [0], [1], [0, 0, 1, 1], [], []>} : vector<11x128xf32>, vector<128x128xf32>, vector<11x128xf32> -> vector<11x128xf32>
      %109 = arith.addf %103, %108 : vector<11x128xf32>
      %110 = arith.index_cast %arg19 : i32 to index
      %c0_204 = arith.constant 0 : index
      %c0_205 = arith.constant 0 : index
      %111 = vector.load %arg15[%110, %c0_204, %c0_205] : memref<11x11x128xf32, #tpu.memory_space<vmem>>, vector<1x11x128xf32>
      %112 = vector.shape_cast %111 : vector<1x11x128xf32> to vector<11x128xf32>
      %113 = vector.shape_cast %109 : vector<11x128xf32> to vector<1x11x128xf32>
      tpu.vector_store %arg15[%110, %c0_204, %c0_205], %113 {strides = array<i32>} : memref<11x11x128xf32, #tpu.memory_space<vmem>>, vector<1x11x128xf32>,
    }
    %c11_i32_79 = arith.constant 11 : i32
    %c0_i32_80 = arith.constant 0 : i32
    %c11_i32_81 = arith.constant 11 : i32
    %32 = arith.addi %c0_i32_80, %c11_i32_81 : i32
    %c1_i32_82 = arith.constant 1 : i32
    scf.for %arg19 = %c0_i32_80 to %32 step %c1_i32_82  : i32 {
      %101 = arith.index_cast %arg19 : i32 to index
      %c0_198 = arith.constant 0 : index
      %c0_199 = arith.constant 0 : index
      %102 = vector.load %arg15[%101, %c0_198, %c0_199] : memref<11x11x128xf32, #tpu.memory_space<vmem>>, vector<1x11x128xf32>
      %103 = vector.shape_cast %102 : vector<1x11x128xf32> to vector<11x128xf32>
      %cst_200 = arith.constant 0.000000e+00 : f32
      %104 = vector.broadcast %cst_200 : f32 to vector<11x128xf32>
      %105 = arith.maximumf %103, %104 : vector<11x128xf32>
      %106 = arith.index_cast %arg19 : i32 to index
      %c0_201 = arith.constant 0 : index
      %c0_202 = arith.constant 0 : index
      %107 = vector.load %arg15[%106, %c0_201, %c0_202] : memref<11x11x128xf32, #tpu.memory_space<vmem>>, vector<1x11x128xf32>
      %108 = vector.shape_cast %107 : vector<1x11x128xf32> to vector<11x128xf32>
      %109 = vector.shape_cast %105 : vector<11x128xf32> to vector<1x11x128xf32>
      tpu.vector_store %arg15[%106, %c0_201, %c0_202], %109 {strides = array<i32>} : memref<11x11x128xf32, #tpu.memory_space<vmem>>, vector<1x11x128xf32>,
    }
    %c11_i32_83 = arith.constant 11 : i32
    %c0_i32_84 = arith.constant 0 : i32
    %c5_i32 = arith.constant 5 : i32
    %33 = arith.addi %c0_i32_84, %c5_i32 : i32
    %c1_i32_85 = arith.constant 1 : i32
    scf.for %arg19 = %c0_i32_84 to %33 step %c1_i32_85  : i32 {
      %c2_i32_198 = arith.constant 2 : i32
      %101 = arith.muli %c2_i32_198, %arg19 : i32
      %102 = arith.index_cast %101 : i32 to index
      %c0_199 = arith.constant 0 : index
      %c0_200 = arith.constant 0 : index
      %103 = tpu.strided_load %arg15[%102, %c0_199, %c0_200] {strides = array<i32: 1, 2, 1>} : memref<11x11x128xf32, #tpu.memory_space<vmem>>, vector<1x5x128xf32>
      %104 = vector.shape_cast %103 : vector<1x5x128xf32> to vector<5x128xf32>
      %105 = arith.index_cast %101 : i32 to index
      %c1_201 = arith.constant 1 : index
      %c0_202 = arith.constant 0 : index
      %106 = tpu.strided_load %arg15[%105, %c1_201, %c0_202] {strides = array<i32: 1, 2, 1>} : memref<11x11x128xf32, #tpu.memory_space<vmem>>, vector<1x5x128xf32>
      %107 = vector.shape_cast %106 : vector<1x5x128xf32> to vector<5x128xf32>
      %c1_i32_203 = arith.constant 1 : i32
      %108 = arith.addi %101, %c1_i32_203 : i32
      %109 = arith.index_cast %108 : i32 to index
      %c0_204 = arith.constant 0 : index
      %c0_205 = arith.constant 0 : index
      %110 = tpu.strided_load %arg15[%109, %c0_204, %c0_205] {strides = array<i32: 1, 2, 1>} : memref<11x11x128xf32, #tpu.memory_space<vmem>>, vector<1x5x128xf32>
      %111 = vector.shape_cast %110 : vector<1x5x128xf32> to vector<5x128xf32>
      %c1_i32_206 = arith.constant 1 : i32
      %112 = arith.addi %101, %c1_i32_206 : i32
      %113 = arith.index_cast %112 : i32 to index
      %c1_207 = arith.constant 1 : index
      %c0_208 = arith.constant 0 : index
      %114 = tpu.strided_load %arg15[%113, %c1_207, %c0_208] {strides = array<i32: 1, 2, 1>} : memref<11x11x128xf32, #tpu.memory_space<vmem>>, vector<1x5x128xf32>
      %115 = vector.shape_cast %114 : vector<1x5x128xf32> to vector<5x128xf32>
      %116 = arith.maximumf %104, %107 : vector<5x128xf32>
      %117 = arith.maximumf %111, %115 : vector<5x128xf32>
      %118 = arith.maximumf %116, %117 : vector<5x128xf32>
      %119 = arith.index_cast %arg19 : i32 to index
      %c0_209 = arith.constant 0 : index
      %c0_210 = arith.constant 0 : index
      %120 = vector.load %arg16[%119, %c0_209, %c0_210] : memref<5x5x128xf32, #tpu.memory_space<vmem>>, vector<1x5x128xf32>
      %121 = vector.shape_cast %120 : vector<1x5x128xf32> to vector<5x128xf32>
      %122 = vector.shape_cast %118 : vector<5x128xf32> to vector<1x5x128xf32>
      tpu.vector_store %arg16[%119, %c0_209, %c0_210], %122 {strides = array<i32>} : memref<5x5x128xf32, #tpu.memory_space<vmem>>, vector<1x5x128xf32>,
    }
    %c5_i32_86 = arith.constant 5 : i32
    %c0_87 = arith.constant 0 : index
    %c0_88 = arith.constant 0 : index
    %34 = vector.load %arg7[%c0_87, %c0_88] : memref<1x128xf32, #tpu.memory_space<vmem>>, vector<1x128xf32>
    %c0_i32_89 = arith.constant 0 : i32
    %c3_i32 = arith.constant 3 : i32
    %35 = arith.addi %c0_i32_89, %c3_i32 : i32
    %c1_i32_90 = arith.constant 1 : i32
    scf.for %arg19 = %c0_i32_89 to %35 step %c1_i32_90  : i32 {
      %101 = vector.shape_cast %34 : vector<1x128xf32> to vector<1x128xf32>
      %102 = vector.broadcast %101 : vector<1x128xf32> to vector<3x128xf32>
      %103 = arith.index_cast %arg19 : i32 to index
      %c0_198 = arith.constant 0 : index
      %c0_199 = arith.constant 0 : index
      %104 = vector.load %arg17[%103, %c0_198, %c0_199] : memref<3x3x128xf32, #tpu.memory_space<vmem>>, vector<1x3x128xf32>
      %105 = vector.shape_cast %104 : vector<1x3x128xf32> to vector<3x128xf32>
      %106 = vector.shape_cast %102 : vector<3x128xf32> to vector<1x3x128xf32>
      tpu.vector_store %arg17[%103, %c0_198, %c0_199], %106 {strides = array<i32>} : memref<3x3x128xf32, #tpu.memory_space<vmem>>, vector<1x3x128xf32>,
    }
    %c3_i32_91 = arith.constant 3 : i32
    %c0_92 = arith.constant 0 : index
    %c0_93 = arith.constant 0 : index
    %c0_94 = arith.constant 0 : index
    %c0_95 = arith.constant 0 : index
    %36 = vector.load %arg6[%c0_92, %c0_93, %c0_94, %c0_95] : memref<3x3x128x128xf32, #tpu.memory_space<vmem>>, vector<1x1x128x128xf32>
    %37 = vector.shape_cast %36 : vector<1x1x128x128xf32> to vector<128x128xf32>
    %c0_i32_96 = arith.constant 0 : i32
    %c3_i32_97 = arith.constant 3 : i32
    %38 = arith.addi %c0_i32_96, %c3_i32_97 : i32
    %c1_i32_98 = arith.constant 1 : i32
    scf.for %arg19 = %c0_i32_96 to %38 step %c1_i32_98  : i32 {
      %101 = arith.index_cast %arg19 : i32 to index
      %c0_198 = arith.constant 0 : index
      %c0_199 = arith.constant 0 : index
      %102 = vector.load %arg17[%101, %c0_198, %c0_199] : memref<3x3x128xf32, #tpu.memory_space<vmem>>, vector<1x3x128xf32>
      %103 = vector.shape_cast %102 : vector<1x3x128xf32> to vector<3x128xf32>
      %c0_i32_200 = arith.constant 0 : i32
      %104 = arith.addi %arg19, %c0_i32_200 : i32
      %105 = arith.index_cast %104 : i32 to index
      %c0_201 = arith.constant 0 : index
      %c0_202 = arith.constant 0 : index
      %106 = vector.load %arg16[%105, %c0_201, %c0_202] : memref<5x5x128xf32, #tpu.memory_space<vmem>>, vector<1x3x128xf32>
      %107 = vector.shape_cast %106 : vector<1x3x128xf32> to vector<3x128xf32>
      %cst_203 = arith.constant dense<0.000000e+00> : vector<3x128xf32>
      %108 = tpu.matmul %107, %37, %cst_203 {dimension_numbers = #tpu.dot_dimension_numbers<[1], [0], [0], [1], [0, 0, 1, 1], [], []>} : vector<3x128xf32>, vector<128x128xf32>, vector<3x128xf32> -> vector<3x128xf32>
      %109 = arith.addf %103, %108 : vector<3x128xf32>
      %110 = arith.index_cast %arg19 : i32 to index
      %c0_204 = arith.constant 0 : index
      %c0_205 = arith.constant 0 : index
      %111 = vector.load %arg17[%110, %c0_204, %c0_205] : memref<3x3x128xf32, #tpu.memory_space<vmem>>, vector<1x3x128xf32>
      %112 = vector.shape_cast %111 : vector<1x3x128xf32> to vector<3x128xf32>
      %113 = vector.shape_cast %109 : vector<3x128xf32> to vector<1x3x128xf32>
      tpu.vector_store %arg17[%110, %c0_204, %c0_205], %113 {strides = array<i32>} : memref<3x3x128xf32, #tpu.memory_space<vmem>>, vector<1x3x128xf32>,
    }
    %c3_i32_99 = arith.constant 3 : i32
    %c0_100 = arith.constant 0 : index
    %c1_101 = arith.constant 1 : index
    %c0_102 = arith.constant 0 : index
    %c0_103 = arith.constant 0 : index
    %39 = vector.load %arg6[%c0_100, %c1_101, %c0_102, %c0_103] : memref<3x3x128x128xf32, #tpu.memory_space<vmem>>, vector<1x1x128x128xf32>
    %40 = vector.shape_cast %39 : vector<1x1x128x128xf32> to vector<128x128xf32>
    %c0_i32_104 = arith.constant 0 : i32
    %c3_i32_105 = arith.constant 3 : i32
    %41 = arith.addi %c0_i32_104, %c3_i32_105 : i32
    %c1_i32_106 = arith.constant 1 : i32
    scf.for %arg19 = %c0_i32_104 to %41 step %c1_i32_106  : i32 {
      %101 = arith.index_cast %arg19 : i32 to index
      %c0_198 = arith.constant 0 : index
      %c0_199 = arith.constant 0 : index
      %102 = vector.load %arg17[%101, %c0_198, %c0_199] : memref<3x3x128xf32, #tpu.memory_space<vmem>>, vector<1x3x128xf32>
      %103 = vector.shape_cast %102 : vector<1x3x128xf32> to vector<3x128xf32>
      %c0_i32_200 = arith.constant 0 : i32
      %104 = arith.addi %arg19, %c0_i32_200 : i32
      %105 = arith.index_cast %104 : i32 to index
      %c1_201 = arith.constant 1 : index
      %c0_202 = arith.constant 0 : index
      %106 = vector.load %arg16[%105, %c1_201, %c0_202] : memref<5x5x128xf32, #tpu.memory_space<vmem>>, vector<1x3x128xf32>
      %107 = vector.shape_cast %106 : vector<1x3x128xf32> to vector<3x128xf32>
      %cst_203 = arith.constant dense<0.000000e+00> : vector<3x128xf32>
      %108 = tpu.matmul %107, %40, %cst_203 {dimension_numbers = #tpu.dot_dimension_numbers<[1], [0], [0], [1], [0, 0, 1, 1], [], []>} : vector<3x128xf32>, vector<128x128xf32>, vector<3x128xf32> -> vector<3x128xf32>
      %109 = arith.addf %103, %108 : vector<3x128xf32>
      %110 = arith.index_cast %arg19 : i32 to index
      %c0_204 = arith.constant 0 : index
      %c0_205 = arith.constant 0 : index
      %111 = vector.load %arg17[%110, %c0_204, %c0_205] : memref<3x3x128xf32, #tpu.memory_space<vmem>>, vector<1x3x128xf32>
      %112 = vector.shape_cast %111 : vector<1x3x128xf32> to vector<3x128xf32>
      %113 = vector.shape_cast %109 : vector<3x128xf32> to vector<1x3x128xf32>
      tpu.vector_store %arg17[%110, %c0_204, %c0_205], %113 {strides = array<i32>} : memref<3x3x128xf32, #tpu.memory_space<vmem>>, vector<1x3x128xf32>,
    }
    %c3_i32_107 = arith.constant 3 : i32
    %c0_108 = arith.constant 0 : index
    %c2_109 = arith.constant 2 : index
    %c0_110 = arith.constant 0 : index
    %c0_111 = arith.constant 0 : index
    %42 = vector.load %arg6[%c0_108, %c2_109, %c0_110, %c0_111] : memref<3x3x128x128xf32, #tpu.memory_space<vmem>>, vector<1x1x128x128xf32>
    %43 = vector.shape_cast %42 : vector<1x1x128x128xf32> to vector<128x128xf32>
    %c0_i32_112 = arith.constant 0 : i32
    %c3_i32_113 = arith.constant 3 : i32
    %44 = arith.addi %c0_i32_112, %c3_i32_113 : i32
    %c1_i32_114 = arith.constant 1 : i32
    scf.for %arg19 = %c0_i32_112 to %44 step %c1_i32_114  : i32 {
      %101 = arith.index_cast %arg19 : i32 to index
      %c0_198 = arith.constant 0 : index
      %c0_199 = arith.constant 0 : index
      %102 = vector.load %arg17[%101, %c0_198, %c0_199] : memref<3x3x128xf32, #tpu.memory_space<vmem>>, vector<1x3x128xf32>
      %103 = vector.shape_cast %102 : vector<1x3x128xf32> to vector<3x128xf32>
      %c0_i32_200 = arith.constant 0 : i32
      %104 = arith.addi %arg19, %c0_i32_200 : i32
      %105 = arith.index_cast %104 : i32 to index
      %c2_201 = arith.constant 2 : index
      %c0_202 = arith.constant 0 : index
      %106 = vector.load %arg16[%105, %c2_201, %c0_202] : memref<5x5x128xf32, #tpu.memory_space<vmem>>, vector<1x3x128xf32>
      %107 = vector.shape_cast %106 : vector<1x3x128xf32> to vector<3x128xf32>
      %cst_203 = arith.constant dense<0.000000e+00> : vector<3x128xf32>
      %108 = tpu.matmul %107, %43, %cst_203 {dimension_numbers = #tpu.dot_dimension_numbers<[1], [0], [0], [1], [0, 0, 1, 1], [], []>} : vector<3x128xf32>, vector<128x128xf32>, vector<3x128xf32> -> vector<3x128xf32>
      %109 = arith.addf %103, %108 : vector<3x128xf32>
      %110 = arith.index_cast %arg19 : i32 to index
      %c0_204 = arith.constant 0 : index
      %c0_205 = arith.constant 0 : index
      %111 = vector.load %arg17[%110, %c0_204, %c0_205] : memref<3x3x128xf32, #tpu.memory_space<vmem>>, vector<1x3x128xf32>
      %112 = vector.shape_cast %111 : vector<1x3x128xf32> to vector<3x128xf32>
      %113 = vector.shape_cast %109 : vector<3x128xf32> to vector<1x3x128xf32>
      tpu.vector_store %arg17[%110, %c0_204, %c0_205], %113 {strides = array<i32>} : memref<3x3x128xf32, #tpu.memory_space<vmem>>, vector<1x3x128xf32>,
    }
    %c3_i32_115 = arith.constant 3 : i32
    %c1_116 = arith.constant 1 : index
    %c0_117 = arith.constant 0 : index
    %c0_118 = arith.constant 0 : index
    %c0_119 = arith.constant 0 : index
    %45 = vector.load %arg6[%c1_116, %c0_117, %c0_118, %c0_119] : memref<3x3x128x128xf32, #tpu.memory_space<vmem>>, vector<1x1x128x128xf32>
    %46 = vector.shape_cast %45 : vector<1x1x128x128xf32> to vector<128x128xf32>
    %c0_i32_120 = arith.constant 0 : i32
    %c3_i32_121 = arith.constant 3 : i32
    %47 = arith.addi %c0_i32_120, %c3_i32_121 : i32
    %c1_i32_122 = arith.constant 1 : i32
    scf.for %arg19 = %c0_i32_120 to %47 step %c1_i32_122  : i32 {
      %101 = arith.index_cast %arg19 : i32 to index
      %c0_198 = arith.constant 0 : index
      %c0_199 = arith.constant 0 : index
      %102 = vector.load %arg17[%101, %c0_198, %c0_199] : memref<3x3x128xf32, #tpu.memory_space<vmem>>, vector<1x3x128xf32>
      %103 = vector.shape_cast %102 : vector<1x3x128xf32> to vector<3x128xf32>
      %c1_i32_200 = arith.constant 1 : i32
      %104 = arith.addi %arg19, %c1_i32_200 : i32
      %105 = arith.index_cast %104 : i32 to index
      %c0_201 = arith.constant 0 : index
      %c0_202 = arith.constant 0 : index
      %106 = vector.load %arg16[%105, %c0_201, %c0_202] : memref<5x5x128xf32, #tpu.memory_space<vmem>>, vector<1x3x128xf32>
      %107 = vector.shape_cast %106 : vector<1x3x128xf32> to vector<3x128xf32>
      %cst_203 = arith.constant dense<0.000000e+00> : vector<3x128xf32>
      %108 = tpu.matmul %107, %46, %cst_203 {dimension_numbers = #tpu.dot_dimension_numbers<[1], [0], [0], [1], [0, 0, 1, 1], [], []>} : vector<3x128xf32>, vector<128x128xf32>, vector<3x128xf32> -> vector<3x128xf32>
      %109 = arith.addf %103, %108 : vector<3x128xf32>
      %110 = arith.index_cast %arg19 : i32 to index
      %c0_204 = arith.constant 0 : index
      %c0_205 = arith.constant 0 : index
      %111 = vector.load %arg17[%110, %c0_204, %c0_205] : memref<3x3x128xf32, #tpu.memory_space<vmem>>, vector<1x3x128xf32>
      %112 = vector.shape_cast %111 : vector<1x3x128xf32> to vector<3x128xf32>
      %113 = vector.shape_cast %109 : vector<3x128xf32> to vector<1x3x128xf32>
      tpu.vector_store %arg17[%110, %c0_204, %c0_205], %113 {strides = array<i32>} : memref<3x3x128xf32, #tpu.memory_space<vmem>>, vector<1x3x128xf32>,
    }
    %c3_i32_123 = arith.constant 3 : i32
    %c1_124 = arith.constant 1 : index
    %c1_125 = arith.constant 1 : index
    %c0_126 = arith.constant 0 : index
    %c0_127 = arith.constant 0 : index
    %48 = vector.load %arg6[%c1_124, %c1_125, %c0_126, %c0_127] : memref<3x3x128x128xf32, #tpu.memory_space<vmem>>, vector<1x1x128x128xf32>
    %49 = vector.shape_cast %48 : vector<1x1x128x128xf32> to vector<128x128xf32>
    %c0_i32_128 = arith.constant 0 : i32
    %c3_i32_129 = arith.constant 3 : i32
    %50 = arith.addi %c0_i32_128, %c3_i32_129 : i32
    %c1_i32_130 = arith.constant 1 : i32
    scf.for %arg19 = %c0_i32_128 to %50 step %c1_i32_130  : i32 {
      %101 = arith.index_cast %arg19 : i32 to index
      %c0_198 = arith.constant 0 : index
      %c0_199 = arith.constant 0 : index
      %102 = vector.load %arg17[%101, %c0_198, %c0_199] : memref<3x3x128xf32, #tpu.memory_space<vmem>>, vector<1x3x128xf32>
      %103 = vector.shape_cast %102 : vector<1x3x128xf32> to vector<3x128xf32>
      %c1_i32_200 = arith.constant 1 : i32
      %104 = arith.addi %arg19, %c1_i32_200 : i32
      %105 = arith.index_cast %104 : i32 to index
      %c1_201 = arith.constant 1 : index
      %c0_202 = arith.constant 0 : index
      %106 = vector.load %arg16[%105, %c1_201, %c0_202] : memref<5x5x128xf32, #tpu.memory_space<vmem>>, vector<1x3x128xf32>
      %107 = vector.shape_cast %106 : vector<1x3x128xf32> to vector<3x128xf32>
      %cst_203 = arith.constant dense<0.000000e+00> : vector<3x128xf32>
      %108 = tpu.matmul %107, %49, %cst_203 {dimension_numbers = #tpu.dot_dimension_numbers<[1], [0], [0], [1], [0, 0, 1, 1], [], []>} : vector<3x128xf32>, vector<128x128xf32>, vector<3x128xf32> -> vector<3x128xf32>
      %109 = arith.addf %103, %108 : vector<3x128xf32>
      %110 = arith.index_cast %arg19 : i32 to index
      %c0_204 = arith.constant 0 : index
      %c0_205 = arith.constant 0 : index
      %111 = vector.load %arg17[%110, %c0_204, %c0_205] : memref<3x3x128xf32, #tpu.memory_space<vmem>>, vector<1x3x128xf32>
      %112 = vector.shape_cast %111 : vector<1x3x128xf32> to vector<3x128xf32>
      %113 = vector.shape_cast %109 : vector<3x128xf32> to vector<1x3x128xf32>
      tpu.vector_store %arg17[%110, %c0_204, %c0_205], %113 {strides = array<i32>} : memref<3x3x128xf32, #tpu.memory_space<vmem>>, vector<1x3x128xf32>,
    }
    %c3_i32_131 = arith.constant 3 : i32
    %c1_132 = arith.constant 1 : index
    %c2_133 = arith.constant 2 : index
    %c0_134 = arith.constant 0 : index
    %c0_135 = arith.constant 0 : index
    %51 = vector.load %arg6[%c1_132, %c2_133, %c0_134, %c0_135] : memref<3x3x128x128xf32, #tpu.memory_space<vmem>>, vector<1x1x128x128xf32>
    %52 = vector.shape_cast %51 : vector<1x1x128x128xf32> to vector<128x128xf32>
    %c0_i32_136 = arith.constant 0 : i32
    %c3_i32_137 = arith.constant 3 : i32
    %53 = arith.addi %c0_i32_136, %c3_i32_137 : i32
    %c1_i32_138 = arith.constant 1 : i32
    scf.for %arg19 = %c0_i32_136 to %53 step %c1_i32_138  : i32 {
      %101 = arith.index_cast %arg19 : i32 to index
      %c0_198 = arith.constant 0 : index
      %c0_199 = arith.constant 0 : index
      %102 = vector.load %arg17[%101, %c0_198, %c0_199] : memref<3x3x128xf32, #tpu.memory_space<vmem>>, vector<1x3x128xf32>
      %103 = vector.shape_cast %102 : vector<1x3x128xf32> to vector<3x128xf32>
      %c1_i32_200 = arith.constant 1 : i32
      %104 = arith.addi %arg19, %c1_i32_200 : i32
      %105 = arith.index_cast %104 : i32 to index
      %c2_201 = arith.constant 2 : index
      %c0_202 = arith.constant 0 : index
      %106 = vector.load %arg16[%105, %c2_201, %c0_202] : memref<5x5x128xf32, #tpu.memory_space<vmem>>, vector<1x3x128xf32>
      %107 = vector.shape_cast %106 : vector<1x3x128xf32> to vector<3x128xf32>
      %cst_203 = arith.constant dense<0.000000e+00> : vector<3x128xf32>
      %108 = tpu.matmul %107, %52, %cst_203 {dimension_numbers = #tpu.dot_dimension_numbers<[1], [0], [0], [1], [0, 0, 1, 1], [], []>} : vector<3x128xf32>, vector<128x128xf32>, vector<3x128xf32> -> vector<3x128xf32>
      %109 = arith.addf %103, %108 : vector<3x128xf32>
      %110 = arith.index_cast %arg19 : i32 to index
      %c0_204 = arith.constant 0 : index
      %c0_205 = arith.constant 0 : index
      %111 = vector.load %arg17[%110, %c0_204, %c0_205] : memref<3x3x128xf32, #tpu.memory_space<vmem>>, vector<1x3x128xf32>
      %112 = vector.shape_cast %111 : vector<1x3x128xf32> to vector<3x128xf32>
      %113 = vector.shape_cast %109 : vector<3x128xf32> to vector<1x3x128xf32>
      tpu.vector_store %arg17[%110, %c0_204, %c0_205], %113 {strides = array<i32>} : memref<3x3x128xf32, #tpu.memory_space<vmem>>, vector<1x3x128xf32>,
    }
    %c3_i32_139 = arith.constant 3 : i32
    %c2_140 = arith.constant 2 : index
    %c0_141 = arith.constant 0 : index
    %c0_142 = arith.constant 0 : index
    %c0_143 = arith.constant 0 : index
    %54 = vector.load %arg6[%c2_140, %c0_141, %c0_142, %c0_143] : memref<3x3x128x128xf32, #tpu.memory_space<vmem>>, vector<1x1x128x128xf32>
    %55 = vector.shape_cast %54 : vector<1x1x128x128xf32> to vector<128x128xf32>
    %c0_i32_144 = arith.constant 0 : i32
    %c3_i32_145 = arith.constant 3 : i32
    %56 = arith.addi %c0_i32_144, %c3_i32_145 : i32
    %c1_i32_146 = arith.constant 1 : i32
    scf.for %arg19 = %c0_i32_144 to %56 step %c1_i32_146  : i32 {
      %101 = arith.index_cast %arg19 : i32 to index
      %c0_198 = arith.constant 0 : index
      %c0_199 = arith.constant 0 : index
      %102 = vector.load %arg17[%101, %c0_198, %c0_199] : memref<3x3x128xf32, #tpu.memory_space<vmem>>, vector<1x3x128xf32>
      %103 = vector.shape_cast %102 : vector<1x3x128xf32> to vector<3x128xf32>
      %c2_i32_200 = arith.constant 2 : i32
      %104 = arith.addi %arg19, %c2_i32_200 : i32
      %105 = arith.index_cast %104 : i32 to index
      %c0_201 = arith.constant 0 : index
      %c0_202 = arith.constant 0 : index
      %106 = vector.load %arg16[%105, %c0_201, %c0_202] : memref<5x5x128xf32, #tpu.memory_space<vmem>>, vector<1x3x128xf32>
      %107 = vector.shape_cast %106 : vector<1x3x128xf32> to vector<3x128xf32>
      %cst_203 = arith.constant dense<0.000000e+00> : vector<3x128xf32>
      %108 = tpu.matmul %107, %55, %cst_203 {dimension_numbers = #tpu.dot_dimension_numbers<[1], [0], [0], [1], [0, 0, 1, 1], [], []>} : vector<3x128xf32>, vector<128x128xf32>, vector<3x128xf32> -> vector<3x128xf32>
      %109 = arith.addf %103, %108 : vector<3x128xf32>
      %110 = arith.index_cast %arg19 : i32 to index
      %c0_204 = arith.constant 0 : index
      %c0_205 = arith.constant 0 : index
      %111 = vector.load %arg17[%110, %c0_204, %c0_205] : memref<3x3x128xf32, #tpu.memory_space<vmem>>, vector<1x3x128xf32>
      %112 = vector.shape_cast %111 : vector<1x3x128xf32> to vector<3x128xf32>
      %113 = vector.shape_cast %109 : vector<3x128xf32> to vector<1x3x128xf32>
      tpu.vector_store %arg17[%110, %c0_204, %c0_205], %113 {strides = array<i32>} : memref<3x3x128xf32, #tpu.memory_space<vmem>>, vector<1x3x128xf32>,
    }
    %c3_i32_147 = arith.constant 3 : i32
    %c2_148 = arith.constant 2 : index
    %c1_149 = arith.constant 1 : index
    %c0_150 = arith.constant 0 : index
    %c0_151 = arith.constant 0 : index
    %57 = vector.load %arg6[%c2_148, %c1_149, %c0_150, %c0_151] : memref<3x3x128x128xf32, #tpu.memory_space<vmem>>, vector<1x1x128x128xf32>
    %58 = vector.shape_cast %57 : vector<1x1x128x128xf32> to vector<128x128xf32>
    %c0_i32_152 = arith.constant 0 : i32
    %c3_i32_153 = arith.constant 3 : i32
    %59 = arith.addi %c0_i32_152, %c3_i32_153 : i32
    %c1_i32_154 = arith.constant 1 : i32
    scf.for %arg19 = %c0_i32_152 to %59 step %c1_i32_154  : i32 {
      %101 = arith.index_cast %arg19 : i32 to index
      %c0_198 = arith.constant 0 : index
      %c0_199 = arith.constant 0 : index
      %102 = vector.load %arg17[%101, %c0_198, %c0_199] : memref<3x3x128xf32, #tpu.memory_space<vmem>>, vector<1x3x128xf32>
      %103 = vector.shape_cast %102 : vector<1x3x128xf32> to vector<3x128xf32>
      %c2_i32_200 = arith.constant 2 : i32
      %104 = arith.addi %arg19, %c2_i32_200 : i32
      %105 = arith.index_cast %104 : i32 to index
      %c1_201 = arith.constant 1 : index
      %c0_202 = arith.constant 0 : index
      %106 = vector.load %arg16[%105, %c1_201, %c0_202] : memref<5x5x128xf32, #tpu.memory_space<vmem>>, vector<1x3x128xf32>
      %107 = vector.shape_cast %106 : vector<1x3x128xf32> to vector<3x128xf32>
      %cst_203 = arith.constant dense<0.000000e+00> : vector<3x128xf32>
      %108 = tpu.matmul %107, %58, %cst_203 {dimension_numbers = #tpu.dot_dimension_numbers<[1], [0], [0], [1], [0, 0, 1, 1], [], []>} : vector<3x128xf32>, vector<128x128xf32>, vector<3x128xf32> -> vector<3x128xf32>
      %109 = arith.addf %103, %108 : vector<3x128xf32>
      %110 = arith.index_cast %arg19 : i32 to index
      %c0_204 = arith.constant 0 : index
      %c0_205 = arith.constant 0 : index
      %111 = vector.load %arg17[%110, %c0_204, %c0_205] : memref<3x3x128xf32, #tpu.memory_space<vmem>>, vector<1x3x128xf32>
      %112 = vector.shape_cast %111 : vector<1x3x128xf32> to vector<3x128xf32>
      %113 = vector.shape_cast %109 : vector<3x128xf32> to vector<1x3x128xf32>
      tpu.vector_store %arg17[%110, %c0_204, %c0_205], %113 {strides = array<i32>} : memref<3x3x128xf32, #tpu.memory_space<vmem>>, vector<1x3x128xf32>,
    }
    %c3_i32_155 = arith.constant 3 : i32
    %c2_156 = arith.constant 2 : index
    %c2_157 = arith.constant 2 : index
    %c0_158 = arith.constant 0 : index
    %c0_159 = arith.constant 0 : index
    %60 = vector.load %arg6[%c2_156, %c2_157, %c0_158, %c0_159] : memref<3x3x128x128xf32, #tpu.memory_space<vmem>>, vector<1x1x128x128xf32>
    %61 = vector.shape_cast %60 : vector<1x1x128x128xf32> to vector<128x128xf32>
    %c0_i32_160 = arith.constant 0 : i32
    %c3_i32_161 = arith.constant 3 : i32
    %62 = arith.addi %c0_i32_160, %c3_i32_161 : i32
    %c1_i32_162 = arith.constant 1 : i32
    scf.for %arg19 = %c0_i32_160 to %62 step %c1_i32_162  : i32 {
      %101 = arith.index_cast %arg19 : i32 to index
      %c0_198 = arith.constant 0 : index
      %c0_199 = arith.constant 0 : index
      %102 = vector.load %arg17[%101, %c0_198, %c0_199] : memref<3x3x128xf32, #tpu.memory_space<vmem>>, vector<1x3x128xf32>
      %103 = vector.shape_cast %102 : vector<1x3x128xf32> to vector<3x128xf32>
      %c2_i32_200 = arith.constant 2 : i32
      %104 = arith.addi %arg19, %c2_i32_200 : i32
      %105 = arith.index_cast %104 : i32 to index
      %c2_201 = arith.constant 2 : index
      %c0_202 = arith.constant 0 : index
      %106 = vector.load %arg16[%105, %c2_201, %c0_202] : memref<5x5x128xf32, #tpu.memory_space<vmem>>, vector<1x3x128xf32>
      %107 = vector.shape_cast %106 : vector<1x3x128xf32> to vector<3x128xf32>
      %cst_203 = arith.constant dense<0.000000e+00> : vector<3x128xf32>
      %108 = tpu.matmul %107, %61, %cst_203 {dimension_numbers = #tpu.dot_dimension_numbers<[1], [0], [0], [1], [0, 0, 1, 1], [], []>} : vector<3x128xf32>, vector<128x128xf32>, vector<3x128xf32> -> vector<3x128xf32>
      %109 = arith.addf %103, %108 : vector<3x128xf32>
      %110 = arith.index_cast %arg19 : i32 to index
      %c0_204 = arith.constant 0 : index
      %c0_205 = arith.constant 0 : index
      %111 = vector.load %arg17[%110, %c0_204, %c0_205] : memref<3x3x128xf32, #tpu.memory_space<vmem>>, vector<1x3x128xf32>
      %112 = vector.shape_cast %111 : vector<1x3x128xf32> to vector<3x128xf32>
      %113 = vector.shape_cast %109 : vector<3x128xf32> to vector<1x3x128xf32>
      tpu.vector_store %arg17[%110, %c0_204, %c0_205], %113 {strides = array<i32>} : memref<3x3x128xf32, #tpu.memory_space<vmem>>, vector<1x3x128xf32>,
    }
    %c3_i32_163 = arith.constant 3 : i32
    %c0_i32_164 = arith.constant 0 : i32
    %c3_i32_165 = arith.constant 3 : i32
    %63 = arith.addi %c0_i32_164, %c3_i32_165 : i32
    %c1_i32_166 = arith.constant 1 : i32
    scf.for %arg19 = %c0_i32_164 to %63 step %c1_i32_166  : i32 {
      %101 = arith.index_cast %arg19 : i32 to index
      %c0_198 = arith.constant 0 : index
      %c0_199 = arith.constant 0 : index
      %102 = vector.load %arg17[%101, %c0_198, %c0_199] : memref<3x3x128xf32, #tpu.memory_space<vmem>>, vector<1x3x128xf32>
      %103 = vector.shape_cast %102 : vector<1x3x128xf32> to vector<3x128xf32>
      %cst_200 = arith.constant 0.000000e+00 : f32
      %104 = vector.broadcast %cst_200 : f32 to vector<3x128xf32>
      %105 = arith.maximumf %103, %104 : vector<3x128xf32>
      %106 = arith.index_cast %arg19 : i32 to index
      %c0_201 = arith.constant 0 : index
      %c0_202 = arith.constant 0 : index
      %107 = vector.load %arg17[%106, %c0_201, %c0_202] : memref<3x3x128xf32, #tpu.memory_space<vmem>>, vector<1x3x128xf32>
      %108 = vector.shape_cast %107 : vector<1x3x128xf32> to vector<3x128xf32>
      %109 = vector.shape_cast %105 : vector<3x128xf32> to vector<1x3x128xf32>
      tpu.vector_store %arg17[%106, %c0_201, %c0_202], %109 {strides = array<i32>} : memref<3x3x128xf32, #tpu.memory_space<vmem>>, vector<1x3x128xf32>,
    }
    %c3_i32_167 = arith.constant 3 : i32
    %c0_i32_168 = arith.constant 0 : i32
    %c2_i32 = arith.constant 2 : i32
    %64 = arith.muli %c2_i32, %c0_i32_168 : i32
    %65 = arith.index_cast %64 : i32 to index
    %c0_169 = arith.constant 0 : index
    %c0_170 = arith.constant 0 : index
    %66 = tpu.strided_load %arg17[%65, %c0_169, %c0_170] {strides = array<i32: 1, 2, 1>} : memref<3x3x128xf32, #tpu.memory_space<vmem>>, vector<1x1x128xf32>
    %67 = vector.shape_cast %66 : vector<1x1x128xf32> to vector<1x128xf32>
    %68 = arith.index_cast %64 : i32 to index
    %c1_171 = arith.constant 1 : index
    %c0_172 = arith.constant 0 : index
    %69 = tpu.strided_load %arg17[%68, %c1_171, %c0_172] {strides = array<i32: 1, 2, 1>} : memref<3x3x128xf32, #tpu.memory_space<vmem>>, vector<1x1x128xf32>
    %70 = vector.shape_cast %69 : vector<1x1x128xf32> to vector<1x128xf32>
    %c1_i32_173 = arith.constant 1 : i32
    %71 = arith.addi %64, %c1_i32_173 : i32
    %72 = arith.index_cast %71 : i32 to index
    %c0_174 = arith.constant 0 : index
    %c0_175 = arith.constant 0 : index
    %73 = tpu.strided_load %arg17[%72, %c0_174, %c0_175] {strides = array<i32: 1, 2, 1>} : memref<3x3x128xf32, #tpu.memory_space<vmem>>, vector<1x1x128xf32>
    %74 = vector.shape_cast %73 : vector<1x1x128xf32> to vector<1x128xf32>
    %c1_i32_176 = arith.constant 1 : i32
    %75 = arith.addi %64, %c1_i32_176 : i32
    %76 = arith.index_cast %75 : i32 to index
    %c1_177 = arith.constant 1 : index
    %c0_178 = arith.constant 0 : index
    %77 = tpu.strided_load %arg17[%76, %c1_177, %c0_178] {strides = array<i32: 1, 2, 1>} : memref<3x3x128xf32, #tpu.memory_space<vmem>>, vector<1x1x128xf32>
    %78 = vector.shape_cast %77 : vector<1x1x128xf32> to vector<1x128xf32>
    %79 = arith.maximumf %67, %70 : vector<1x128xf32>
    %80 = arith.maximumf %74, %78 : vector<1x128xf32>
    %81 = arith.maximumf %79, %80 : vector<1x128xf32>
    %82 = arith.index_cast %c0_i32_168 : i32 to index
    %c0_179 = arith.constant 0 : index
    %c0_180 = arith.constant 0 : index
    %83 = vector.load %arg18[%82, %c0_179, %c0_180] : memref<1x1x128xf32, #tpu.memory_space<vmem>>, vector<1x1x128xf32>
    %84 = vector.shape_cast %83 : vector<1x1x128xf32> to vector<1x128xf32>
    %85 = vector.shape_cast %81 : vector<1x128xf32> to vector<1x1x128xf32>
    tpu.vector_store %arg18[%82, %c0_179, %c0_180], %85 {strides = array<i32>} : memref<1x1x128xf32, #tpu.memory_space<vmem>>, vector<1x1x128xf32>,
    %c1_i32_181 = arith.constant 1 : i32
    %c0_182 = arith.constant 0 : index
    %c0_183 = arith.constant 0 : index
    %c0_184 = arith.constant 0 : index
    %86 = vector.load %arg18[%c0_182, %c0_183, %c0_184] : memref<1x1x128xf32, #tpu.memory_space<vmem>>, vector<1x1x128xf32>
    %87 = vector.shape_cast %86 : vector<1x1x128xf32> to vector<1x128xf32>
    %c0_185 = arith.constant 0 : index
    %c0_186 = arith.constant 0 : index
    %88 = vector.load %arg8[%c0_185, %c0_186] : memref<128x128xf32, #tpu.memory_space<vmem>>, vector<128x128xf32>
    %cst = arith.constant dense<0.000000e+00> : vector<1x128xf32>
    %89 = tpu.matmul %87, %88, %cst {dimension_numbers = #tpu.dot_dimension_numbers<[1], [0], [0], [1], [0, 0, 1, 1], [], []>} : vector<1x128xf32>, vector<128x128xf32>, vector<1x128xf32> -> vector<1x128xf32>
    %c0_187 = arith.constant 0 : index
    %c0_188 = arith.constant 0 : index
    %90 = vector.load %arg9[%c0_187, %c0_188] : memref<1x128xf32, #tpu.memory_space<vmem>>, vector<1x128xf32>
    %91 = arith.addf %89, %90 : vector<1x128xf32>
    %cst_189 = arith.constant 0.000000e+00 : f32
    %92 = vector.broadcast %cst_189 : f32 to vector<1x128xf32>
    %93 = arith.maximumf %91, %92 : vector<1x128xf32>
    %c0_190 = arith.constant 0 : index
    %c0_191 = arith.constant 0 : index
    %94 = vector.load %arg10[%c0_190, %c0_191] : memref<128x128xf32, #tpu.memory_space<vmem>>, vector<128x128xf32>
    %cst_192 = arith.constant dense<0.000000e+00> : vector<1x128xf32>
    %95 = tpu.matmul %93, %94, %cst_192 {dimension_numbers = #tpu.dot_dimension_numbers<[1], [0], [0], [1], [0, 0, 1, 1], [], []>} : vector<1x128xf32>, vector<128x128xf32>, vector<1x128xf32> -> vector<1x128xf32>
    %c0_193 = arith.constant 0 : index
    %c0_194 = arith.constant 0 : index
    %96 = vector.load %arg11[%c0_193, %c0_194] : memref<1x128xf32, #tpu.memory_space<vmem>>, vector<1x128xf32>
    %97 = arith.addf %95, %96 : vector<1x128xf32>
    %c0_195 = arith.constant 0 : index
    %c0_196 = arith.constant 0 : index
    %c0_197 = arith.constant 0 : index
    %98 = vector.load %arg12[%c0_195, %c0_196, %c0_197] : memref<1x1x128xf32, #tpu.memory_space<vmem>>, vector<1x1x128xf32>
    %99 = vector.shape_cast %98 : vector<1x1x128xf32> to vector<1x128xf32>
    %100 = vector.shape_cast %97 : vector<1x128xf32> to vector<1x1x128xf32>
    tpu.vector_store %arg12[%c0_195, %c0_196, %c0_197], %100 {strides = array<i32>} : memref<1x1x128xf32, #tpu.memory_space<vmem>>, vector<1x1x128xf32>,
    return
  }
  func.func @transform_0(%arg0: i32) -> (i32, i32, i32, i32) {
    %c0_i32 = arith.constant 0 : i32
    %c0_i32_0 = arith.constant 0 : i32
    %c0_i32_1 = arith.constant 0 : i32
    %c0_i32_2 = arith.constant 0 : i32
    return %arg0, %c0_i32, %c0_i32_0, %c0_i32_1 : i32, i32, i32, i32
  }
  func.func @transform_1(%arg0: i32) -> (i32, i32, i32, i32) {
    %c0_i32 = arith.constant 0 : i32
    %c0_i32_0 = arith.constant 0 : i32
    %c0_i32_1 = arith.constant 0 : i32
    %c0_i32_2 = arith.constant 0 : i32
    %c0_i32_3 = arith.constant 0 : i32
    return %c0_i32, %c0_i32_0, %c0_i32_1, %c0_i32_2 : i32, i32, i32, i32
  }
  func.func @transform_2(%arg0: i32) -> (i32, i32) {
    %c0_i32 = arith.constant 0 : i32
    %c0_i32_0 = arith.constant 0 : i32
    %c0_i32_1 = arith.constant 0 : i32
    return %c0_i32, %c0_i32_0 : i32, i32
  }
  func.func @transform_3(%arg0: i32) -> (i32, i32, i32, i32) {
    %c0_i32 = arith.constant 0 : i32
    %c0_i32_0 = arith.constant 0 : i32
    %c0_i32_1 = arith.constant 0 : i32
    %c0_i32_2 = arith.constant 0 : i32
    %c0_i32_3 = arith.constant 0 : i32
    return %c0_i32, %c0_i32_0, %c0_i32_1, %c0_i32_2 : i32, i32, i32, i32
  }
  func.func @transform_4(%arg0: i32) -> (i32, i32) {
    %c0_i32 = arith.constant 0 : i32
    %c0_i32_0 = arith.constant 0 : i32
    %c0_i32_1 = arith.constant 0 : i32
    return %c0_i32, %c0_i32_0 : i32, i32
  }
  func.func @transform_5(%arg0: i32) -> (i32, i32, i32, i32) {
    %c0_i32 = arith.constant 0 : i32
    %c0_i32_0 = arith.constant 0 : i32
    %c0_i32_1 = arith.constant 0 : i32
    %c0_i32_2 = arith.constant 0 : i32
    %c0_i32_3 = arith.constant 0 : i32
    return %c0_i32, %c0_i32_0, %c0_i32_1, %c0_i32_2 : i32, i32, i32, i32
  }
  func.func @transform_6(%arg0: i32) -> (i32, i32) {
    %c0_i32 = arith.constant 0 : i32
    %c0_i32_0 = arith.constant 0 : i32
    %c0_i32_1 = arith.constant 0 : i32
    return %c0_i32, %c0_i32_0 : i32, i32
  }
  func.func @transform_7(%arg0: i32) -> (i32, i32) {
    %c0_i32 = arith.constant 0 : i32
    %c0_i32_0 = arith.constant 0 : i32
    %c0_i32_1 = arith.constant 0 : i32
    return %c0_i32, %c0_i32_0 : i32, i32
  }
  func.func @transform_8(%arg0: i32) -> (i32, i32) {
    %c0_i32 = arith.constant 0 : i32
    %c0_i32_0 = arith.constant 0 : i32
    %c0_i32_1 = arith.constant 0 : i32
    return %c0_i32, %c0_i32_0 : i32, i32
  }
  func.func @transform_9(%arg0: i32) -> (i32, i32) {
    %c0_i32 = arith.constant 0 : i32
    %c0_i32_0 = arith.constant 0 : i32
    %c0_i32_1 = arith.constant 0 : i32
    return %c0_i32, %c0_i32_0 : i32, i32
  }
  func.func @transform_10(%arg0: i32) -> (i32, i32) {
    %c0_i32 = arith.constant 0 : i32
    %c0_i32_0 = arith.constant 0 : i32
    %c0_i32_1 = arith.constant 0 : i32
    return %c0_i32, %c0_i32_0 : i32, i32
  }
  func.func @transform_11(%arg0: i32) -> (i32, i32, i32) {
    %c0_i32 = arith.constant 0 : i32
    %c0_i32_0 = arith.constant 0 : i32
    %c0_i32_1 = arith.constant 0 : i32
    return %arg0, %c0_i32, %c0_i32_0 : i32, i32, i32
  }
}

</mosaic_0001>

<bundles_post_ra>
// kernel: reduced_filters_cnn_forward.1
= control target key start
LH: loop header
LB: loop body
LE: loop exit
PB: predicated region body
PF: predicated region fallthrough
CT: control target
= control target key end

     0   :  { %s7278_s0 = inlined_call_operand.vmem [shape: f32[2,28,28,1], index: 0, kind: input, shape index: {}]   ;;  %s7279_s1 = inlined_call_operand.vmem [shape: f32[3,3,1,128], index: 1, kind: input, shape index: {}]   ;;  %s7280_s2 = inlined_call_operand.vmem [shape: f32[1,128], index: 2, kind: input, shape index: {}]   ;;  %s7281_s3 = inlined_call_operand.vmem [shape: f32[3,3,128,128], index: 3, kind: input, shape index: {}]   ;;  %s7282_s4 = inlined_call_operand.vmem [shape: f32[1,128], index: 4, kind: input, shape index: {}]   ;;  %s7283_s5 = inlined_call_operand.vmem [shape: f32[3,3,128,128], index: 5, kind: input, shape index: {}]   ;;  %s7284_s6 = inlined_call_operand.vmem [shape: f32[1,128], index: 6, kind: input, shape index: {}]   ;;  %s7285_s7 = inlined_call_operand.vmem [shape: f32[128,128], index: 7, kind: input, shape index: {}]   ;;  %s7286_s8 = inlined_call_operand.vmem [shape: f32[1,128], index: 8, kind: input, shape index: {}]   ;;  %s7287_s9 = inlined_call_operand.vmem [shape: f32[128,128], index: 9, kind: input, shape index: {}]   ;;  %s7288_s10 = inlined_call_operand.vmem [shape: f32[1,128], index: 10, kind: input, shape index: {}]   ;;  %s7289_s11 = inlined_call_operand.hbm [shape: f32[2,1,128], index: 11, kind: output, shape index: {}]  }
   0x1   :  { %7291 = sst [smem:[#allocation11_spill]] %s7278_s0 }
   0x2   :  { %7292 = sst [smem:[#allocation12_spill]] %s7279_s1 }
   0x3   :  { %7293 = sst [smem:[#allocation13_spill]] %s7280_s2 }
   0x4   :  { %16 = vsyncpa [#allocation9], 0 }
   0x5   :  { %18 = vsyncpa [#allocation9 + $0x1], 0  ;;  %s5921_s17 = smov 0   ;;  %s5923_s18 = smov 0  }
   0x6   :  { %s5925_s19 = smov 0   ;;  %s5927_s20 = smov 0  }
   0x7 LB: > { %s5942_s21 = sadd.s32 4294967295, %s5727_s20   ;;  %s3301_s22 = sadd.s32 4294967294, %s5727_s20   ;;  %s5727_s20 = sphi %s5927_s20, %s7303_s20   ;;  %s5723_s19 = sphi %s5925_s19, %s7302_s19   ;;  %s5719_s18 = sphi %s5923_s18, %s7301_s18   ;;  %s5715_s17 = sphi %s5921_s17, %s7300_s17  }
   0x8   : > { %s5946_s23 = sadd.s32 1, %s5727_s20   ;;  %s267_s24 = sadd.s32 1, %s5723_s19 }
   0x9   : > { %s264_s25 = ssub.s32 %s5727_s20, %s5946_s23  ;;  %p277_p0 = scmp.ne.s32.totalorder %s5723_s19, %s5719_s18 }
   0xa   : > { %p265_p1 = scmp.eq.s32.totalorder %s264_s25, 0  ;;  %p278_p2 = scmp.eq.s32.totalorder %s5942_s21, 1 }
   0xb   : > { %p283_p3 = scmp.ne.s32.totalorder %s5719_s18, %s5715_s17  ;;  %p284_p4 = scmp.eq.s32.totalorder %s3301_s22, 1 }
   0xc   : > { %s5957_s26 = scalar_select %p265_p1, %s5723_s19, %s267_s24  }
   0xd   : > { %p5959_p5 = por %p278_p2, %p277_p0  ;;  %p5963_p6 = por %p284_p4, %p283_p3 }
   0xe   : > { %p3304_p7 = scmp.ge.s32.totalorder %s5727_s20, 1  ;;  %p340_p8 = scmp.lt.s32.totalorder %s5727_s20, 3 }
  0x10   : > { %p341_p9 = pnand %p3304_p7, %p340_p8 }
  0x11   : > { %s7290_s29 = sand.u32 (!%p341_p9), 1, %s5719_s18   ;;  %p379_p10 = scmp.lt.s32.totalorder (!%p341_p9), %s5942_s21, 1 }
  0x12   : > { %344 = sbr.rel (%p341_p9) target bundleno = 5260 (0x148c), region = 64  ;;  %s7296_s2 = sld [smem:[#allocation13_spill]] (!%p341_p9) }
  0x13   : > { %s7297_s0 = sld [smem:[#allocation11_spill]] (!%p341_p9)  ;;  %s5984_s24 = scalar_lea.vmem (!%p341_p9), [#allocation8], %s7290_s29 }
  0x14   : > { %s5986_s25 = smov (!%p341_p9), 0  }
  0x18   : > { %v5974_v0 = vld [vmem:[%s7296_s2] ss:$0 sm:$0xff] (!%p341_p9) }
  0x19   : > { %s380_s13 = scalar_select %p379_p10, %s5942_s21, 1 }
  0x1b   : > { %s5292_s14 = smul.u32 896, %s380_s13 }
  0x1d   : > { %s5980_s22 = scalar_lea.vmem %s7297_s0, %s5292_s14 }
  0x1e LB: >> { %v5829_v1 = vmov 0   ;;  %s3307_s30 = sshll.u32 %s5731_s25, 5  ;;  %s7298_s1 = sld [smem:[#allocation12_spill]]  ;;  %s5731_s25 = sphi %s5986_s25, %s390_s25  }
  0x1f   : >> { %5564 = vset.pattern.permute.xlu1 %v5829_v1  ;;  %5563 = vset.pattern.permute.xlu0 %v5829_v1  ;;  %s5995_s12 = scalar_lea.vmem %s5980_s22, %s3307_s30  ;;  %s768_s13 = scalar_lea.vmem [#allocation2], %s3307_s30 }
  0x20   : >> { %v401_v2 = vld [vmem:[%s5995_s12 + $0x10] sm:$0xff]  ;;  %v399_v3 = vld [vmem:[%s5995_s12] sm:$0xff]  ;;  %v402_v4 = vld [vmem:[%s5995_s12 + $0x18] sm:$0x3]  ;;  %s390_s25 = sadd.s32 1, %s5731_s25  }
  0x21   : >> { %416 = vperm.xlu1 %5564, %v401_v2   ;;  %406 = vperm.xlu0 %5563, %v399_v3   ;;  %v400_v5 = vld [vmem:[%s5995_s12 + $0x8] sm:$0xff]  ;;  %v441_v8 = vld [vmem:[%s5995_s12 + $0x19] sm:$0x3]  ;;  %v440_v9 = vld [vmem:[%s5995_s12 + $0x11] sm:$0xff]  ;;  %p387_p11 = scmp.ge.s32.totalorder %s390_s25, 26  }
  0x22   : >> { %v439_v6 = vld [vmem:[%s5995_s12 + $0x9] sm:$0xff]  ;;  %v438_v7 = vld [vmem:[%s5995_s12 + $0x1] sm:$0xff]  ;;  %v481_v12 = vld [vmem:[%s5995_s12 + $0x1a] sm:$0x3]  ;;  %s5733_s14 = smov (%p387_p11), 0  }
  0x23   : >> { %v479_v10 = vld [vmem:[%s5995_s12 + $0xa] sm:$0xff]  ;;  %v478_v11 = vld [vmem:[%s5995_s12 + $0x2] sm:$0xff]  ;;  %v480_v13 = vld [vmem:[%s5995_s12 + $0x12] sm:$0xff] }
  0x24   : >> { %v3315_v14 = vld [vmem:[%s5995_s12 + $0x28] sm:$0xff]  ;;  %v3314_v15 = vld [vmem:[%s5995_s12 + $0x20] sm:$0xff]  ;;  %v3317_v16 = vld [vmem:[%s5995_s12 + $0x38] sm:$0x3] }
  0x25   : >> { %421 = vperm.xlu1 %5564, %v402_v4   ;;  %411 = vperm.xlu0 %5563, %v400_v5   ;;  %v3316_v17 = vld [vmem:[%s5995_s12 + $0x30] sm:$0xff]  ;;  %v3320_v19 = vld [vmem:[%s5995_s12 + $0x21] sm:$0xff]  ;;  %v3323_v20 = vld [vmem:[%s5995_s12 + $0x39] sm:$0x3] }
  0x26   : >> { %v3321_v18 = vld [vmem:[%s5995_s12 + $0x29] sm:$0xff]  ;;  %v3322_v21 = vld [vmem:[%s5995_s12 + $0x31] sm:$0xff]  ;;  %v3329_v24 = vld [vmem:[%s5995_s12 + $0x3a] sm:$0x3] }
  0x27   : >> { %v3327_v22 = vld [vmem:[%s5995_s12 + $0x2a] sm:$0xff]  ;;  %v3326_v23 = vld [vmem:[%s5995_s12 + $0x22] sm:$0xff]  ;;  %v3328_v25 = vld [vmem:[%s5995_s12 + $0x32] sm:$0xff] }
  0x28   : >> { %v3334_v26 = vld [vmem:[%s5995_s12 + $0x48] sm:$0xff]  ;;  %v3333_v27 = vld [vmem:[%s5995_s12 + $0x40] sm:$0xff]  ;;  %v3336_v28 = vld [vmem:[%s5995_s12 + $0x58] sm:$0x3] }
  0x29   : >> { %451 = vperm.xlu1 %5564, %v439_v6   ;;  %446 = vperm.xlu0 %5563, %v438_v7   ;;  %v3335_v29 = vld [vmem:[%s5995_s12 + $0x50] sm:$0xff]  ;;  %v3339_v31 = vld [vmem:[%s5995_s12 + $0x41] sm:$0xff]  ;;  %v3342_v32 = vld [vmem:[%s5995_s12 + $0x59] sm:$0x3] }
  0x2a   : >> { %v3340_v30 = vld [vmem:[%s5995_s12 + $0x49] sm:$0xff]  ;;  %v3341_v33 = vld [vmem:[%s5995_s12 + $0x51] sm:$0xff]  ;;  %v3348_v36 = vld [vmem:[%s5995_s12 + $0x5a] sm:$0x3] }
  0x2b   : >> { %v3346_v34 = vld [vmem:[%s5995_s12 + $0x4a] sm:$0xff]  ;;  %v3345_v35 = vld [vmem:[%s5995_s12 + $0x42] sm:$0xff]  ;;  %v3347_v37 = vld [vmem:[%s5995_s12 + $0x52] sm:$0xff] }
  0x2c   : >> { %v3308_v60 = vld [vmem:[%s7298_s1] ss:$0 sm:$0xff]  ;;  %v3310_v63 = vld [vmem:[%s7298_s1 + $0x1] ss:$0 sm:$0xff]  ;;  %v3312_v3 = vld [vmem:[%s7298_s1 + $0x2] ss:$0 sm:$0xff] }
  0x2d   : >> { %461 = vperm.xlu1 %5564, %v441_v8   ;;  %456 = vperm.xlu0 %5563, %v440_v9  }
  0x31   : >> { %491 = vperm.xlu1 %5564, %v479_v10   ;;  %486 = vperm.xlu0 %5563, %v478_v11   ;;  %v3319_v10 = vld [vmem:[%s7298_s1 + $0x3] ss:$0 sm:$0xff] }
  0x35   : >> { %501 = vperm.xlu1 %5564, %v481_v12   ;;  %496 = vperm.xlu0 %5563, %v480_v13  }
  0x39   : >> { %534 = vperm.xlu1 %5564, %v3315_v14   ;;  %529 = vperm.xlu0 %5563, %v3314_v15  }
  0x3d   : >> { %544 = vperm.xlu1 %5564, %v3317_v16   ;;  %539 = vperm.xlu0 %5563, %v3316_v17   ;;  %v3325_v17 = vld [vmem:[%s7298_s1 + $0x4] ss:$0 sm:$0xff] }
  0x41   : >> { %574 = vperm.xlu1 %5564, %v3321_v18   ;;  %569 = vperm.xlu0 %5563, %v3320_v19  }
  0x45   : >> { %584 = vperm.xlu1 %5564, %v3323_v20   ;;  %579 = vperm.xlu0 %5563, %v3322_v21  }
  0x49   : >> { %614 = vperm.xlu1 %5564, %v3327_v22   ;;  %609 = vperm.xlu0 %5563, %v3326_v23  }
  0x4d   : >> { %624 = vperm.xlu1 %5564, %v3329_v24   ;;  %619 = vperm.xlu0 %5563, %v3328_v25  }
  0x51   : >> { %657 = vperm.xlu1 %5564, %v3334_v26   ;;  %652 = vperm.xlu0 %5563, %v3333_v27  }
  0x55   : >> { %667 = vperm.xlu1 %5564, %v3336_v28   ;;  %662 = vperm.xlu0 %5563, %v3335_v29   ;;  %v3331_v28 = vld [vmem:[%s7298_s1 + $0x5] ss:$0 sm:$0xff] }
  0x59   : >> { %697 = vperm.xlu1 %5564, %v3340_v30   ;;  %692 = vperm.xlu0 %5563, %v3339_v31  }
  0x5d   : >> { %707 = vperm.xlu1 %5564, %v3342_v32   ;;  %702 = vperm.xlu0 %5563, %v3341_v33  }
  0x61   : >> { %737 = vperm.xlu1 %5564, %v3346_v34   ;;  %732 = vperm.xlu0 %5563, %v3345_v35  }
  0x65   : >> { %747 = vperm.xlu1 %5564, %v3348_v36   ;;  %742 = vperm.xlu0 %5563, %v3347_v37   ;;  %v3338_v37 = vld [vmem:[%s7298_s1 + $0x6] ss:$0 sm:$0xff] }
  0xa0   : >> { %v417_v38 = vpop.permute.xlu1 %416  ;;  %v407_v39 = vpop.permute.xlu0 %406 }
  0xa1   : >> { %v430_v1 = vmul.f32 %v3308_v60, %v407_v39  ;;  %v432_v8 = vmul.f32 %v3308_v60, %v417_v38 }
  0xa3   : >> { %v434_v11 = vadd.f32 %v5974_v0, %v430_v1  ;;  %v436_v24 = vadd.f32 %v5974_v0, %v432_v8  ;;  %v3350_v8 = vld [vmem:[%s7298_s1 + $0x8] ss:$0 sm:$0xff] }
  0xa4   : >> { %v422_v40 = vpop.permute.xlu1 %421  ;;  %v412_v41 = vpop.permute.xlu0 %411 }
  0xa5   : >> { %v431_v2 = vmul.f32 %v3308_v60, %v412_v41  ;;  %v433_v9 = vmul.f32 %v3308_v60, %v422_v40 }
  0xa7   : >> { %v435_v12 = vadd.f32 %v5974_v0, %v431_v2  ;;  %v437_v25 = vadd.f32 %v5974_v0, %v433_v9 }
  0xa8   : >> { %v452_v42 = vpop.permute.xlu1 %451  ;;  %v447_v43 = vpop.permute.xlu0 %446 }
  0xa9   : >> { %v471_v6 = vmul.f32 %v3310_v63, %v452_v42  ;;  %v470_v7 = vmul.f32 %v3310_v63, %v447_v43 }
  0xab   : >> { %v475_v20 = vadd.f32 %v471_v6, %v435_v12  ;;  %v474_v21 = vadd.f32 %v470_v7, %v434_v11 }
  0xac   : >> { %v462_v44 = vpop.permute.xlu1 %461  ;;  %v457_v45 = vpop.permute.xlu0 %456 }
  0xad   : >> { %v473_v15 = vmul.f32 %v3310_v63, %v462_v44  ;;  %v472_v16 = vmul.f32 %v3310_v63, %v457_v45 }
  0xaf   : >> { %v477_v33 = vadd.f32 %v473_v15, %v437_v25  ;;  %v476_v34 = vadd.f32 %v472_v16, %v436_v24 }
  0xb0   : >> { %v492_v46 = vpop.permute.xlu1 %491  ;;  %v487_v47 = vpop.permute.xlu0 %486 }
  0xb1   : >> { %v511_v13 = vmul.f32 %v3312_v3, %v492_v46  ;;  %v510_v14 = vmul.f32 %v3312_v3, %v487_v47 }
  0xb3   : >> { %v515_v29 = vadd.f32 %v511_v13, %v475_v20  ;;  %v514_v30 = vadd.f32 %v510_v14, %v474_v21 }
  0xb4   : >> { %v502_v48 = vpop.permute.xlu1 %501  ;;  %v497_v49 = vpop.permute.xlu0 %496 }
  0xb5   : >> { %v513_v26 = vmul.f32 %v3312_v3, %v502_v48  ;;  %v512_v27 = vmul.f32 %v3312_v3, %v497_v49  ;;  %v3344_v48 = vld [vmem:[%s7298_s1 + $0x7] ss:$0 sm:$0xff] }
  0xb7   : >> { %v517_v44 = vadd.f32 %v513_v26, %v477_v33  ;;  %v516_v45 = vadd.f32 %v512_v27, %v476_v34 }
  0xb8   : >> { %v535_v50 = vpop.permute.xlu1 %534  ;;  %v530_v51 = vpop.permute.xlu0 %529 }
  0xb9   : >> { %v554_v22 = vmul.f32 %v3319_v10, %v535_v50  ;;  %v553_v23 = vmul.f32 %v3319_v10, %v530_v51 }
  0xbb   : >> { %v558_v40 = vadd.f32 %v554_v22, %v515_v29  ;;  %v557_v41 = vadd.f32 %v553_v23, %v514_v30 }
  0xbc   : >> { %v545_v52 = vpop.permute.xlu1 %544  ;;  %v540_v53 = vpop.permute.xlu0 %539 }
  0xbd   : >> { %v556_v35 = vmul.f32 %v3319_v10, %v545_v52  ;;  %v555_v36 = vmul.f32 %v3319_v10, %v540_v53 }
  0xbf   : >> { %v560_v53 = vadd.f32 %v556_v35, %v517_v44 }
  0xc0   : >> { %v575_v54 = vpop.permute.xlu1 %574  ;;  %v570_v55 = vpop.permute.xlu0 %569 }
  0xc1   : >> { %v594_v31 = vmul.f32 %v3325_v17, %v575_v54  ;;  %v593_v32 = vmul.f32 %v3325_v17, %v570_v55  ;;  %v559_v54 = vadd.f32 %v555_v36, %v516_v45 }
  0xc3   : >> { %v598_v49 = vadd.f32 %v594_v31, %v558_v40  ;;  %v597_v50 = vadd.f32 %v593_v32, %v557_v41 }
  0xc4   : >> { %v585_v56 = vpop.permute.xlu1 %584  ;;  %v580_v57 = vpop.permute.xlu0 %579 }
  0xc5   : >> { %v596_v46 = vmul.f32 %v3325_v17, %v585_v56  ;;  %v595_v47 = vmul.f32 %v3325_v17, %v580_v57 }
  0xc7   : >> { %v600_v56 = vadd.f32 %v596_v46, %v560_v53  ;;  %v599_v57 = vadd.f32 %v595_v47, %v559_v54 }
  0xc8   : >> { %v615_v58 = vpop.permute.xlu1 %614  ;;  %v610_v59 = vpop.permute.xlu0 %609 }
  0xc9   : >> { %v634_v42 = vmul.f32 %v3331_v28, %v615_v58  ;;  %v633_v43 = vmul.f32 %v3331_v28, %v610_v59 }
  0xcb   : >> { %v638_v58 = vadd.f32 %v634_v42, %v598_v49  ;;  %v637_v59 = vadd.f32 %v633_v43, %v597_v50 }
  0xcc   : >> { %v625_v61 = vpop.permute.xlu1 %624  ;;  %v620_v62 = vpop.permute.xlu0 %619 }
  0xcd   : >> { %v636_v55 = vmul.f32 %v3331_v28, %v625_v61  ;;  %v635_v60 = vmul.f32 %v3331_v28, %v620_v62 }
  0xcf   : >> { %v640_v9 = vadd.f32 %v636_v55, %v600_v56  ;;  %v639_v10 = vadd.f32 %v635_v60, %v599_v57 }
  0xd0   : >> { %v658_v4 = vpop.permute.xlu1 %657  ;;  %v653_v5 = vpop.permute.xlu0 %652 }
  0xd1   : >> { %v677_v51 = vmul.f32 %v3338_v37, %v658_v4  ;;  %v676_v52 = vmul.f32 %v3338_v37, %v653_v5 }
  0xd3   : >> { %v681_v4 = vadd.f32 %v677_v51, %v638_v58  ;;  %v680_v5 = vadd.f32 %v676_v52, %v637_v59 }
  0xd4   : >> { %v668_v18 = vpop.permute.xlu1 %667  ;;  %v663_v19 = vpop.permute.xlu0 %662 }
  0xd5   : >> { %v679_v6 = vmul.f32 %v3338_v37, %v668_v18  ;;  %v678_v7 = vmul.f32 %v3338_v37, %v663_v19 }
  0xd7   : >> { %v683_v17 = vadd.f32 %v679_v6, %v640_v9  ;;  %v682_v18 = vadd.f32 %v678_v7, %v639_v10 }
  0xd8   : >> { %v698_v38 = vpop.permute.xlu1 %697  ;;  %v693_v39 = vpop.permute.xlu0 %692 }
  0xd9   : >> { %v717_v2 = vmul.f32 %v3344_v48, %v698_v38  ;;  %v716_v3 = vmul.f32 %v3344_v48, %v693_v39 }
  0xdb   : >> { %v721_v13 = vadd.f32 %v717_v2, %v681_v4  ;;  %v720_v14 = vadd.f32 %v716_v3, %v680_v5 }
  0xdc   : >> { %v708_v63 = vpop.permute.xlu1 %707  ;;  %v703_v1 = vpop.permute.xlu0 %702 }
  0xdd   : >> { %v719_v61 = vmul.f32 %v3344_v48, %v708_v63  ;;  %v718_v62 = vmul.f32 %v3344_v48, %v703_v1 }
  0xdf   : >> { %v723_v21 = vadd.f32 %v719_v61, %v683_v17  ;;  %v722_v22 = vadd.f32 %v718_v62, %v682_v18 }
  0xe0   : >> { %v738_v11 = vpop.permute.xlu1 %737  ;;  %v733_v12 = vpop.permute.xlu0 %732 }
  0xe1   : >> { %v757_v15 = vmul.f32 %v3350_v8, %v738_v11  ;;  %v756_v16 = vmul.f32 %v3350_v8, %v733_v12 }
  0xe3   : >> { %v761_v19 = vadd.f32 %v757_v15, %v721_v13  ;;  %v760_v20 = vadd.f32 %v756_v16, %v720_v14 }
  0xe4   : >> { %v748_v23 = vpop.permute.xlu1 %747  ;;  %v743_v24 = vpop.permute.xlu0 %742 }
  0xe5   : >> { %v765_v25 = vmax.f32 %v761_v19, 0.0  ;;  %v764_v26 = vmax.f32 %v760_v20, 0.0  ;;  %v759_v27 = vmul.f32 %v3350_v8, %v748_v23  ;;  %v758_v28 = vmul.f32 %v3350_v8, %v743_v24  ;;  %389 = sbr.rel (!%p387_p11) target bundleno = 30 (0x1e), region = 359 }
  0xe7   : >> { %770 = vst [vmem:[%s768_s13 + $0x8] sm:$0xff] %v765_v25  ;;  %769 = vst [vmem:[%s768_s13] sm:$0xff] %v764_v26  ;;  %v763_v29 = vadd.f32 %v759_v27, %v723_v21  ;;  %v762_v30 = vadd.f32 %v758_v28, %v722_v22 }
  0xe9   : >> { %v767_v31 = vmax.f32 %v763_v29, 0.0  ;;  %v766_v32 = vmax.f32 %v762_v30, 0.0 }
  0xeb   : >> { %772 = vst [vmem:[%s768_s13 + $0x18] sm:$0x3] %v767_v31  ;;  %771 = vst [vmem:[%s768_s13 + $0x10] sm:$0xff] %v766_v32 }
  0xec LB: >> { %s3687_s29 = sshll.u32 %s5735_s14, 6  ;;  %s3362_s30 = sshll.u32 %s5735_s14, 4  ;;  %s5735_s14 = sphi %s5733_s14, %s778_s14  }
  0xed   : >> { %s781_s15 = scalar_lea.vmem [#allocation2], %s3687_s29  ;;  %s806_s22 = scalar_lea.vmem [#allocation3], %s3362_s30 }
  0xee   : >> { %s778_s14 = sadd.s32 1, %s5735_s14  }
  0xef   : >> { %p775_p12 = scmp.ge.s32.totalorder %s778_s14, 13  }
  0xf0   : > { %v3363_v46 = vld [vmem:[%s7282_s4] ss:$0 sm:$0xff] (%p775_p12)  ;;  %s5737_s12 = smov (%p775_p12), 0  }
  0xf2   : >> { %v782_v33 = vld [vmem:[%s781_s15] ss:$2 sm:$0xff]  ;;  %v3354_v34 = vld [vmem:[%s781_s15 + $0x1] ss:$2 sm:$0xff] }
  0xf3   : >> { %v3358_v35 = vld [vmem:[%s781_s15 + $0x20] ss:$2 sm:$0xff]  ;;  %v3360_v36 = vld [vmem:[%s781_s15 + $0x21] ss:$2 sm:$0xff]  ;;  %v799_v37 = vmax.f32 %v782_v33, %v3354_v34 }
  0xf4   : >> { %v3353_v38 = vld [vmem:[%s781_s15 + $0x10] ss:$2 sm:$0x1f]  ;;  %v801_v39 = vmax.f32 %v3358_v35, %v3360_v36  ;;  %v3355_v40 = vld [vmem:[%s781_s15 + $0x11] ss:$2 sm:$0x1f] }
  0xf5   : >> { %v3359_v41 = vld [vmem:[%s781_s15 + $0x30] ss:$2 sm:$0x1f]  ;;  %v3361_v42 = vld [vmem:[%s781_s15 + $0x31] ss:$2 sm:$0x1f]  ;;  %v800_v43 = vmax.f32 %v3353_v38, %v3355_v40 }
  0xf6   : >> { %v803_v44 = vmax.f32 %v799_v37, %v801_v39  ;;  %v802_v45 = vmax.f32 %v3359_v41, %v3361_v42  ;;  %777 = sbr.rel (!%p775_p12) target bundleno = 236 (0xec), region = 370 }
  0xf8   : >> { %807 = vst [vmem:[%s806_s22] sm:$0xff] %v803_v44  ;;  %v804_v0 = vmax.f32 %v800_v43, %v802_v45 }
  0xfa   : >> { %808 = vst [vmem:[%s806_s22 + $0x8] sm:$0x1f] %v804_v0 }
  0xfd LB: >> { %s3364_s13 = sshll.u32 %s5739_s12, 4  ;;  %s815_s12 = sadd.s32 1, %s5739_s12   ;;  %s5739_s12 = sphi %s5737_s12, %s815_s12  }
  0xfe   : >> { %s823_s29 = scalar_lea.vmem [#allocation4], %s3364_s13  ;;  %p812_p13 = scmp.ge.s32.totalorder %s815_s12, 11  }
  0xff   : >> { %824 = vst [vmem:[%s823_s29] sm:$0xff] %v3363_v46  ;;  %825 = vst [vmem:[%s823_s29 + $0x8] sm:$0x7] %v3363_v46  ;;  %v826_v47 = vld [vmem:[%s7281_s3] sm:$0xff] (%p812_p13)  ;;  %v827_v48 = vld [vmem:[%s7281_s3 + $0x8] sm:$0xff] (%p812_p13)  ;;  %s6120_s1 = smov (%p812_p13), 0  }
 0x100   : > { %814 = sbr.rel (!%p812_p13) target bundleno = 253 (0xfd), region = 381  ;;  %v828_v49 = vld [vmem:[%s7281_s3 + $0x10] sm:$0xff] (%p812_p13)  ;;  %v829_v50 = vld [vmem:[%s7281_s3 + $0x18] sm:$0xff] (%p812_p13)  ;;  %v830_v51 = vld [vmem:[%s7281_s3 + $0x20] sm:$0xff] (%p812_p13) }
 0x101   : > { %v831_v52 = vld [vmem:[%s7281_s3 + $0x28] sm:$0xff] (%p812_p13)  ;;  %v832_v53 = vld [vmem:[%s7281_s3 + $0x30] sm:$0xff] (%p812_p13)  ;;  %v833_v54 = vld [vmem:[%s7281_s3 + $0x38] sm:$0xff] (%p812_p13) }
 0x102   : > { %v834_v55 = vld [vmem:[%s7281_s3 + $0x40] sm:$0xff] (%p812_p13)  ;;  %v835_v60 = vld [vmem:[%s7281_s3 + $0x48] sm:$0xff] (%p812_p13)  ;;  %v836_v63 = vld [vmem:[%s7281_s3 + $0x50] sm:$0xff] (%p812_p13) }
 0x103   : > { %v837_v1 = vld [vmem:[%s7281_s3 + $0x58] sm:$0xff] (%p812_p13)  ;;  %v838_v58 = vld [vmem:[%s7281_s3 + $0x60] sm:$0xff] (%p812_p13)  ;;  %v839_v59 = vld [vmem:[%s7281_s3 + $0x68] sm:$0xff] (%p812_p13) }
 0x104   : > { %v840_v2 = vld [vmem:[%s7281_s3 + $0x70] sm:$0xff] (%p812_p13)  ;;  %v841_v3 = vld [vmem:[%s7281_s3 + $0x78] sm:$0xff] (%p812_p13) }
 0x107 LB: >> { %v4740_v56 = vpack.c.bf16 %v827_v48, %v826_v47  ;;  %v4744_v57 = vpack.c.bf16 %v829_v50, %v828_v49  ;;  %s3365_s29 = sshll.u32 %s5743_s1, 4  ;;  %v4748_v6 = vpack.c.bf16 %v831_v52, %v830_v51  ;;  %v4752_v8 = vpack.c.bf16 %v833_v54, %v832_v53  ;;  %s847_s1 = sadd.s32 1, %s5743_s1   ;;  %s5743_s1 = sphi %s6120_s1, %s847_s1  }
 0x108   : >> { %s852_s2 = scalar_lea.vmem [#allocation3], %s3365_s29  ;;  %v4756_v4 = vpack.c.bf16 %v835_v60, %v834_v55  ;;  %v4760_v5 = vpack.c.bf16 %v837_v1, %v836_v63  ;;  %v4764_v9 = vpack.c.bf16 %v839_v59, %v838_v58  ;;  %v4768_v10 = vpack.c.bf16 %v841_v3, %v840_v2  ;;  %s849_s12 = scalar_lea.vmem [#allocation4], %s3365_s29 }
 0x109   : >> { %4741 = vmatprep.subr.bf16.mxu0 %v4740_v56  ;;  %v853_v7 = vld [vmem:[%s852_s2] sm:$0xff]  ;;  %v854_v61 = vld [vmem:[%s852_s2 + $0x8] sm:$0x7]  ;;  %p844_p0 = scmp.ge.s32.totalorder %s847_s1, 11  }
 0x10a   : >> { %4743 = vmatpush3.bf16.msra.mxu0 %v4740_v56  ;;  %4072 = vmatprep.mubr.f32.mxu0 %v853_v7  ;;  %v851_v62 = vld [vmem:[%s849_s12 + $0x8] sm:$0x7]  ;;  %v850_v11 = vld [vmem:[%s849_s12] sm:$0xff]  ;;  %v3368_v18 = vld [vmem:[%s7281_s3 + $0x90] sm:$0xff] (%p844_p0)  ;;  %s6177_s29 = smov (%p844_p0), 0  }
 0x10b   : >> { %4745 = vmatprep.subr.bf16.mxu0 %v4744_v57  ;;  %v3366_v16 = vld [vmem:[%s7281_s3 + $0x80] sm:$0xff] (%p844_p0)  ;;  %v3367_v17 = vld [vmem:[%s7281_s3 + $0x88] sm:$0xff] (%p844_p0)  ;;  %v3369_v19 = vld [vmem:[%s7281_s3 + $0x98] sm:$0xff] (%p844_p0) }
 0x10c   : > { %v3370_v20 = vld [vmem:[%s7281_s3 + $0xa0] sm:$0xff] (%p844_p0)  ;;  %v3371_v21 = vld [vmem:[%s7281_s3 + $0xa8] sm:$0xff] (%p844_p0)  ;;  %v3372_v22 = vld [vmem:[%s7281_s3 + $0xb0] sm:$0xff] (%p844_p0) }
 0x10d   : > { %v3373_v23 = vld [vmem:[%s7281_s3 + $0xb8] sm:$0xff] (%p844_p0)  ;;  %v3374_v24 = vld [vmem:[%s7281_s3 + $0xc0] sm:$0xff] (%p844_p0)  ;;  %v3375_v25 = vld [vmem:[%s7281_s3 + $0xc8] sm:$0xff] (%p844_p0) }
 0x10e   : >> { %4747 = vmatpush3.bf16.msra.mxu0 %v4744_v57  ;;  %v3376_v26 = vld [vmem:[%s7281_s3 + $0xd0] sm:$0xff] (%p844_p0)  ;;  %v3377_v27 = vld [vmem:[%s7281_s3 + $0xd8] sm:$0xff] (%p844_p0)  ;;  %v3378_v28 = vld [vmem:[%s7281_s3 + $0xe0] sm:$0xff] (%p844_p0) }
 0x10f   : >> { %4749 = vmatprep.subr.bf16.mxu0 %v4748_v6  ;;  %v3379_v29 = vld [vmem:[%s7281_s3 + $0xe8] sm:$0xff] (%p844_p0)  ;;  %v3380_v30 = vld [vmem:[%s7281_s3 + $0xf0] sm:$0xff] (%p844_p0)  ;;  %v3381_v31 = vld [vmem:[%s7281_s3 + $0xf8] sm:$0xff] (%p844_p0) }
 0x112   : >> { %4751 = vmatpush3.bf16.msra.mxu0 %v4748_v6 }
 0x113   : >> { %4753 = vmatprep.subr.bf16.mxu0 %v4752_v8 }
 0x116   : >> { %4755 = vmatpush3.bf16.msra.mxu0 %v4752_v8 }
 0x117   : >> { %4757 = vmatprep.subr.bf16.mxu0 %v4756_v4 }
 0x11a   : >> { %4759 = vmatpush3.bf16.msra.mxu0 %v4756_v4 }
 0x11b   : >> { %4761 = vmatprep.subr.bf16.mxu0 %v4760_v5 }
 0x11e   : >> { %4763 = vmatpush3.bf16.msra.mxu0 %v4760_v5 }
 0x11f   : >> { %4765 = vmatprep.subr.bf16.mxu0 %v4764_v9 }
 0x122   : >> { %4767 = vmatpush3.bf16.msra.mxu0 %v4764_v9 }
 0x123   : >> { %4769 = vmatprep.subr.bf16.mxu0 %v4768_v10 }
 0x126   : >> { %4771 = vmatpush3.bf16.msra.mxu0 %v4768_v10 }
 0x129   : >> { %4073 = vmatmul.mubr.f32.vlgmr.msra.gmra.mrb[0].mxu0 %v854_v61 }
 0x1fa   : > { %846 = sbr.rel (!%p844_p0) target bundleno = 263 (0x107), region = 392 }
 0x1fc   : >> { %v4074_v12 = vpop.f32.mrb[0].mxu0 }
 0x1fd   : >> { %v931_v13 = vadd.f32 %v4074_v12, %v851_v62  ;;  %v921_v14 = vpop.f32.mrb[1].mxu0 }
 0x1fe   : >> { %v930_v15 = vadd.f32 %v921_v14, %v850_v11 }
 0x1ff   : >> { %933 = vst [vmem:[%s849_s12 + $0x8] sm:$0x7] %v931_v13 }
 0x200   : >> { %932 = vst [vmem:[%s849_s12] sm:$0xff] %v930_v15 }
 0x201 LB: >> { %v4772_v32 = vpack.c.bf16 %v3367_v17, %v3366_v16  ;;  %v4776_v33 = vpack.c.bf16 %v3369_v19, %v3368_v18  ;;  %s3382_s2 = sshll.u32 %s5747_s29, 4  ;;  %v4780_v34 = vpack.c.bf16 %v3371_v21, %v3370_v20  ;;  %v4784_v36 = vpack.c.bf16 %v3373_v23, %v3372_v22  ;;  %s956_s29 = sadd.s32 1, %s5747_s29   ;;  %s5747_s29 = sphi %s6177_s29, %s956_s29  }
 0x202   : >> { %s961_s1 = scalar_lea.vmem [#allocation3], %s3382_s2  ;;  %v4788_v37 = vpack.c.bf16 %v3375_v25, %v3374_v24  ;;  %v4792_v38 = vpack.c.bf16 %v3377_v27, %v3376_v26  ;;  %v4796_v39 = vpack.c.bf16 %v3379_v29, %v3378_v28  ;;  %v4800_v40 = vpack.c.bf16 %v3381_v31, %v3380_v30  ;;  %s958_s12 = scalar_lea.vmem [#allocation4], %s3382_s2 }
 0x203   : >> { %4773 = vmatprep.subr.bf16.mxu0 %v4772_v32  ;;  %v962_v35 = vld [vmem:[%s961_s1 + $0x1] sm:$0xff]  ;;  %v963_v41 = vld [vmem:[%s961_s1 + $0x9] sm:$0x7]  ;;  %p953_p1 = scmp.ge.s32.totalorder %s956_s29, 11  }
 0x204   : >> { %4775 = vmatpush3.bf16.msra.mxu0 %v4772_v32  ;;  %4107 = vmatprep.mubr.f32.mxu0 %v962_v35  ;;  %v3383_v47 = vld [vmem:[%s7281_s3 + $0x100] sm:$0xff] (%p953_p1)  ;;  %v3384_v48 = vld [vmem:[%s7281_s3 + $0x108] sm:$0xff] (%p953_p1)  ;;  %v3385_v49 = vld [vmem:[%s7281_s3 + $0x110] sm:$0xff] (%p953_p1)  ;;  %s6234_s2 = smov (%p953_p1), 0  }
 0x205   : >> { %4777 = vmatprep.subr.bf16.mxu0 %v4776_v33  ;;  %v3386_v50 = vld [vmem:[%s7281_s3 + $0x118] sm:$0xff] (%p953_p1)  ;;  %v3387_v51 = vld [vmem:[%s7281_s3 + $0x120] sm:$0xff] (%p953_p1)  ;;  %v3388_v52 = vld [vmem:[%s7281_s3 + $0x128] sm:$0xff] (%p953_p1) }
 0x206   : > { %v3389_v53 = vld [vmem:[%s7281_s3 + $0x130] sm:$0xff] (%p953_p1)  ;;  %v3390_v54 = vld [vmem:[%s7281_s3 + $0x138] sm:$0xff] (%p953_p1)  ;;  %v3391_v55 = vld [vmem:[%s7281_s3 + $0x140] sm:$0xff] (%p953_p1) }
 0x207   : >> { %v960_v42 = vld [vmem:[%s958_s12 + $0x8] sm:$0x7]  ;;  %v959_v43 = vld [vmem:[%s958_s12] sm:$0xff]  ;;  %v3393_v63 = vld [vmem:[%s7281_s3 + $0x150] sm:$0xff] (%p953_p1) }
 0x208   : >> { %4779 = vmatpush3.bf16.msra.mxu0 %v4776_v33  ;;  %v3392_v60 = vld [vmem:[%s7281_s3 + $0x148] sm:$0xff] (%p953_p1)  ;;  %v3394_v1 = vld [vmem:[%s7281_s3 + $0x158] sm:$0xff] (%p953_p1)  ;;  %v3395_v58 = vld [vmem:[%s7281_s3 + $0x160] sm:$0xff] (%p953_p1) }
 0x209   : >> { %4781 = vmatprep.subr.bf16.mxu0 %v4780_v34  ;;  %v3396_v59 = vld [vmem:[%s7281_s3 + $0x168] sm:$0xff] (%p953_p1)  ;;  %v3397_v2 = vld [vmem:[%s7281_s3 + $0x170] sm:$0xff] (%p953_p1)  ;;  %v3398_v3 = vld [vmem:[%s7281_s3 + $0x178] sm:$0xff] (%p953_p1) }
 0x20c   : >> { %4783 = vmatpush3.bf16.msra.mxu0 %v4780_v34 }
 0x20d   : >> { %4785 = vmatprep.subr.bf16.mxu0 %v4784_v36 }
 0x210   : >> { %4787 = vmatpush3.bf16.msra.mxu0 %v4784_v36 }
 0x211   : >> { %4789 = vmatprep.subr.bf16.mxu0 %v4788_v37 }
 0x214   : >> { %4791 = vmatpush3.bf16.msra.mxu0 %v4788_v37 }
 0x215   : >> { %4793 = vmatprep.subr.bf16.mxu0 %v4792_v38 }
 0x218   : >> { %4795 = vmatpush3.bf16.msra.mxu0 %v4792_v38 }
 0x219   : >> { %4797 = vmatprep.subr.bf16.mxu0 %v4796_v39 }
 0x21c   : >> { %4799 = vmatpush3.bf16.msra.mxu0 %v4796_v39 }
 0x21d   : >> { %4801 = vmatprep.subr.bf16.mxu0 %v4800_v40 }
 0x220   : >> { %4803 = vmatpush3.bf16.msra.mxu0 %v4800_v40 }
 0x223   : >> { %4108 = vmatmul.mubr.f32.vlgmr.msra.gmra.mrb[0].mxu0 %v963_v41 }
 0x2f4   : > { %955 = sbr.rel (!%p953_p1) target bundleno = 513 (0x201), region = 403 }
 0x2f6   : >> { %v4109_v44 = vpop.f32.mrb[0].mxu0 }
 0x2f7   : >> { %v1040_v45 = vadd.f32 %v4109_v44, %v960_v42  ;;  %v1030_v0 = vpop.f32.mrb[1].mxu0 }
 0x2f8   : >> { %v1039_v46 = vadd.f32 %v1030_v0, %v959_v43 }
 0x2f9   : >> { %1042 = vst [vmem:[%s958_s12 + $0x8] sm:$0x7] %v1040_v45 }
 0x2fa   : >> { %1041 = vst [vmem:[%s958_s12] sm:$0xff] %v1039_v46 }
 0x2fb LB: >> { %v4804_v56 = vpack.c.bf16 %v3384_v48, %v3383_v47  ;;  %v4808_v57 = vpack.c.bf16 %v3386_v50, %v3385_v49  ;;  %s3399_s1 = sshll.u32 %s5751_s2, 4  ;;  %v4812_v6 = vpack.c.bf16 %v3388_v52, %v3387_v51  ;;  %v4816_v8 = vpack.c.bf16 %v3390_v54, %v3389_v53  ;;  %s1065_s2 = sadd.s32 1, %s5751_s2   ;;  %s5751_s2 = sphi %s6234_s2, %s1065_s2  }
 0x2fc   : >> { %s1070_s29 = scalar_lea.vmem [#allocation3], %s3399_s1  ;;  %v4820_v4 = vpack.c.bf16 %v3392_v60, %v3391_v55  ;;  %v4824_v5 = vpack.c.bf16 %v3394_v1, %v3393_v63  ;;  %v4828_v9 = vpack.c.bf16 %v3396_v59, %v3395_v58  ;;  %v4832_v10 = vpack.c.bf16 %v3398_v3, %v3397_v2  ;;  %s1067_s12 = scalar_lea.vmem [#allocation4], %s3399_s1 }
 0x2fd   : >> { %4805 = vmatprep.subr.bf16.mxu0 %v4804_v56  ;;  %v1071_v7 = vld [vmem:[%s1070_s29 + $0x2] sm:$0xff]  ;;  %v1072_v61 = vld [vmem:[%s1070_s29 + $0xa] sm:$0x7]  ;;  %p1062_p2 = scmp.ge.s32.totalorder %s1065_s2, 11  }
 0x2fe   : >> { %4807 = vmatpush3.bf16.msra.mxu0 %v4804_v56  ;;  %4142 = vmatprep.mubr.f32.mxu0 %v1071_v7  ;;  %v3400_v16 = vld [vmem:[%s7281_s3 + $0x180] sm:$0xff] (%p1062_p2)  ;;  %v3401_v17 = vld [vmem:[%s7281_s3 + $0x188] sm:$0xff] (%p1062_p2)  ;;  %v3402_v18 = vld [vmem:[%s7281_s3 + $0x190] sm:$0xff] (%p1062_p2)  ;;  %s6291_s1 = smov (%p1062_p2), 0  }
 0x2ff   : >> { %4809 = vmatprep.subr.bf16.mxu0 %v4808_v57  ;;  %v3403_v19 = vld [vmem:[%s7281_s3 + $0x198] sm:$0xff] (%p1062_p2)  ;;  %v3404_v20 = vld [vmem:[%s7281_s3 + $0x1a0] sm:$0xff] (%p1062_p2)  ;;  %v3405_v21 = vld [vmem:[%s7281_s3 + $0x1a8] sm:$0xff] (%p1062_p2) }
 0x300   : > { %v3406_v22 = vld [vmem:[%s7281_s3 + $0x1b0] sm:$0xff] (%p1062_p2)  ;;  %v3407_v23 = vld [vmem:[%s7281_s3 + $0x1b8] sm:$0xff] (%p1062_p2)  ;;  %v3408_v24 = vld [vmem:[%s7281_s3 + $0x1c0] sm:$0xff] (%p1062_p2) }
 0x301   : >> { %v1069_v62 = vld [vmem:[%s1067_s12 + $0x8] sm:$0x7]  ;;  %v1068_v11 = vld [vmem:[%s1067_s12] sm:$0xff]  ;;  %v3410_v26 = vld [vmem:[%s7281_s3 + $0x1d0] sm:$0xff] (%p1062_p2) }
 0x302   : >> { %4811 = vmatpush3.bf16.msra.mxu0 %v4808_v57  ;;  %v3409_v25 = vld [vmem:[%s7281_s3 + $0x1c8] sm:$0xff] (%p1062_p2)  ;;  %v3411_v27 = vld [vmem:[%s7281_s3 + $0x1d8] sm:$0xff] (%p1062_p2)  ;;  %v3412_v28 = vld [vmem:[%s7281_s3 + $0x1e0] sm:$0xff] (%p1062_p2) }
 0x303   : >> { %4813 = vmatprep.subr.bf16.mxu0 %v4812_v6  ;;  %v3413_v29 = vld [vmem:[%s7281_s3 + $0x1e8] sm:$0xff] (%p1062_p2)  ;;  %v3414_v30 = vld [vmem:[%s7281_s3 + $0x1f0] sm:$0xff] (%p1062_p2)  ;;  %v3415_v31 = vld [vmem:[%s7281_s3 + $0x1f8] sm:$0xff] (%p1062_p2) }
 0x306   : >> { %4815 = vmatpush3.bf16.msra.mxu0 %v4812_v6 }
 0x307   : >> { %4817 = vmatprep.subr.bf16.mxu0 %v4816_v8 }
 0x30a   : >> { %4819 = vmatpush3.bf16.msra.mxu0 %v4816_v8 }
 0x30b   : >> { %4821 = vmatprep.subr.bf16.mxu0 %v4820_v4 }
 0x30e   : >> { %4823 = vmatpush3.bf16.msra.mxu0 %v4820_v4 }
 0x30f   : >> { %4825 = vmatprep.subr.bf16.mxu0 %v4824_v5 }
 0x312   : >> { %4827 = vmatpush3.bf16.msra.mxu0 %v4824_v5 }
 0x313   : >> { %4829 = vmatprep.subr.bf16.mxu0 %v4828_v9 }
 0x316   : >> { %4831 = vmatpush3.bf16.msra.mxu0 %v4828_v9 }
 0x317   : >> { %4833 = vmatprep.subr.bf16.mxu0 %v4832_v10 }
 0x31a   : >> { %4835 = vmatpush3.bf16.msra.mxu0 %v4832_v10 }
 0x31d   : >> { %4143 = vmatmul.mubr.f32.vlgmr.msra.gmra.mrb[0].mxu0 %v1072_v61 }
 0x3ee   : > { %1064 = sbr.rel (!%p1062_p2) target bundleno = 763 (0x2fb), region = 414 }
 0x3f0   : >> { %v4144_v12 = vpop.f32.mrb[0].mxu0 }
 0x3f1   : >> { %v1149_v13 = vadd.f32 %v4144_v12, %v1069_v62  ;;  %v1139_v14 = vpop.f32.mrb[1].mxu0 }
 0x3f2   : >> { %v1148_v15 = vadd.f32 %v1139_v14, %v1068_v11 }
 0x3f3   : >> { %1151 = vst [vmem:[%s1067_s12 + $0x8] sm:$0x7] %v1149_v13 }
 0x3f4   : >> { %1150 = vst [vmem:[%s1067_s12] sm:$0xff] %v1148_v15 }
 0x3f5 LB: >> { %v4836_v32 = vpack.c.bf16 %v3401_v17, %v3400_v16  ;;  %v4840_v33 = vpack.c.bf16 %v3403_v19, %v3402_v18  ;;  %s3416_s29 = sshll.u32 %s5755_s1, 4  ;;  %v4844_v34 = vpack.c.bf16 %v3405_v21, %v3404_v20  ;;  %v4848_v36 = vpack.c.bf16 %v3407_v23, %v3406_v22  ;;  %s1174_s1 = sadd.s32 1, %s5755_s1   ;;  %s5755_s1 = sphi %s6291_s1, %s1174_s1  }
 0x3f6   : >> { %s3064_s2 = scalar_lea.vmem [#allocation3], %s3416_s29  ;;  %v4852_v37 = vpack.c.bf16 %v3409_v25, %v3408_v24  ;;  %v4856_v38 = vpack.c.bf16 %v3411_v27, %v3410_v26  ;;  %v4860_v39 = vpack.c.bf16 %v3413_v29, %v3412_v28  ;;  %v4864_v40 = vpack.c.bf16 %v3415_v31, %v3414_v30  ;;  %s1176_s12 = scalar_lea.vmem [#allocation4], %s3416_s29 }
 0x3f7   : >> { %4837 = vmatprep.subr.bf16.mxu0 %v4836_v32  ;;  %v3418_v35 = vld [vmem:[%s3064_s2 + $0x10] sm:$0xff]  ;;  %v3419_v41 = vld [vmem:[%s3064_s2 + $0x18] sm:$0x7]  ;;  %p1171_p3 = scmp.ge.s32.totalorder %s1174_s1, 11  }
 0x3f8   : >> { %4839 = vmatpush3.bf16.msra.mxu0 %v4836_v32  ;;  %4177 = vmatprep.mubr.f32.mxu0 %v3418_v35  ;;  %v3420_v47 = vld [vmem:[%s7281_s3 + $0x200] sm:$0xff] (%p1171_p3)  ;;  %v3421_v48 = vld [vmem:[%s7281_s3 + $0x208] sm:$0xff] (%p1171_p3)  ;;  %v3422_v49 = vld [vmem:[%s7281_s3 + $0x210] sm:$0xff] (%p1171_p3)  ;;  %s6348_s29 = smov (%p1171_p3), 0  }
 0x3f9   : >> { %4841 = vmatprep.subr.bf16.mxu0 %v4840_v33  ;;  %v3423_v50 = vld [vmem:[%s7281_s3 + $0x218] sm:$0xff] (%p1171_p3)  ;;  %v3424_v51 = vld [vmem:[%s7281_s3 + $0x220] sm:$0xff] (%p1171_p3)  ;;  %v3425_v52 = vld [vmem:[%s7281_s3 + $0x228] sm:$0xff] (%p1171_p3) }
 0x3fa   : > { %v3426_v53 = vld [vmem:[%s7281_s3 + $0x230] sm:$0xff] (%p1171_p3)  ;;  %v3427_v54 = vld [vmem:[%s7281_s3 + $0x238] sm:$0xff] (%p1171_p3)  ;;  %v3428_v55 = vld [vmem:[%s7281_s3 + $0x240] sm:$0xff] (%p1171_p3) }
 0x3fb   : >> { %v1178_v42 = vld [vmem:[%s1176_s12 + $0x8] sm:$0x7]  ;;  %v1177_v43 = vld [vmem:[%s1176_s12] sm:$0xff]  ;;  %v3430_v63 = vld [vmem:[%s7281_s3 + $0x250] sm:$0xff] (%p1171_p3) }
 0x3fc   : >> { %4843 = vmatpush3.bf16.msra.mxu0 %v4840_v33  ;;  %v3429_v60 = vld [vmem:[%s7281_s3 + $0x248] sm:$0xff] (%p1171_p3)  ;;  %v3431_v1 = vld [vmem:[%s7281_s3 + $0x258] sm:$0xff] (%p1171_p3)  ;;  %v3432_v58 = vld [vmem:[%s7281_s3 + $0x260] sm:$0xff] (%p1171_p3) }
 0x3fd   : >> { %4845 = vmatprep.subr.bf16.mxu0 %v4844_v34  ;;  %v3433_v59 = vld [vmem:[%s7281_s3 + $0x268] sm:$0xff] (%p1171_p3)  ;;  %v3434_v2 = vld [vmem:[%s7281_s3 + $0x270] sm:$0xff] (%p1171_p3)  ;;  %v3435_v3 = vld [vmem:[%s7281_s3 + $0x278] sm:$0xff] (%p1171_p3) }
 0x400   : >> { %4847 = vmatpush3.bf16.msra.mxu0 %v4844_v34 }
 0x401   : >> { %4849 = vmatprep.subr.bf16.mxu0 %v4848_v36 }
 0x404   : >> { %4851 = vmatpush3.bf16.msra.mxu0 %v4848_v36 }
 0x405   : >> { %4853 = vmatprep.subr.bf16.mxu0 %v4852_v37 }
 0x408   : >> { %4855 = vmatpush3.bf16.msra.mxu0 %v4852_v37 }
 0x409   : >> { %4857 = vmatprep.subr.bf16.mxu0 %v4856_v38 }
 0x40c   : >> { %4859 = vmatpush3.bf16.msra.mxu0 %v4856_v38 }
 0x40d   : >> { %4861 = vmatprep.subr.bf16.mxu0 %v4860_v39 }
 0x410   : >> { %4863 = vmatpush3.bf16.msra.mxu0 %v4860_v39 }
 0x411   : >> { %4865 = vmatprep.subr.bf16.mxu0 %v4864_v40 }
 0x414   : >> { %4867 = vmatpush3.bf16.msra.mxu0 %v4864_v40 }
 0x417   : >> { %4178 = vmatmul.mubr.f32.vlgmr.msra.gmra.mrb[0].mxu0 %v3419_v41 }
 0x4e8   : > { %1173 = sbr.rel (!%p1171_p3) target bundleno = 1013 (0x3f5), region = 425 }
 0x4ea   : >> { %v4179_v44 = vpop.f32.mrb[0].mxu0 }
 0x4eb   : >> { %v1260_v45 = vadd.f32 %v4179_v44, %v1178_v42  ;;  %v1250_v0 = vpop.f32.mrb[1].mxu0 }
 0x4ec   : >> { %v1259_v46 = vadd.f32 %v1250_v0, %v1177_v43 }
 0x4ed   : >> { %1262 = vst [vmem:[%s1176_s12 + $0x8] sm:$0x7] %v1260_v45 }
 0x4ee   : >> { %1261 = vst [vmem:[%s1176_s12] sm:$0xff] %v1259_v46 }
 0x4ef LB: >> { %v4868_v56 = vpack.c.bf16 %v3421_v48, %v3420_v47  ;;  %v4872_v57 = vpack.c.bf16 %v3423_v50, %v3422_v49  ;;  %s3436_s2 = sshll.u32 %s5759_s29, 4  ;;  %v4876_v6 = vpack.c.bf16 %v3425_v52, %v3424_v51  ;;  %v4880_v8 = vpack.c.bf16 %v3427_v54, %v3426_v53  ;;  %s1285_s29 = sadd.s32 1, %s5759_s29   ;;  %s5759_s29 = sphi %s6348_s29, %s1285_s29  }
 0x4f0   : >> { %s3069_s1 = scalar_lea.vmem [#allocation3], %s3436_s2  ;;  %v4884_v4 = vpack.c.bf16 %v3429_v60, %v3428_v55  ;;  %v4888_v5 = vpack.c.bf16 %v3431_v1, %v3430_v63  ;;  %v4892_v9 = vpack.c.bf16 %v3433_v59, %v3432_v58  ;;  %v4896_v10 = vpack.c.bf16 %v3435_v3, %v3434_v2  ;;  %s1287_s12 = scalar_lea.vmem [#allocation4], %s3436_s2 }
 0x4f1   : >> { %4869 = vmatprep.subr.bf16.mxu0 %v4868_v56  ;;  %v3438_v7 = vld [vmem:[%s3069_s1 + $0x11] sm:$0xff]  ;;  %v3439_v61 = vld [vmem:[%s3069_s1 + $0x19] sm:$0x7]  ;;  %p1282_p4 = scmp.ge.s32.totalorder %s1285_s29, 11  }
 0x4f2   : >> { %4871 = vmatpush3.bf16.msra.mxu0 %v4868_v56  ;;  %4212 = vmatprep.mubr.f32.mxu0 %v3438_v7  ;;  %v3440_v16 = vld [vmem:[%s7281_s3 + $0x280] sm:$0xff] (%p1282_p4)  ;;  %v3441_v17 = vld [vmem:[%s7281_s3 + $0x288] sm:$0xff] (%p1282_p4)  ;;  %v3442_v18 = vld [vmem:[%s7281_s3 + $0x290] sm:$0xff] (%p1282_p4)  ;;  %s6405_s2 = smov (%p1282_p4), 0  }
 0x4f3   : >> { %4873 = vmatprep.subr.bf16.mxu0 %v4872_v57  ;;  %v3443_v19 = vld [vmem:[%s7281_s3 + $0x298] sm:$0xff] (%p1282_p4)  ;;  %v3444_v20 = vld [vmem:[%s7281_s3 + $0x2a0] sm:$0xff] (%p1282_p4)  ;;  %v3445_v21 = vld [vmem:[%s7281_s3 + $0x2a8] sm:$0xff] (%p1282_p4) }
 0x4f4   : > { %v3446_v22 = vld [vmem:[%s7281_s3 + $0x2b0] sm:$0xff] (%p1282_p4)  ;;  %v3447_v23 = vld [vmem:[%s7281_s3 + $0x2b8] sm:$0xff] (%p1282_p4)  ;;  %v3448_v24 = vld [vmem:[%s7281_s3 + $0x2c0] sm:$0xff] (%p1282_p4) }
 0x4f5   : >> { %v1289_v62 = vld [vmem:[%s1287_s12 + $0x8] sm:$0x7]  ;;  %v1288_v11 = vld [vmem:[%s1287_s12] sm:$0xff]  ;;  %v3450_v26 = vld [vmem:[%s7281_s3 + $0x2d0] sm:$0xff] (%p1282_p4) }
 0x4f6   : >> { %4875 = vmatpush3.bf16.msra.mxu0 %v4872_v57  ;;  %v3449_v25 = vld [vmem:[%s7281_s3 + $0x2c8] sm:$0xff] (%p1282_p4)  ;;  %v3451_v27 = vld [vmem:[%s7281_s3 + $0x2d8] sm:$0xff] (%p1282_p4)  ;;  %v3452_v28 = vld [vmem:[%s7281_s3 + $0x2e0] sm:$0xff] (%p1282_p4) }
 0x4f7   : >> { %4877 = vmatprep.subr.bf16.mxu0 %v4876_v6  ;;  %v3453_v29 = vld [vmem:[%s7281_s3 + $0x2e8] sm:$0xff] (%p1282_p4)  ;;  %v3454_v30 = vld [vmem:[%s7281_s3 + $0x2f0] sm:$0xff] (%p1282_p4)  ;;  %v3455_v31 = vld [vmem:[%s7281_s3 + $0x2f8] sm:$0xff] (%p1282_p4) }
 0x4fa   : >> { %4879 = vmatpush3.bf16.msra.mxu0 %v4876_v6 }
 0x4fb   : >> { %4881 = vmatprep.subr.bf16.mxu0 %v4880_v8 }
 0x4fe   : >> { %4883 = vmatpush3.bf16.msra.mxu0 %v4880_v8 }
 0x4ff   : >> { %4885 = vmatprep.subr.bf16.mxu0 %v4884_v4 }
 0x502   : >> { %4887 = vmatpush3.bf16.msra.mxu0 %v4884_v4 }
 0x503   : >> { %4889 = vmatprep.subr.bf16.mxu0 %v4888_v5 }
 0x506   : >> { %4891 = vmatpush3.bf16.msra.mxu0 %v4888_v5 }
 0x507   : >> { %4893 = vmatprep.subr.bf16.mxu0 %v4892_v9 }
 0x50a   : >> { %4895 = vmatpush3.bf16.msra.mxu0 %v4892_v9 }
 0x50b   : >> { %4897 = vmatprep.subr.bf16.mxu0 %v4896_v10 }
 0x50e   : >> { %4899 = vmatpush3.bf16.msra.mxu0 %v4896_v10 }
 0x511   : >> { %4213 = vmatmul.mubr.f32.vlgmr.msra.gmra.mrb[0].mxu0 %v3439_v61 }
 0x5e2   : > { %1284 = sbr.rel (!%p1282_p4) target bundleno = 1263 (0x4ef), region = 436 }
 0x5e4   : >> { %v4214_v12 = vpop.f32.mrb[0].mxu0 }
 0x5e5   : >> { %v1371_v13 = vadd.f32 %v4214_v12, %v1289_v62  ;;  %v1361_v14 = vpop.f32.mrb[1].mxu0 }
 0x5e6   : >> { %v1370_v15 = vadd.f32 %v1361_v14, %v1288_v11 }
 0x5e7   : >> { %1373 = vst [vmem:[%s1287_s12 + $0x8] sm:$0x7] %v1371_v13 }
 0x5e8   : >> { %1372 = vst [vmem:[%s1287_s12] sm:$0xff] %v1370_v15 }
 0x5e9 LB: >> { %v4900_v32 = vpack.c.bf16 %v3441_v17, %v3440_v16  ;;  %v4904_v33 = vpack.c.bf16 %v3443_v19, %v3442_v18  ;;  %s3456_s1 = sshll.u32 %s5763_s2, 4  ;;  %v4908_v34 = vpack.c.bf16 %v3445_v21, %v3444_v20  ;;  %v4912_v36 = vpack.c.bf16 %v3447_v23, %v3446_v22  ;;  %s1396_s2 = sadd.s32 1, %s5763_s2   ;;  %s5763_s2 = sphi %s6405_s2, %s1396_s2  }
 0x5ea   : >> { %s3074_s29 = scalar_lea.vmem [#allocation3], %s3456_s1  ;;  %v4916_v37 = vpack.c.bf16 %v3449_v25, %v3448_v24  ;;  %v4920_v38 = vpack.c.bf16 %v3451_v27, %v3450_v26  ;;  %v4924_v39 = vpack.c.bf16 %v3453_v29, %v3452_v28  ;;  %v4928_v40 = vpack.c.bf16 %v3455_v31, %v3454_v30  ;;  %s1398_s12 = scalar_lea.vmem [#allocation4], %s3456_s1 }
 0x5eb   : >> { %4901 = vmatprep.subr.bf16.mxu0 %v4900_v32  ;;  %v3458_v35 = vld [vmem:[%s3074_s29 + $0x12] sm:$0xff]  ;;  %v3459_v41 = vld [vmem:[%s3074_s29 + $0x1a] sm:$0x7]  ;;  %p1393_p7 = scmp.ge.s32.totalorder %s1396_s2, 11  }
 0x5ec   : >> { %4903 = vmatpush3.bf16.msra.mxu0 %v4900_v32  ;;  %4247 = vmatprep.mubr.f32.mxu0 %v3458_v35  ;;  %v3460_v47 = vld [vmem:[%s7281_s3 + $0x300] sm:$0xff] (%p1393_p7)  ;;  %v3461_v48 = vld [vmem:[%s7281_s3 + $0x308] sm:$0xff] (%p1393_p7)  ;;  %v3462_v49 = vld [vmem:[%s7281_s3 + $0x310] sm:$0xff] (%p1393_p7)  ;;  %s6462_s1 = smov (%p1393_p7), 0  }
 0x5ed   : >> { %4905 = vmatprep.subr.bf16.mxu0 %v4904_v33  ;;  %v3463_v50 = vld [vmem:[%s7281_s3 + $0x318] sm:$0xff] (%p1393_p7)  ;;  %v3464_v51 = vld [vmem:[%s7281_s3 + $0x320] sm:$0xff] (%p1393_p7)  ;;  %v3465_v52 = vld [vmem:[%s7281_s3 + $0x328] sm:$0xff] (%p1393_p7) }
 0x5ee   : > { %v3466_v53 = vld [vmem:[%s7281_s3 + $0x330] sm:$0xff] (%p1393_p7)  ;;  %v3467_v54 = vld [vmem:[%s7281_s3 + $0x338] sm:$0xff] (%p1393_p7)  ;;  %v3468_v55 = vld [vmem:[%s7281_s3 + $0x340] sm:$0xff] (%p1393_p7) }
 0x5ef   : >> { %v1400_v42 = vld [vmem:[%s1398_s12 + $0x8] sm:$0x7]  ;;  %v1399_v43 = vld [vmem:[%s1398_s12] sm:$0xff]  ;;  %v3470_v63 = vld [vmem:[%s7281_s3 + $0x350] sm:$0xff] (%p1393_p7) }
 0x5f0   : >> { %4907 = vmatpush3.bf16.msra.mxu0 %v4904_v33  ;;  %v3469_v60 = vld [vmem:[%s7281_s3 + $0x348] sm:$0xff] (%p1393_p7)  ;;  %v3471_v1 = vld [vmem:[%s7281_s3 + $0x358] sm:$0xff] (%p1393_p7)  ;;  %v3472_v58 = vld [vmem:[%s7281_s3 + $0x360] sm:$0xff] (%p1393_p7) }
 0x5f1   : >> { %4909 = vmatprep.subr.bf16.mxu0 %v4908_v34  ;;  %v3473_v59 = vld [vmem:[%s7281_s3 + $0x368] sm:$0xff] (%p1393_p7)  ;;  %v3474_v2 = vld [vmem:[%s7281_s3 + $0x370] sm:$0xff] (%p1393_p7)  ;;  %v3475_v3 = vld [vmem:[%s7281_s3 + $0x378] sm:$0xff] (%p1393_p7) }
 0x5f4   : >> { %4911 = vmatpush3.bf16.msra.mxu0 %v4908_v34 }
 0x5f5   : >> { %4913 = vmatprep.subr.bf16.mxu0 %v4912_v36 }
 0x5f8   : >> { %4915 = vmatpush3.bf16.msra.mxu0 %v4912_v36 }
 0x5f9   : >> { %4917 = vmatprep.subr.bf16.mxu0 %v4916_v37 }
 0x5fc   : >> { %4919 = vmatpush3.bf16.msra.mxu0 %v4916_v37 }
 0x5fd   : >> { %4921 = vmatprep.subr.bf16.mxu0 %v4920_v38 }
 0x600   : >> { %4923 = vmatpush3.bf16.msra.mxu0 %v4920_v38 }
 0x601   : >> { %4925 = vmatprep.subr.bf16.mxu0 %v4924_v39 }
 0x604   : >> { %4927 = vmatpush3.bf16.msra.mxu0 %v4924_v39 }
 0x605   : >> { %4929 = vmatprep.subr.bf16.mxu0 %v4928_v40 }
 0x608   : >> { %4931 = vmatpush3.bf16.msra.mxu0 %v4928_v40 }
 0x60b   : >> { %4248 = vmatmul.mubr.f32.vlgmr.msra.gmra.mrb[0].mxu0 %v3459_v41 }
 0x6dc   : > { %1395 = sbr.rel (!%p1393_p7) target bundleno = 1513 (0x5e9), region = 447 }
 0x6de   : >> { %v4249_v44 = vpop.f32.mrb[0].mxu0 }
 0x6df   : >> { %v1482_v45 = vadd.f32 %v4249_v44, %v1400_v42  ;;  %v1472_v0 = vpop.f32.mrb[1].mxu0 }
 0x6e0   : >> { %v1481_v46 = vadd.f32 %v1472_v0, %v1399_v43 }
 0x6e1   : >> { %1484 = vst [vmem:[%s1398_s12 + $0x8] sm:$0x7] %v1482_v45 }
 0x6e2   : >> { %1483 = vst [vmem:[%s1398_s12] sm:$0xff] %v1481_v46 }
 0x6e3 LB: >> { %v4932_v56 = vpack.c.bf16 %v3461_v48, %v3460_v47  ;;  %v4936_v57 = vpack.c.bf16 %v3463_v50, %v3462_v49  ;;  %s3476_s29 = sshll.u32 %s5767_s1, 4  ;;  %v4940_v6 = vpack.c.bf16 %v3465_v52, %v3464_v51  ;;  %v4944_v8 = vpack.c.bf16 %v3467_v54, %v3466_v53  ;;  %s1507_s1 = sadd.s32 1, %s5767_s1   ;;  %s5767_s1 = sphi %s6462_s1, %s1507_s1  }
 0x6e4   : >> { %s3079_s2 = scalar_lea.vmem [#allocation3], %s3476_s29  ;;  %v4948_v4 = vpack.c.bf16 %v3469_v60, %v3468_v55  ;;  %v4952_v5 = vpack.c.bf16 %v3471_v1, %v3470_v63  ;;  %v4956_v9 = vpack.c.bf16 %v3473_v59, %v3472_v58  ;;  %v4960_v10 = vpack.c.bf16 %v3475_v3, %v3474_v2  ;;  %s1509_s12 = scalar_lea.vmem [#allocation4], %s3476_s29 }
 0x6e5   : >> { %4933 = vmatprep.subr.bf16.mxu0 %v4932_v56  ;;  %v3478_v7 = vld [vmem:[%s3079_s2 + $0x20] sm:$0xff]  ;;  %v3479_v61 = vld [vmem:[%s3079_s2 + $0x28] sm:$0x7]  ;;  %p1504_p8 = scmp.ge.s32.totalorder %s1507_s1, 11  }
 0x6e6   : >> { %4935 = vmatpush3.bf16.msra.mxu0 %v4932_v56  ;;  %4282 = vmatprep.mubr.f32.mxu0 %v3478_v7  ;;  %v3480_v16 = vld [vmem:[%s7281_s3 + $0x380] sm:$0xff] (%p1504_p8)  ;;  %v3481_v17 = vld [vmem:[%s7281_s3 + $0x388] sm:$0xff] (%p1504_p8)  ;;  %v3482_v18 = vld [vmem:[%s7281_s3 + $0x390] sm:$0xff] (%p1504_p8)  ;;  %s6519_s29 = smov (%p1504_p8), 0  }
 0x6e7   : >> { %4937 = vmatprep.subr.bf16.mxu0 %v4936_v57  ;;  %v3483_v19 = vld [vmem:[%s7281_s3 + $0x398] sm:$0xff] (%p1504_p8)  ;;  %v3484_v20 = vld [vmem:[%s7281_s3 + $0x3a0] sm:$0xff] (%p1504_p8)  ;;  %v3485_v21 = vld [vmem:[%s7281_s3 + $0x3a8] sm:$0xff] (%p1504_p8) }
 0x6e8   : > { %v3486_v22 = vld [vmem:[%s7281_s3 + $0x3b0] sm:$0xff] (%p1504_p8)  ;;  %v3487_v23 = vld [vmem:[%s7281_s3 + $0x3b8] sm:$0xff] (%p1504_p8)  ;;  %v3488_v24 = vld [vmem:[%s7281_s3 + $0x3c0] sm:$0xff] (%p1504_p8) }
 0x6e9   : >> { %v1511_v62 = vld [vmem:[%s1509_s12 + $0x8] sm:$0x7]  ;;  %v1510_v11 = vld [vmem:[%s1509_s12] sm:$0xff]  ;;  %v3490_v26 = vld [vmem:[%s7281_s3 + $0x3d0] sm:$0xff] (%p1504_p8) }
 0x6ea   : >> { %4939 = vmatpush3.bf16.msra.mxu0 %v4936_v57  ;;  %v3489_v25 = vld [vmem:[%s7281_s3 + $0x3c8] sm:$0xff] (%p1504_p8)  ;;  %v3491_v27 = vld [vmem:[%s7281_s3 + $0x3d8] sm:$0xff] (%p1504_p8)  ;;  %v3492_v28 = vld [vmem:[%s7281_s3 + $0x3e0] sm:$0xff] (%p1504_p8) }
 0x6eb   : >> { %4941 = vmatprep.subr.bf16.mxu0 %v4940_v6  ;;  %v3493_v29 = vld [vmem:[%s7281_s3 + $0x3e8] sm:$0xff] (%p1504_p8)  ;;  %v3494_v30 = vld [vmem:[%s7281_s3 + $0x3f0] sm:$0xff] (%p1504_p8)  ;;  %v3495_v31 = vld [vmem:[%s7281_s3 + $0x3f8] sm:$0xff] (%p1504_p8) }
 0x6ee   : >> { %4943 = vmatpush3.bf16.msra.mxu0 %v4940_v6 }
 0x6ef   : >> { %4945 = vmatprep.subr.bf16.mxu0 %v4944_v8 }
 0x6f2   : >> { %4947 = vmatpush3.bf16.msra.mxu0 %v4944_v8 }
 0x6f3   : >> { %4949 = vmatprep.subr.bf16.mxu0 %v4948_v4 }
 0x6f6   : >> { %4951 = vmatpush3.bf16.msra.mxu0 %v4948_v4 }
 0x6f7   : >> { %4953 = vmatprep.subr.bf16.mxu0 %v4952_v5 }
 0x6fa   : >> { %4955 = vmatpush3.bf16.msra.mxu0 %v4952_v5 }
 0x6fb   : >> { %4957 = vmatprep.subr.bf16.mxu0 %v4956_v9 }
 0x6fe   : >> { %4959 = vmatpush3.bf16.msra.mxu0 %v4956_v9 }
 0x6ff   : >> { %4961 = vmatprep.subr.bf16.mxu0 %v4960_v10 }
 0x702   : >> { %4963 = vmatpush3.bf16.msra.mxu0 %v4960_v10 }
 0x705   : >> { %4283 = vmatmul.mubr.f32.vlgmr.msra.gmra.mrb[0].mxu0 %v3479_v61 }
 0x7d6   : > { %1506 = sbr.rel (!%p1504_p8) target bundleno = 1763 (0x6e3), region = 458 }
 0x7d8   : >> { %v4284_v12 = vpop.f32.mrb[0].mxu0 }
 0x7d9   : >> { %v1593_v13 = vadd.f32 %v4284_v12, %v1511_v62  ;;  %v1583_v14 = vpop.f32.mrb[1].mxu0 }
 0x7da   : >> { %v1592_v15 = vadd.f32 %v1583_v14, %v1510_v11 }
 0x7db   : >> { %1595 = vst [vmem:[%s1509_s12 + $0x8] sm:$0x7] %v1593_v13 }
 0x7dc   : >> { %1594 = vst [vmem:[%s1509_s12] sm:$0xff] %v1592_v15 }
 0x7dd LB: >> { %v4964_v32 = vpack.c.bf16 %v3481_v17, %v3480_v16  ;;  %v4968_v33 = vpack.c.bf16 %v3483_v19, %v3482_v18  ;;  %s3496_s2 = sshll.u32 %s5771_s29, 4  ;;  %v4972_v34 = vpack.c.bf16 %v3485_v21, %v3484_v20  ;;  %v4976_v36 = vpack.c.bf16 %v3487_v23, %v3486_v22  ;;  %s1618_s29 = sadd.s32 1, %s5771_s29   ;;  %s5771_s29 = sphi %s6519_s29, %s1618_s29  }
 0x7de   : >> { %s3084_s1 = scalar_lea.vmem [#allocation3], %s3496_s2  ;;  %v4980_v37 = vpack.c.bf16 %v3489_v25, %v3488_v24  ;;  %v4984_v38 = vpack.c.bf16 %v3491_v27, %v3490_v26  ;;  %v4988_v39 = vpack.c.bf16 %v3493_v29, %v3492_v28  ;;  %v4992_v40 = vpack.c.bf16 %v3495_v31, %v3494_v30  ;;  %s1620_s12 = scalar_lea.vmem [#allocation4], %s3496_s2 }
 0x7df   : >> { %4965 = vmatprep.subr.bf16.mxu0 %v4964_v32  ;;  %v3498_v35 = vld [vmem:[%s3084_s1 + $0x21] sm:$0xff]  ;;  %v3499_v41 = vld [vmem:[%s3084_s1 + $0x29] sm:$0x7]  ;;  %p1615_p9 = scmp.ge.s32.totalorder %s1618_s29, 11  }
 0x7e0   : >> { %4967 = vmatpush3.bf16.msra.mxu0 %v4964_v32  ;;  %4317 = vmatprep.mubr.f32.mxu0 %v3498_v35  ;;  %v3500_v47 = vld [vmem:[%s7281_s3 + $0x400] sm:$0xff] (%p1615_p9)  ;;  %v3501_v48 = vld [vmem:[%s7281_s3 + $0x408] sm:$0xff] (%p1615_p9)  ;;  %v3502_v49 = vld [vmem:[%s7281_s3 + $0x410] sm:$0xff] (%p1615_p9)  ;;  %s6576_s2 = smov (%p1615_p9), 0  }
 0x7e1   : >> { %4969 = vmatprep.subr.bf16.mxu0 %v4968_v33  ;;  %v3503_v50 = vld [vmem:[%s7281_s3 + $0x418] sm:$0xff] (%p1615_p9)  ;;  %v3504_v51 = vld [vmem:[%s7281_s3 + $0x420] sm:$0xff] (%p1615_p9)  ;;  %v3505_v52 = vld [vmem:[%s7281_s3 + $0x428] sm:$0xff] (%p1615_p9) }
 0x7e2   : > { %v3506_v53 = vld [vmem:[%s7281_s3 + $0x430] sm:$0xff] (%p1615_p9)  ;;  %v3507_v54 = vld [vmem:[%s7281_s3 + $0x438] sm:$0xff] (%p1615_p9)  ;;  %v3508_v55 = vld [vmem:[%s7281_s3 + $0x440] sm:$0xff] (%p1615_p9) }
 0x7e3   : >> { %v1622_v42 = vld [vmem:[%s1620_s12 + $0x8] sm:$0x7]  ;;  %v1621_v43 = vld [vmem:[%s1620_s12] sm:$0xff]  ;;  %v3510_v63 = vld [vmem:[%s7281_s3 + $0x450] sm:$0xff] (%p1615_p9) }
 0x7e4   : >> { %4971 = vmatpush3.bf16.msra.mxu0 %v4968_v33  ;;  %v3509_v60 = vld [vmem:[%s7281_s3 + $0x448] sm:$0xff] (%p1615_p9)  ;;  %v3511_v1 = vld [vmem:[%s7281_s3 + $0x458] sm:$0xff] (%p1615_p9)  ;;  %v3512_v58 = vld [vmem:[%s7281_s3 + $0x460] sm:$0xff] (%p1615_p9) }
 0x7e5   : >> { %4973 = vmatprep.subr.bf16.mxu0 %v4972_v34  ;;  %v3513_v59 = vld [vmem:[%s7281_s3 + $0x468] sm:$0xff] (%p1615_p9)  ;;  %v3514_v2 = vld [vmem:[%s7281_s3 + $0x470] sm:$0xff] (%p1615_p9)  ;;  %v3515_v3 = vld [vmem:[%s7281_s3 + $0x478] sm:$0xff] (%p1615_p9) }
 0x7e8   : >> { %4975 = vmatpush3.bf16.msra.mxu0 %v4972_v34 }
 0x7e9   : >> { %4977 = vmatprep.subr.bf16.mxu0 %v4976_v36 }
 0x7ec   : >> { %4979 = vmatpush3.bf16.msra.mxu0 %v4976_v36 }
 0x7ed   : >> { %4981 = vmatprep.subr.bf16.mxu0 %v4980_v37 }
 0x7f0   : >> { %4983 = vmatpush3.bf16.msra.mxu0 %v4980_v37 }
 0x7f1   : >> { %4985 = vmatprep.subr.bf16.mxu0 %v4984_v38 }
 0x7f4   : >> { %4987 = vmatpush3.bf16.msra.mxu0 %v4984_v38 }
 0x7f5   : >> { %4989 = vmatprep.subr.bf16.mxu0 %v4988_v39 }
 0x7f8   : >> { %4991 = vmatpush3.bf16.msra.mxu0 %v4988_v39 }
 0x7f9   : >> { %4993 = vmatprep.subr.bf16.mxu0 %v4992_v40 }
 0x7fc   : >> { %4995 = vmatpush3.bf16.msra.mxu0 %v4992_v40 }
 0x7ff   : >> { %4318 = vmatmul.mubr.f32.vlgmr.msra.gmra.mrb[0].mxu0 %v3499_v41 }
 0x8d0   : > { %1617 = sbr.rel (!%p1615_p9) target bundleno = 2013 (0x7dd), region = 469 }
 0x8d2   : >> { %v4319_v44 = vpop.f32.mrb[0].mxu0 }
 0x8d3   : >> { %v1704_v45 = vadd.f32 %v4319_v44, %v1622_v42  ;;  %v1694_v0 = vpop.f32.mrb[1].mxu0 }
 0x8d4   : >> { %v1703_v46 = vadd.f32 %v1694_v0, %v1621_v43 }
 0x8d5   : >> { %1706 = vst [vmem:[%s1620_s12 + $0x8] sm:$0x7] %v1704_v45 }
 0x8d6   : >> { %1705 = vst [vmem:[%s1620_s12] sm:$0xff] %v1703_v46 }
 0x8d7 LB: >> { %v4996_v56 = vpack.c.bf16 %v3501_v48, %v3500_v47  ;;  %v5000_v57 = vpack.c.bf16 %v3503_v50, %v3502_v49  ;;  %s3516_s1 = sshll.u32 %s5775_s2, 4  ;;  %v5004_v6 = vpack.c.bf16 %v3505_v52, %v3504_v51  ;;  %v5008_v8 = vpack.c.bf16 %v3507_v54, %v3506_v53  ;;  %s1729_s2 = sadd.s32 1, %s5775_s2   ;;  %s5775_s2 = sphi %s6576_s2, %s1729_s2  }
 0x8d8   : >> { %s3089_s29 = scalar_lea.vmem [#allocation3], %s3516_s1  ;;  %v5012_v4 = vpack.c.bf16 %v3509_v60, %v3508_v55  ;;  %v5016_v5 = vpack.c.bf16 %v3511_v1, %v3510_v63  ;;  %v5020_v9 = vpack.c.bf16 %v3513_v59, %v3512_v58  ;;  %v5024_v10 = vpack.c.bf16 %v3515_v3, %v3514_v2  ;;  %s1731_s12 = scalar_lea.vmem [#allocation4], %s3516_s1 }
 0x8d9   : >> { %4997 = vmatprep.subr.bf16.mxu0 %v4996_v56  ;;  %v3518_v7 = vld [vmem:[%s3089_s29 + $0x22] sm:$0xff]  ;;  %v3519_v61 = vld [vmem:[%s3089_s29 + $0x2a] sm:$0x7]  ;;  %p1726_p10 = scmp.ge.s32.totalorder %s1729_s2, 11  }
 0x8da   : >> { %4999 = vmatpush3.bf16.msra.mxu0 %v4996_v56  ;;  %4352 = vmatprep.mubr.f32.mxu0 %v3518_v7  ;;  %s5777_s30 = smov (%p1726_p10), 0  }
 0x8db   : >> { %5001 = vmatprep.subr.bf16.mxu0 %v5000_v57 }
 0x8dd   : >> { %v1733_v62 = vld [vmem:[%s1731_s12 + $0x8] sm:$0x7]  ;;  %v1732_v11 = vld [vmem:[%s1731_s12] sm:$0xff] }
 0x8de   : >> { %5003 = vmatpush3.bf16.msra.mxu0 %v5000_v57 }
 0x8df   : >> { %5005 = vmatprep.subr.bf16.mxu0 %v5004_v6 }
 0x8e2   : >> { %5007 = vmatpush3.bf16.msra.mxu0 %v5004_v6 }
 0x8e3   : >> { %5009 = vmatprep.subr.bf16.mxu0 %v5008_v8 }
 0x8e6   : >> { %5011 = vmatpush3.bf16.msra.mxu0 %v5008_v8 }
 0x8e7   : >> { %5013 = vmatprep.subr.bf16.mxu0 %v5012_v4 }
 0x8ea   : >> { %5015 = vmatpush3.bf16.msra.mxu0 %v5012_v4 }
 0x8eb   : >> { %5017 = vmatprep.subr.bf16.mxu0 %v5016_v5 }
 0x8ee   : >> { %5019 = vmatpush3.bf16.msra.mxu0 %v5016_v5 }
 0x8ef   : >> { %5021 = vmatprep.subr.bf16.mxu0 %v5020_v9 }
 0x8f2   : >> { %5023 = vmatpush3.bf16.msra.mxu0 %v5020_v9 }
 0x8f3   : >> { %5025 = vmatprep.subr.bf16.mxu0 %v5024_v10 }
 0x8f6   : >> { %5027 = vmatpush3.bf16.msra.mxu0 %v5024_v10 }
 0x8f9   : >> { %4353 = vmatmul.mubr.f32.vlgmr.msra.gmra.mrb[0].mxu0 %v3519_v61 }
 0x9ca   : > { %1728 = sbr.rel (!%p1726_p10) target bundleno = 2263 (0x8d7), region = 480 }
 0x9cc   : >> { %v4354_v12 = vpop.f32.mrb[0].mxu0 }
 0x9cd   : >> { %v1815_v13 = vadd.f32 %v4354_v12, %v1733_v62  ;;  %v1805_v14 = vpop.f32.mrb[1].mxu0 }
 0x9ce   : >> { %v1814_v15 = vadd.f32 %v1805_v14, %v1732_v11 }
 0x9cf   : >> { %1817 = vst [vmem:[%s1731_s12 + $0x8] sm:$0x7] %v1815_v13 }
 0x9d0   : >> { %1816 = vst [vmem:[%s1731_s12] sm:$0xff] %v1814_v15 }
 0x9d1 LB: >> { %s3520_s15 = sshll.u32 %s5779_s30, 4  ;;  %s1823_s30 = sadd.s32 1, %s5779_s30   ;;  %s5779_s30 = sphi %s5777_s30, %s1823_s30  }
 0x9d2   : >> { %s1825_s14 = scalar_lea.vmem [#allocation4], %s3520_s15  ;;  %p1820_p11 = scmp.ge.s32.totalorder %s1823_s30, 11  }
 0x9d3   : > { %s5781_s22 = smov (%p1820_p11), 0  }
 0x9d4   : > { %1822 = sbr.rel (!%p1820_p11) target bundleno = 2513 (0x9d1), region = 491 }
 0x9d7   : >> { %v1826_v16 = vld [vmem:[%s1825_s14] sm:$0xff]  ;;  %v1827_v17 = vld [vmem:[%s1825_s14 + $0x8] sm:$0x7] }
 0x9d8   : >> { %v1828_v18 = vmax.f32 %v1826_v16, 0.0  ;;  %v1829_v19 = vmax.f32 %v1827_v17, 0.0 }
 0x9da   : >> { %1830 = vst [vmem:[%s1825_s14] sm:$0xff] %v1828_v18  ;;  %1831 = vst [vmem:[%s1825_s14 + $0x8] sm:$0x7] %v1829_v19 }
 0x9db LB: >> { %s3689_s25 = sshll.u32 %s5783_s22, 5  ;;  %s3528_s16 = sshll.u32 %s5783_s22, 3  ;;  %s5783_s22 = sphi %s5781_s22, %s1837_s22  }
 0x9dc   : >> { %s1840_s0 = scalar_lea.vmem [#allocation4], %s3689_s25  ;;  %s1854_s13 = scalar_lea.vmem [#allocation5], %s3528_s16 }
 0x9dd   : >> { %s1837_s22 = sadd.s32 1, %s5783_s22  }
 0x9de   : >> { %p1834_p12 = scmp.ge.s32.totalorder %s1837_s22, 5  }
 0x9df   : > { %v3529_v27 = vld [vmem:[%s7284_s6] ss:$0 sm:$0xff] (%p1834_p12)  ;;  %s5785_s29 = smov (%p1834_p12), 0  }
 0x9e1   : >> { %v1841_v20 = vld [vmem:[%s1840_s0] ss:$2 sm:$0x1f]  ;;  %v3523_v21 = vld [vmem:[%s1840_s0 + $0x1] ss:$2 sm:$0x1f] }
 0x9e2   : >> { %v3526_v22 = vld [vmem:[%s1840_s0 + $0x10] ss:$2 sm:$0x1f]  ;;  %v3527_v23 = vld [vmem:[%s1840_s0 + $0x11] ss:$2 sm:$0x1f]  ;;  %v1850_v24 = vmax.f32 %v1841_v20, %v3523_v21 }
 0x9e3   : >> { %v1851_v25 = vmax.f32 %v3526_v22, %v3527_v23  ;;  %1836 = sbr.rel (!%p1834_p12) target bundleno = 2523 (0x9db), region = 502 }
 0x9e5   : >> { %v1852_v26 = vmax.f32 %v1850_v24, %v1851_v25 }
 0x9e7   : >> { %1855 = vst [vmem:[%s1854_s13] sm:$0x1f] %v1852_v26 }
 0x9ea LB: >> { %s3530_s12 = sshll.u32 %s5787_s29, 2  ;;  %s1862_s29 = sadd.s32 1, %s5787_s29   ;;  %s5787_s29 = sphi %s5785_s29, %s1862_s29  }
 0x9eb   : >> { %s1870_s30 = scalar_lea.vmem [#allocation6], %s3530_s12  ;;  %p1859_p13 = scmp.ge.s32.totalorder %s1862_s29, 3  }
 0x9ec   : >> { %1871 = vst [vmem:[%s1870_s30] sm:$0x7] %v3529_v27  ;;  %v1872_v28 = vld [vmem:[%s7283_s5] sm:$0xff] (%p1859_p13)  ;;  %v1873_v29 = vld [vmem:[%s7283_s5 + $0x8] sm:$0xff] (%p1859_p13)  ;;  %v1874_v30 = vld [vmem:[%s7283_s5 + $0x10] sm:$0xff] (%p1859_p13)  ;;  %s6636_s1 = smov (%p1859_p13), 0  }
 0x9ed   : > { %1861 = sbr.rel (!%p1859_p13) target bundleno = 2538 (0x9ea), region = 513  ;;  %v1875_v31 = vld [vmem:[%s7283_s5 + $0x18] sm:$0xff] (%p1859_p13)  ;;  %v1876_v32 = vld [vmem:[%s7283_s5 + $0x20] sm:$0xff] (%p1859_p13)  ;;  %v1877_v33 = vld [vmem:[%s7283_s5 + $0x28] sm:$0xff] (%p1859_p13) }
 0x9ee   : > { %v1878_v34 = vld [vmem:[%s7283_s5 + $0x30] sm:$0xff] (%p1859_p13)  ;;  %v1879_v35 = vld [vmem:[%s7283_s5 + $0x38] sm:$0xff] (%p1859_p13)  ;;  %v1880_v36 = vld [vmem:[%s7283_s5 + $0x40] sm:$0xff] (%p1859_p13) }
 0x9ef   : > { %v1881_v37 = vld [vmem:[%s7283_s5 + $0x48] sm:$0xff] (%p1859_p13)  ;;  %v1882_v38 = vld [vmem:[%s7283_s5 + $0x50] sm:$0xff] (%p1859_p13)  ;;  %v1883_v39 = vld [vmem:[%s7283_s5 + $0x58] sm:$0xff] (%p1859_p13) }
 0x9f0   : > { %v1884_v40 = vld [vmem:[%s7283_s5 + $0x60] sm:$0xff] (%p1859_p13)  ;;  %v1885_v41 = vld [vmem:[%s7283_s5 + $0x68] sm:$0xff] (%p1859_p13)  ;;  %v1886_v42 = vld [vmem:[%s7283_s5 + $0x70] sm:$0xff] (%p1859_p13) }
 0x9f1   : > { %v1887_v43 = vld [vmem:[%s7283_s5 + $0x78] sm:$0xff] (%p1859_p13) }
 0x9f4 LB: >> { %v5029_v44 = vpack.c.bf16 %v1873_v29, %v1872_v28  ;;  %v5830_v45 = vmov 0.0|0.0   ;;  %v5032_v0 = vpack.c.bf16 %v1875_v31, %v1874_v30  ;;  %vm5831_vm0 = vmmov 0   ;;  %s3532_s12 = sshll.u32 %s5791_s1, 3  ;;  %s3531_s30 = sshll.u32 %s5791_s1, 2  ;;  %s5791_s1 = sphi %s6636_s1, %s1893_s1  }
 0x9f5   : >> { %5028 = vmatprep.subr.bf16.mxu0 %v5830_v45  ;;  %v5832_v46 = vmov 0.0   ;;  %v5035_v47 = vpack.c.bf16 %v1877_v33, %v1876_v32  ;;  %v5038_v48 = vpack.c.bf16 %v1879_v35, %v1878_v34  ;;  %v5041_v49 = vpack.c.bf16 %v1881_v37, %v1880_v36  ;;  %s1898_s29 = scalar_lea.vmem [#allocation5], %s3532_s12  ;;  %s1895_s15 = scalar_lea.vmem [#allocation6], %s3531_s30 }
 0x9f6   : >> { %5030 = vmatpush3.bf16.msra.mxu0 %v5029_v44  ;;  %4387 = vmatprep.mubr.msk.f32.mxu0 %vm5831_vm0, %v5832_v46  ;;  %v5044_v50 = vpack.c.bf16 %v1883_v39, %v1882_v38  ;;  %v5047_v51 = vpack.c.bf16 %v1885_v41, %v1884_v40  ;;  %v5050_v52 = vpack.c.bf16 %v1887_v43, %v1886_v42  ;;  %v1899_v53 = vld [vmem:[%s1898_s29] sm:$0x7]  ;;  %s1893_s1 = sadd.s32 1, %s5791_s1  }
 0x9f7   : >> { %5031 = vmatprep.subr.bf16.mxu0 %v5830_v45  ;;  %v1896_v54 = vld [vmem:[%s1895_s15] sm:$0x7]  ;;  %p1890_p0 = scmp.ge.s32.totalorder %s1893_s1, 3  }
 0x9f8   : > { %v3533_v1 = vld [vmem:[%s7283_s5 + $0x80] sm:$0xff] (%p1890_p0)  ;;  %v3534_v58 = vld [vmem:[%s7283_s5 + $0x88] sm:$0xff] (%p1890_p0)  ;;  %v3535_v59 = vld [vmem:[%s7283_s5 + $0x90] sm:$0xff] (%p1890_p0)  ;;  %s6694_s29 = smov (%p1890_p0), 0  }
 0x9f9   : > { %v3536_v2 = vld [vmem:[%s7283_s5 + $0x98] sm:$0xff] (%p1890_p0)  ;;  %v3537_v3 = vld [vmem:[%s7283_s5 + $0xa0] sm:$0xff] (%p1890_p0)  ;;  %v3538_v56 = vld [vmem:[%s7283_s5 + $0xa8] sm:$0xff] (%p1890_p0) }
 0x9fa   : >> { %5033 = vmatpush3.bf16.msra.mxu0 %v5032_v0  ;;  %v3539_v57 = vld [vmem:[%s7283_s5 + $0xb0] sm:$0xff] (%p1890_p0)  ;;  %v3540_v6 = vld [vmem:[%s7283_s5 + $0xb8] sm:$0xff] (%p1890_p0)  ;;  %v3541_v7 = vld [vmem:[%s7283_s5 + $0xc0] sm:$0xff] (%p1890_p0) }
 0x9fb   : >> { %5034 = vmatprep.subr.bf16.mxu0 %v5830_v45  ;;  %v3542_v8 = vld [vmem:[%s7283_s5 + $0xc8] sm:$0xff] (%p1890_p0)  ;;  %v3543_v4 = vld [vmem:[%s7283_s5 + $0xd0] sm:$0xff] (%p1890_p0)  ;;  %v3544_v5 = vld [vmem:[%s7283_s5 + $0xd8] sm:$0xff] (%p1890_p0) }
 0x9fc   : > { %v3545_v9 = vld [vmem:[%s7283_s5 + $0xe0] sm:$0xff] (%p1890_p0)  ;;  %v3546_v10 = vld [vmem:[%s7283_s5 + $0xe8] sm:$0xff] (%p1890_p0)  ;;  %v3547_v61 = vld [vmem:[%s7283_s5 + $0xf0] sm:$0xff] (%p1890_p0) }
 0x9fd   : > { %v3548_v62 = vld [vmem:[%s7283_s5 + $0xf8] sm:$0xff] (%p1890_p0) }
 0x9fe   : >> { %5036 = vmatpush3.bf16.msra.mxu0 %v5035_v47 }
 0x9ff   : >> { %5037 = vmatprep.subr.bf16.mxu0 %v5830_v45 }
 0xa02   : >> { %5039 = vmatpush3.bf16.msra.mxu0 %v5038_v48 }
 0xa03   : >> { %5040 = vmatprep.subr.bf16.mxu0 %v5830_v45 }
 0xa06   : >> { %5042 = vmatpush3.bf16.msra.mxu0 %v5041_v49 }
 0xa07   : >> { %5043 = vmatprep.subr.bf16.mxu0 %v5830_v45 }
 0xa0a   : >> { %5045 = vmatpush3.bf16.msra.mxu0 %v5044_v50 }
 0xa0b   : >> { %5046 = vmatprep.subr.bf16.mxu0 %v5830_v45 }
 0xa0e   : >> { %5048 = vmatpush3.bf16.msra.mxu0 %v5047_v51 }
 0xa0f   : >> { %5049 = vmatprep.subr.bf16.mxu0 %v5830_v45 }
 0xa12   : >> { %5051 = vmatpush3.bf16.msra.mxu0 %v5050_v52 }
 0xa15   : >> { %4388 = vmatmul.mubr.f32.vlgmr.msra.gmra.mrb[0].mxu0 %v1899_v53 }
 0xae5   : > { %1892 = sbr.rel (!%p1890_p0) target bundleno = 2548 (0x9f4), region = 524 }
 0xae8   : >> { %v1966_v55 = vpop.f32.mrb[0].mxu0 }
 0xae9   : >> { %v1970_v60 = vadd.f32 %v1966_v55, %v1896_v54  ;;  %v4389_v63 = vpop.f32.mrb[1].mxu0 }
 0xaeb   : >> { %1971 = vst [vmem:[%s1895_s15] sm:$0x7] %v1970_v60 }
 0xaec LB: >> { %v5053_v11 = vpack.c.bf16 %v3534_v58, %v3533_v1  ;;  %v5833_v12 = vmov 0.0|0.0   ;;  %v5056_v13 = vpack.c.bf16 %v3536_v2, %v3535_v59  ;;  %vm5834_vm1 = vmmov 0   ;;  %s3550_s30 = sshll.u32 %s5795_s29, 3  ;;  %s3549_s15 = sshll.u32 %s5795_s29, 2  ;;  %s5795_s29 = sphi %s6694_s29, %s1994_s29  }
 0xaed   : >> { %5052 = vmatprep.subr.bf16.mxu0 %v5833_v12  ;;  %v5835_v14 = vmov 0.0   ;;  %v5059_v15 = vpack.c.bf16 %v3538_v56, %v3537_v3  ;;  %v5062_v16 = vpack.c.bf16 %v3540_v6, %v3539_v57  ;;  %v5065_v17 = vpack.c.bf16 %v3542_v8, %v3541_v7  ;;  %s1999_s1 = scalar_lea.vmem [#allocation5], %s3550_s30  ;;  %s1996_s14 = scalar_lea.vmem [#allocation6], %s3549_s15 }
 0xaee   : >> { %5054 = vmatpush3.bf16.msra.mxu0 %v5053_v11  ;;  %4422 = vmatprep.mubr.msk.f32.mxu0 %vm5834_vm1, %v5835_v14  ;;  %v5068_v18 = vpack.c.bf16 %v3544_v5, %v3543_v4  ;;  %v5071_v19 = vpack.c.bf16 %v3546_v10, %v3545_v9  ;;  %v5074_v20 = vpack.c.bf16 %v3548_v62, %v3547_v61  ;;  %v2000_v21 = vld [vmem:[%s1999_s1 + $0x1] sm:$0x7]  ;;  %s1994_s29 = sadd.s32 1, %s5795_s29  }
 0xaef   : >> { %5055 = vmatprep.subr.bf16.mxu0 %v5833_v12  ;;  %p1991_p1 = scmp.ge.s32.totalorder %s1994_s29, 3  }
 0xaf0   : > { %v3551_v26 = vld [vmem:[%s7283_s5 + $0x100] sm:$0xff] (%p1991_p1)  ;;  %v3552_v27 = vld [vmem:[%s7283_s5 + $0x108] sm:$0xff] (%p1991_p1)  ;;  %v3553_v28 = vld [vmem:[%s7283_s5 + $0x110] sm:$0xff] (%p1991_p1)  ;;  %s6752_s1 = smov (%p1991_p1), 0  }
 0xaf1   : > { %v3554_v29 = vld [vmem:[%s7283_s5 + $0x118] sm:$0xff] (%p1991_p1)  ;;  %v3555_v30 = vld [vmem:[%s7283_s5 + $0x120] sm:$0xff] (%p1991_p1)  ;;  %v3556_v31 = vld [vmem:[%s7283_s5 + $0x128] sm:$0xff] (%p1991_p1) }
 0xaf2   : >> { %5057 = vmatpush3.bf16.msra.mxu0 %v5056_v13  ;;  %v1997_v22 = vld [vmem:[%s1996_s14] sm:$0x7]  ;;  %v3557_v32 = vld [vmem:[%s7283_s5 + $0x130] sm:$0xff] (%p1991_p1)  ;;  %v3558_v33 = vld [vmem:[%s7283_s5 + $0x138] sm:$0xff] (%p1991_p1) }
 0xaf3   : >> { %5058 = vmatprep.subr.bf16.mxu0 %v5833_v12  ;;  %v3559_v34 = vld [vmem:[%s7283_s5 + $0x140] sm:$0xff] (%p1991_p1)  ;;  %v3560_v35 = vld [vmem:[%s7283_s5 + $0x148] sm:$0xff] (%p1991_p1)  ;;  %v3561_v36 = vld [vmem:[%s7283_s5 + $0x150] sm:$0xff] (%p1991_p1) }
 0xaf4   : > { %v3562_v37 = vld [vmem:[%s7283_s5 + $0x158] sm:$0xff] (%p1991_p1)  ;;  %v3563_v38 = vld [vmem:[%s7283_s5 + $0x160] sm:$0xff] (%p1991_p1)  ;;  %v3564_v39 = vld [vmem:[%s7283_s5 + $0x168] sm:$0xff] (%p1991_p1) }
 0xaf5   : > { %v3565_v40 = vld [vmem:[%s7283_s5 + $0x170] sm:$0xff] (%p1991_p1)  ;;  %v3566_v41 = vld [vmem:[%s7283_s5 + $0x178] sm:$0xff] (%p1991_p1) }
 0xaf6   : >> { %5060 = vmatpush3.bf16.msra.mxu0 %v5059_v15 }
 0xaf7   : >> { %5061 = vmatprep.subr.bf16.mxu0 %v5833_v12 }
 0xafa   : >> { %5063 = vmatpush3.bf16.msra.mxu0 %v5062_v16 }
 0xafb   : >> { %5064 = vmatprep.subr.bf16.mxu0 %v5833_v12 }
 0xafe   : >> { %5066 = vmatpush3.bf16.msra.mxu0 %v5065_v17 }
 0xaff   : >> { %5067 = vmatprep.subr.bf16.mxu0 %v5833_v12 }
 0xb02   : >> { %5069 = vmatpush3.bf16.msra.mxu0 %v5068_v18 }
 0xb03   : >> { %5070 = vmatprep.subr.bf16.mxu0 %v5833_v12 }
 0xb06   : >> { %5072 = vmatpush3.bf16.msra.mxu0 %v5071_v19 }
 0xb07   : >> { %5073 = vmatprep.subr.bf16.mxu0 %v5833_v12 }
 0xb0a   : >> { %5075 = vmatpush3.bf16.msra.mxu0 %v5074_v20 }
 0xb0d   : >> { %4423 = vmatmul.mubr.f32.vlgmr.msra.gmra.mrb[0].mxu0 %v2000_v21 }
 0xbdd   : > { %1993 = sbr.rel (!%p1991_p1) target bundleno = 2796 (0xaec), region = 535 }
 0xbe0   : >> { %v2067_v23 = vpop.f32.mrb[0].mxu0 }
 0xbe1   : >> { %v2071_v24 = vadd.f32 %v2067_v23, %v1997_v22  ;;  %v4424_v25 = vpop.f32.mrb[1].mxu0 }
 0xbe3   : >> { %2072 = vst [vmem:[%s1996_s14] sm:$0x7] %v2071_v24 }
 0xbe4 LB: >> { %v5077_v42 = vpack.c.bf16 %v3552_v27, %v3551_v26  ;;  %v5836_v43 = vmov 0.0|0.0   ;;  %v5080_v44 = vpack.c.bf16 %v3554_v29, %v3553_v28  ;;  %vm5837_vm2 = vmmov 0   ;;  %s3568_s15 = sshll.u32 %s5799_s1, 3  ;;  %s3567_s14 = sshll.u32 %s5799_s1, 2  ;;  %s5799_s1 = sphi %s6752_s1, %s2095_s1  }
 0xbe5   : >> { %5076 = vmatprep.subr.bf16.mxu0 %v5836_v43  ;;  %v5838_v45 = vmov 0.0   ;;  %v5083_v0 = vpack.c.bf16 %v3556_v31, %v3555_v30  ;;  %v5086_v46 = vpack.c.bf16 %v3558_v33, %v3557_v32  ;;  %v5089_v47 = vpack.c.bf16 %v3560_v35, %v3559_v34  ;;  %s2100_s29 = scalar_lea.vmem [#allocation5], %s3568_s15  ;;  %s2097_s22 = scalar_lea.vmem [#allocation6], %s3567_s14 }
 0xbe6   : >> { %5078 = vmatpush3.bf16.msra.mxu0 %v5077_v42  ;;  %4457 = vmatprep.mubr.msk.f32.mxu0 %vm5837_vm2, %v5838_v45  ;;  %v5092_v48 = vpack.c.bf16 %v3562_v37, %v3561_v36  ;;  %v5095_v49 = vpack.c.bf16 %v3564_v39, %v3563_v38  ;;  %v5098_v50 = vpack.c.bf16 %v3566_v41, %v3565_v40  ;;  %v2101_v51 = vld [vmem:[%s2100_s29 + $0x2] sm:$0x7]  ;;  %s2095_s1 = sadd.s32 1, %s5799_s1  }
 0xbe7   : >> { %5079 = vmatprep.subr.bf16.mxu0 %v5836_v43  ;;  %p2092_p2 = scmp.ge.s32.totalorder %s2095_s1, 3  }
 0xbe8   : > { %v3569_v60 = vld [vmem:[%s7283_s5 + $0x180] sm:$0xff] (%p2092_p2)  ;;  %v3570_v63 = vld [vmem:[%s7283_s5 + $0x188] sm:$0xff] (%p2092_p2)  ;;  %v3571_v1 = vld [vmem:[%s7283_s5 + $0x190] sm:$0xff] (%p2092_p2)  ;;  %s6810_s29 = smov (%p2092_p2), 0  }
 0xbe9   : > { %v3572_v58 = vld [vmem:[%s7283_s5 + $0x198] sm:$0xff] (%p2092_p2)  ;;  %v3573_v59 = vld [vmem:[%s7283_s5 + $0x1a0] sm:$0xff] (%p2092_p2)  ;;  %v3574_v2 = vld [vmem:[%s7283_s5 + $0x1a8] sm:$0xff] (%p2092_p2) }
 0xbea   : >> { %5081 = vmatpush3.bf16.msra.mxu0 %v5080_v44  ;;  %v2098_v52 = vld [vmem:[%s2097_s22] sm:$0x7]  ;;  %v3575_v3 = vld [vmem:[%s7283_s5 + $0x1b0] sm:$0xff] (%p2092_p2)  ;;  %v3576_v56 = vld [vmem:[%s7283_s5 + $0x1b8] sm:$0xff] (%p2092_p2) }
 0xbeb   : >> { %5082 = vmatprep.subr.bf16.mxu0 %v5836_v43  ;;  %v3577_v57 = vld [vmem:[%s7283_s5 + $0x1c0] sm:$0xff] (%p2092_p2)  ;;  %v3578_v6 = vld [vmem:[%s7283_s5 + $0x1c8] sm:$0xff] (%p2092_p2)  ;;  %v3579_v7 = vld [vmem:[%s7283_s5 + $0x1d0] sm:$0xff] (%p2092_p2) }
 0xbec   : > { %v3580_v8 = vld [vmem:[%s7283_s5 + $0x1d8] sm:$0xff] (%p2092_p2)  ;;  %v3581_v4 = vld [vmem:[%s7283_s5 + $0x1e0] sm:$0xff] (%p2092_p2)  ;;  %v3582_v5 = vld [vmem:[%s7283_s5 + $0x1e8] sm:$0xff] (%p2092_p2) }
 0xbed   : > { %v3583_v9 = vld [vmem:[%s7283_s5 + $0x1f0] sm:$0xff] (%p2092_p2)  ;;  %v3584_v10 = vld [vmem:[%s7283_s5 + $0x1f8] sm:$0xff] (%p2092_p2) }
 0xbee   : >> { %5084 = vmatpush3.bf16.msra.mxu0 %v5083_v0 }
 0xbef   : >> { %5085 = vmatprep.subr.bf16.mxu0 %v5836_v43 }
 0xbf2   : >> { %5087 = vmatpush3.bf16.msra.mxu0 %v5086_v46 }
 0xbf3   : >> { %5088 = vmatprep.subr.bf16.mxu0 %v5836_v43 }
 0xbf6   : >> { %5090 = vmatpush3.bf16.msra.mxu0 %v5089_v47 }
 0xbf7   : >> { %5091 = vmatprep.subr.bf16.mxu0 %v5836_v43 }
 0xbfa   : >> { %5093 = vmatpush3.bf16.msra.mxu0 %v5092_v48 }
 0xbfb   : >> { %5094 = vmatprep.subr.bf16.mxu0 %v5836_v43 }
 0xbfe   : >> { %5096 = vmatpush3.bf16.msra.mxu0 %v5095_v49 }
 0xbff   : >> { %5097 = vmatprep.subr.bf16.mxu0 %v5836_v43 }
 0xc02   : >> { %5099 = vmatpush3.bf16.msra.mxu0 %v5098_v50 }
 0xc05   : >> { %4458 = vmatmul.mubr.f32.vlgmr.msra.gmra.mrb[0].mxu0 %v2101_v51 }
 0xcd5   : > { %2094 = sbr.rel (!%p2092_p2) target bundleno = 3044 (0xbe4), region = 546 }
 0xcd8   : >> { %v2168_v53 = vpop.f32.mrb[0].mxu0 }
 0xcd9   : >> { %v2172_v54 = vadd.f32 %v2168_v53, %v2098_v52  ;;  %v4459_v55 = vpop.f32.mrb[1].mxu0 }
 0xcdb   : >> { %2173 = vst [vmem:[%s2097_s22] sm:$0x7] %v2172_v54 }
 0xcdc LB: >> { %v5101_v61 = vpack.c.bf16 %v3570_v63, %v3569_v60  ;;  %v5839_v62 = vmov 0.0|0.0   ;;  %v5104_v11 = vpack.c.bf16 %v3572_v58, %v3571_v1  ;;  %vm5840_vm3 = vmmov 0   ;;  %s3586_s14 = sshll.u32 %s5803_s29, 3  ;;  %s3585_s22 = sshll.u32 %s5803_s29, 2  ;;  %s5803_s29 = sphi %s6810_s29, %s2196_s29  }
 0xcdd   : >> { %5100 = vmatprep.subr.bf16.mxu0 %v5839_v62  ;;  %v5841_v12 = vmov 0.0   ;;  %v5107_v13 = vpack.c.bf16 %v3574_v2, %v3573_v59  ;;  %v5110_v14 = vpack.c.bf16 %v3576_v56, %v3575_v3  ;;  %v5113_v15 = vpack.c.bf16 %v3578_v6, %v3577_v57  ;;  %s3119_s1 = scalar_lea.vmem [#allocation5], %s3586_s14  ;;  %s2198_s25 = scalar_lea.vmem [#allocation6], %s3585_s22 }
 0xcde   : >> { %5102 = vmatpush3.bf16.msra.mxu0 %v5101_v61  ;;  %4492 = vmatprep.mubr.msk.f32.mxu0 %vm5840_vm3, %v5841_v12  ;;  %v5116_v16 = vpack.c.bf16 %v3580_v8, %v3579_v7  ;;  %v5119_v17 = vpack.c.bf16 %v3582_v5, %v3581_v4  ;;  %v5122_v18 = vpack.c.bf16 %v3584_v10, %v3583_v9  ;;  %v3587_v19 = vld [vmem:[%s3119_s1 + $0x8] sm:$0x7]  ;;  %s2196_s29 = sadd.s32 1, %s5803_s29  }
 0xcdf   : >> { %5103 = vmatprep.subr.bf16.mxu0 %v5839_v62  ;;  %p2193_p3 = scmp.ge.s32.totalorder %s2196_s29, 3  }
 0xce0   : > { %v3588_v24 = vld [vmem:[%s7283_s5 + $0x200] sm:$0xff] (%p2193_p3)  ;;  %v3589_v25 = vld [vmem:[%s7283_s5 + $0x208] sm:$0xff] (%p2193_p3)  ;;  %v3590_v26 = vld [vmem:[%s7283_s5 + $0x210] sm:$0xff] (%p2193_p3)  ;;  %s6868_s1 = smov (%p2193_p3), 0  }
 0xce1   : > { %v3591_v27 = vld [vmem:[%s7283_s5 + $0x218] sm:$0xff] (%p2193_p3)  ;;  %v3592_v28 = vld [vmem:[%s7283_s5 + $0x220] sm:$0xff] (%p2193_p3)  ;;  %v3593_v29 = vld [vmem:[%s7283_s5 + $0x228] sm:$0xff] (%p2193_p3) }
 0xce2   : >> { %5105 = vmatpush3.bf16.msra.mxu0 %v5104_v11  ;;  %v2199_v20 = vld [vmem:[%s2198_s25] sm:$0x7]  ;;  %v3594_v30 = vld [vmem:[%s7283_s5 + $0x230] sm:$0xff] (%p2193_p3)  ;;  %v3595_v31 = vld [vmem:[%s7283_s5 + $0x238] sm:$0xff] (%p2193_p3) }
 0xce3   : >> { %5106 = vmatprep.subr.bf16.mxu0 %v5839_v62  ;;  %v3596_v32 = vld [vmem:[%s7283_s5 + $0x240] sm:$0xff] (%p2193_p3)  ;;  %v3597_v33 = vld [vmem:[%s7283_s5 + $0x248] sm:$0xff] (%p2193_p3)  ;;  %v3598_v34 = vld [vmem:[%s7283_s5 + $0x250] sm:$0xff] (%p2193_p3) }
 0xce4   : > { %v3599_v35 = vld [vmem:[%s7283_s5 + $0x258] sm:$0xff] (%p2193_p3)  ;;  %v3600_v36 = vld [vmem:[%s7283_s5 + $0x260] sm:$0xff] (%p2193_p3)  ;;  %v3601_v37 = vld [vmem:[%s7283_s5 + $0x268] sm:$0xff] (%p2193_p3) }
 0xce5   : > { %v3602_v38 = vld [vmem:[%s7283_s5 + $0x270] sm:$0xff] (%p2193_p3)  ;;  %v3603_v39 = vld [vmem:[%s7283_s5 + $0x278] sm:$0xff] (%p2193_p3) }
 0xce6   : >> { %5108 = vmatpush3.bf16.msra.mxu0 %v5107_v13 }
 0xce7   : >> { %5109 = vmatprep.subr.bf16.mxu0 %v5839_v62 }
 0xcea   : >> { %5111 = vmatpush3.bf16.msra.mxu0 %v5110_v14 }
 0xceb   : >> { %5112 = vmatprep.subr.bf16.mxu0 %v5839_v62 }
 0xcee   : >> { %5114 = vmatpush3.bf16.msra.mxu0 %v5113_v15 }
 0xcef   : >> { %5115 = vmatprep.subr.bf16.mxu0 %v5839_v62 }
 0xcf2   : >> { %5117 = vmatpush3.bf16.msra.mxu0 %v5116_v16 }
 0xcf3   : >> { %5118 = vmatprep.subr.bf16.mxu0 %v5839_v62 }
 0xcf6   : >> { %5120 = vmatpush3.bf16.msra.mxu0 %v5119_v17 }
 0xcf7   : >> { %5121 = vmatprep.subr.bf16.mxu0 %v5839_v62 }
 0xcfa   : >> { %5123 = vmatpush3.bf16.msra.mxu0 %v5122_v18 }
 0xcfd   : >> { %4493 = vmatmul.mubr.f32.vlgmr.msra.gmra.mrb[0].mxu0 %v3587_v19 }
 0xdcd   : > { %2195 = sbr.rel (!%p2193_p3) target bundleno = 3292 (0xcdc), region = 557 }
 0xdd0   : >> { %v2270_v21 = vpop.f32.mrb[0].mxu0 }
 0xdd1   : >> { %v2274_v22 = vadd.f32 %v2270_v21, %v2199_v20  ;;  %v4494_v23 = vpop.f32.mrb[1].mxu0 }
 0xdd3   : >> { %2275 = vst [vmem:[%s2198_s25] sm:$0x7] %v2274_v22 }
 0xdd4 LB: >> { %v5125_v40 = vpack.c.bf16 %v3589_v25, %v3588_v24  ;;  %v5842_v41 = vmov 0.0|0.0   ;;  %v5128_v42 = vpack.c.bf16 %v3591_v27, %v3590_v26  ;;  %vm5843_vm4 = vmmov 0   ;;  %s3605_s22 = sshll.u32 %s5807_s1, 3  ;;  %s3604_s25 = sshll.u32 %s5807_s1, 2  ;;  %s5807_s1 = sphi %s6868_s1, %s2298_s1  }
 0xdd5   : >> { %5124 = vmatprep.subr.bf16.mxu0 %v5842_v41  ;;  %v5844_v43 = vmov 0.0   ;;  %v5131_v44 = vpack.c.bf16 %v3593_v29, %v3592_v28  ;;  %v5134_v45 = vpack.c.bf16 %v3595_v31, %v3594_v30  ;;  %v5137_v0 = vpack.c.bf16 %v3597_v33, %v3596_v32  ;;  %s3124_s29 = scalar_lea.vmem [#allocation5], %s3605_s22  ;;  %s2300_s16 = scalar_lea.vmem [#allocation6], %s3604_s25 }
 0xdd6   : >> { %5126 = vmatpush3.bf16.msra.mxu0 %v5125_v40  ;;  %4527 = vmatprep.mubr.msk.f32.mxu0 %vm5843_vm4, %v5844_v43  ;;  %v5140_v46 = vpack.c.bf16 %v3599_v35, %v3598_v34  ;;  %v5143_v47 = vpack.c.bf16 %v3601_v37, %v3600_v36  ;;  %v5146_v48 = vpack.c.bf16 %v3603_v39, %v3602_v38  ;;  %v3606_v49 = vld [vmem:[%s3124_s29 + $0x9] sm:$0x7]  ;;  %s2298_s1 = sadd.s32 1, %s5807_s1  }
 0xdd7   : >> { %5127 = vmatprep.subr.bf16.mxu0 %v5842_v41  ;;  %p2295_p4 = scmp.ge.s32.totalorder %s2298_s1, 3  }
 0xdd8   : > { %v3607_v54 = vld [vmem:[%s7283_s5 + $0x280] sm:$0xff] (%p2295_p4)  ;;  %v3608_v55 = vld [vmem:[%s7283_s5 + $0x288] sm:$0xff] (%p2295_p4)  ;;  %v3609_v60 = vld [vmem:[%s7283_s5 + $0x290] sm:$0xff] (%p2295_p4)  ;;  %s6926_s29 = smov (%p2295_p4), 0  }
 0xdd9   : > { %v3610_v63 = vld [vmem:[%s7283_s5 + $0x298] sm:$0xff] (%p2295_p4)  ;;  %v3611_v1 = vld [vmem:[%s7283_s5 + $0x2a0] sm:$0xff] (%p2295_p4)  ;;  %v3612_v58 = vld [vmem:[%s7283_s5 + $0x2a8] sm:$0xff] (%p2295_p4) }
 0xdda   : >> { %5129 = vmatpush3.bf16.msra.mxu0 %v5128_v42  ;;  %v2301_v50 = vld [vmem:[%s2300_s16] sm:$0x7]  ;;  %v3613_v59 = vld [vmem:[%s7283_s5 + $0x2b0] sm:$0xff] (%p2295_p4)  ;;  %v3614_v2 = vld [vmem:[%s7283_s5 + $0x2b8] sm:$0xff] (%p2295_p4) }
 0xddb   : >> { %5130 = vmatprep.subr.bf16.mxu0 %v5842_v41  ;;  %v3615_v3 = vld [vmem:[%s7283_s5 + $0x2c0] sm:$0xff] (%p2295_p4)  ;;  %v3616_v56 = vld [vmem:[%s7283_s5 + $0x2c8] sm:$0xff] (%p2295_p4)  ;;  %v3617_v57 = vld [vmem:[%s7283_s5 + $0x2d0] sm:$0xff] (%p2295_p4) }
 0xddc   : > { %v3618_v6 = vld [vmem:[%s7283_s5 + $0x2d8] sm:$0xff] (%p2295_p4)  ;;  %v3619_v7 = vld [vmem:[%s7283_s5 + $0x2e0] sm:$0xff] (%p2295_p4)  ;;  %v3620_v8 = vld [vmem:[%s7283_s5 + $0x2e8] sm:$0xff] (%p2295_p4) }
 0xddd   : > { %v3621_v4 = vld [vmem:[%s7283_s5 + $0x2f0] sm:$0xff] (%p2295_p4)  ;;  %v3622_v5 = vld [vmem:[%s7283_s5 + $0x2f8] sm:$0xff] (%p2295_p4) }
 0xdde   : >> { %5132 = vmatpush3.bf16.msra.mxu0 %v5131_v44 }
 0xddf   : >> { %5133 = vmatprep.subr.bf16.mxu0 %v5842_v41 }
 0xde2   : >> { %5135 = vmatpush3.bf16.msra.mxu0 %v5134_v45 }
 0xde3   : >> { %5136 = vmatprep.subr.bf16.mxu0 %v5842_v41 }
 0xde6   : >> { %5138 = vmatpush3.bf16.msra.mxu0 %v5137_v0 }
 0xde7   : >> { %5139 = vmatprep.subr.bf16.mxu0 %v5842_v41 }
 0xdea   : >> { %5141 = vmatpush3.bf16.msra.mxu0 %v5140_v46 }
 0xdeb   : >> { %5142 = vmatprep.subr.bf16.mxu0 %v5842_v41 }
 0xdee   : >> { %5144 = vmatpush3.bf16.msra.mxu0 %v5143_v47 }
 0xdef   : >> { %5145 = vmatprep.subr.bf16.mxu0 %v5842_v41 }
 0xdf2   : >> { %5147 = vmatpush3.bf16.msra.mxu0 %v5146_v48 }
 0xdf5   : >> { %4528 = vmatmul.mubr.f32.vlgmr.msra.gmra.mrb[0].mxu0 %v3606_v49 }
 0xec5   : > { %2297 = sbr.rel (!%p2295_p4) target bundleno = 3540 (0xdd4), region = 568 }
 0xec8   : >> { %v2372_v51 = vpop.f32.mrb[0].mxu0 }
 0xec9   : >> { %v2376_v52 = vadd.f32 %v2372_v51, %v2301_v50  ;;  %v4529_v53 = vpop.f32.mrb[1].mxu0 }
 0xecb   : >> { %2377 = vst [vmem:[%s2300_s16] sm:$0x7] %v2376_v52 }
 0xecc LB: >> { %v5149_v9 = vpack.c.bf16 %v3608_v55, %v3607_v54  ;;  %v5845_v10 = vmov 0.0|0.0   ;;  %v5152_v61 = vpack.c.bf16 %v3610_v63, %v3609_v60  ;;  %vm5846_vm5 = vmmov 0   ;;  %s3624_s25 = sshll.u32 %s5811_s29, 3  ;;  %s3623_s16 = sshll.u32 %s5811_s29, 2  ;;  %s5811_s29 = sphi %s6926_s29, %s2400_s29  }
 0xecd   : >> { %5148 = vmatprep.subr.bf16.mxu0 %v5845_v10  ;;  %v5847_v62 = vmov 0.0   ;;  %v5155_v11 = vpack.c.bf16 %v3612_v58, %v3611_v1  ;;  %v5158_v12 = vpack.c.bf16 %v3614_v2, %v3613_v59  ;;  %v5161_v13 = vpack.c.bf16 %v3616_v56, %v3615_v3  ;;  %s3129_s1 = scalar_lea.vmem [#allocation5], %s3624_s25  ;;  %s2402_s0 = scalar_lea.vmem [#allocation6], %s3623_s16 }
 0xece   : >> { %5150 = vmatpush3.bf16.msra.mxu0 %v5149_v9  ;;  %4562 = vmatprep.mubr.msk.f32.mxu0 %vm5846_vm5, %v5847_v62  ;;  %v5164_v14 = vpack.c.bf16 %v3618_v6, %v3617_v57  ;;  %v5167_v15 = vpack.c.bf16 %v3620_v8, %v3619_v7  ;;  %v5170_v16 = vpack.c.bf16 %v3622_v5, %v3621_v4  ;;  %v3625_v17 = vld [vmem:[%s3129_s1 + $0xa] sm:$0x7]  ;;  %s2400_s29 = sadd.s32 1, %s5811_s29  }
 0xecf   : >> { %5151 = vmatprep.subr.bf16.mxu0 %v5845_v10  ;;  %p2397_p7 = scmp.ge.s32.totalorder %s2400_s29, 3  }
 0xed0   : > { %v3626_v22 = vld [vmem:[%s7283_s5 + $0x300] sm:$0xff] (%p2397_p7)  ;;  %v3627_v23 = vld [vmem:[%s7283_s5 + $0x308] sm:$0xff] (%p2397_p7)  ;;  %v3628_v24 = vld [vmem:[%s7283_s5 + $0x310] sm:$0xff] (%p2397_p7)  ;;  %s6984_s1 = smov (%p2397_p7), 0  }
 0xed1   : > { %v3629_v25 = vld [vmem:[%s7283_s5 + $0x318] sm:$0xff] (%p2397_p7)  ;;  %v3630_v26 = vld [vmem:[%s7283_s5 + $0x320] sm:$0xff] (%p2397_p7)  ;;  %v3631_v27 = vld [vmem:[%s7283_s5 + $0x328] sm:$0xff] (%p2397_p7) }
 0xed2   : >> { %5153 = vmatpush3.bf16.msra.mxu0 %v5152_v61  ;;  %v2403_v18 = vld [vmem:[%s2402_s0] sm:$0x7]  ;;  %v3632_v28 = vld [vmem:[%s7283_s5 + $0x330] sm:$0xff] (%p2397_p7)  ;;  %v3633_v29 = vld [vmem:[%s7283_s5 + $0x338] sm:$0xff] (%p2397_p7) }
 0xed3   : >> { %5154 = vmatprep.subr.bf16.mxu0 %v5845_v10  ;;  %v3634_v30 = vld [vmem:[%s7283_s5 + $0x340] sm:$0xff] (%p2397_p7)  ;;  %v3635_v31 = vld [vmem:[%s7283_s5 + $0x348] sm:$0xff] (%p2397_p7)  ;;  %v3636_v32 = vld [vmem:[%s7283_s5 + $0x350] sm:$0xff] (%p2397_p7) }
 0xed4   : > { %v3637_v33 = vld [vmem:[%s7283_s5 + $0x358] sm:$0xff] (%p2397_p7)  ;;  %v3638_v34 = vld [vmem:[%s7283_s5 + $0x360] sm:$0xff] (%p2397_p7)  ;;  %v3639_v35 = vld [vmem:[%s7283_s5 + $0x368] sm:$0xff] (%p2397_p7) }
 0xed5   : > { %v3640_v36 = vld [vmem:[%s7283_s5 + $0x370] sm:$0xff] (%p2397_p7)  ;;  %v3641_v37 = vld [vmem:[%s7283_s5 + $0x378] sm:$0xff] (%p2397_p7) }
 0xed6   : >> { %5156 = vmatpush3.bf16.msra.mxu0 %v5155_v11 }
 0xed7   : >> { %5157 = vmatprep.subr.bf16.mxu0 %v5845_v10 }
 0xeda   : >> { %5159 = vmatpush3.bf16.msra.mxu0 %v5158_v12 }
 0xedb   : >> { %5160 = vmatprep.subr.bf16.mxu0 %v5845_v10 }
 0xede   : >> { %5162 = vmatpush3.bf16.msra.mxu0 %v5161_v13 }
 0xedf   : >> { %5163 = vmatprep.subr.bf16.mxu0 %v5845_v10 }
 0xee2   : >> { %5165 = vmatpush3.bf16.msra.mxu0 %v5164_v14 }
 0xee3   : >> { %5166 = vmatprep.subr.bf16.mxu0 %v5845_v10 }
 0xee6   : >> { %5168 = vmatpush3.bf16.msra.mxu0 %v5167_v15 }
 0xee7   : >> { %5169 = vmatprep.subr.bf16.mxu0 %v5845_v10 }
 0xeea   : >> { %5171 = vmatpush3.bf16.msra.mxu0 %v5170_v16 }
 0xeed   : >> { %4563 = vmatmul.mubr.f32.vlgmr.msra.gmra.mrb[0].mxu0 %v3625_v17 }
 0xfbd   : > { %2399 = sbr.rel (!%p2397_p7) target bundleno = 3788 (0xecc), region = 579 }
 0xfc0   : >> { %v2474_v19 = vpop.f32.mrb[0].mxu0 }
 0xfc1   : >> { %v2478_v20 = vadd.f32 %v2474_v19, %v2403_v18  ;;  %v4564_v21 = vpop.f32.mrb[1].mxu0 }
 0xfc3   : >> { %2479 = vst [vmem:[%s2402_s0] sm:$0x7] %v2478_v20 }
 0xfc4 LB: >> { %v5173_v38 = vpack.c.bf16 %v3627_v23, %v3626_v22  ;;  %v5848_v39 = vmov 0.0|0.0   ;;  %v5176_v40 = vpack.c.bf16 %v3629_v25, %v3628_v24  ;;  %vm5849_vm6 = vmmov 0   ;;  %s3643_s16 = sshll.u32 %s5815_s1, 3  ;;  %s3642_s0 = sshll.u32 %s5815_s1, 2  ;;  %s5815_s1 = sphi %s6984_s1, %s2502_s1  }
 0xfc5   : >> { %5172 = vmatprep.subr.bf16.mxu0 %v5848_v39  ;;  %v5850_v41 = vmov 0.0   ;;  %v5179_v42 = vpack.c.bf16 %v3631_v27, %v3630_v26  ;;  %v5182_v43 = vpack.c.bf16 %v3633_v29, %v3632_v28  ;;  %v5185_v44 = vpack.c.bf16 %v3635_v31, %v3634_v30  ;;  %s3134_s29 = scalar_lea.vmem [#allocation5], %s3643_s16  ;;  %s2504_s13 = scalar_lea.vmem [#allocation6], %s3642_s0 }
 0xfc6   : >> { %5174 = vmatpush3.bf16.msra.mxu0 %v5173_v38  ;;  %4597 = vmatprep.mubr.msk.f32.mxu0 %vm5849_vm6, %v5850_v41  ;;  %v5188_v45 = vpack.c.bf16 %v3637_v33, %v3636_v32  ;;  %v5191_v0 = vpack.c.bf16 %v3639_v35, %v3638_v34  ;;  %v5194_v46 = vpack.c.bf16 %v3641_v37, %v3640_v36  ;;  %v3644_v47 = vld [vmem:[%s3134_s29 + $0x10] sm:$0x7]  ;;  %s2502_s1 = sadd.s32 1, %s5815_s1  }
 0xfc7   : >> { %5175 = vmatprep.subr.bf16.mxu0 %v5848_v39  ;;  %p2499_p8 = scmp.ge.s32.totalorder %s2502_s1, 3  }
 0xfc8   : > { %v3645_v52 = vld [vmem:[%s7283_s5 + $0x380] sm:$0xff] (%p2499_p8)  ;;  %v3646_v53 = vld [vmem:[%s7283_s5 + $0x388] sm:$0xff] (%p2499_p8)  ;;  %v3647_v54 = vld [vmem:[%s7283_s5 + $0x390] sm:$0xff] (%p2499_p8)  ;;  %s7042_s29 = smov (%p2499_p8), 0  }
 0xfc9   : > { %v3648_v55 = vld [vmem:[%s7283_s5 + $0x398] sm:$0xff] (%p2499_p8)  ;;  %v3649_v60 = vld [vmem:[%s7283_s5 + $0x3a0] sm:$0xff] (%p2499_p8)  ;;  %v3650_v63 = vld [vmem:[%s7283_s5 + $0x3a8] sm:$0xff] (%p2499_p8) }
 0xfca   : >> { %5177 = vmatpush3.bf16.msra.mxu0 %v5176_v40  ;;  %v2505_v48 = vld [vmem:[%s2504_s13] sm:$0x7]  ;;  %v3651_v1 = vld [vmem:[%s7283_s5 + $0x3b0] sm:$0xff] (%p2499_p8)  ;;  %v3652_v58 = vld [vmem:[%s7283_s5 + $0x3b8] sm:$0xff] (%p2499_p8) }
 0xfcb   : >> { %5178 = vmatprep.subr.bf16.mxu0 %v5848_v39  ;;  %v3653_v59 = vld [vmem:[%s7283_s5 + $0x3c0] sm:$0xff] (%p2499_p8)  ;;  %v3654_v2 = vld [vmem:[%s7283_s5 + $0x3c8] sm:$0xff] (%p2499_p8)  ;;  %v3655_v3 = vld [vmem:[%s7283_s5 + $0x3d0] sm:$0xff] (%p2499_p8) }
 0xfcc   : > { %v3656_v56 = vld [vmem:[%s7283_s5 + $0x3d8] sm:$0xff] (%p2499_p8)  ;;  %v3657_v57 = vld [vmem:[%s7283_s5 + $0x3e0] sm:$0xff] (%p2499_p8)  ;;  %v3658_v6 = vld [vmem:[%s7283_s5 + $0x3e8] sm:$0xff] (%p2499_p8) }
 0xfcd   : > { %v3659_v7 = vld [vmem:[%s7283_s5 + $0x3f0] sm:$0xff] (%p2499_p8)  ;;  %v3660_v8 = vld [vmem:[%s7283_s5 + $0x3f8] sm:$0xff] (%p2499_p8) }
 0xfce   : >> { %5180 = vmatpush3.bf16.msra.mxu0 %v5179_v42 }
 0xfcf   : >> { %5181 = vmatprep.subr.bf16.mxu0 %v5848_v39 }
 0xfd2   : >> { %5183 = vmatpush3.bf16.msra.mxu0 %v5182_v43 }
 0xfd3   : >> { %5184 = vmatprep.subr.bf16.mxu0 %v5848_v39 }
 0xfd6   : >> { %5186 = vmatpush3.bf16.msra.mxu0 %v5185_v44 }
 0xfd7   : >> { %5187 = vmatprep.subr.bf16.mxu0 %v5848_v39 }
 0xfda   : >> { %5189 = vmatpush3.bf16.msra.mxu0 %v5188_v45 }
 0xfdb   : >> { %5190 = vmatprep.subr.bf16.mxu0 %v5848_v39 }
 0xfde   : >> { %5192 = vmatpush3.bf16.msra.mxu0 %v5191_v0 }
 0xfdf   : >> { %5193 = vmatprep.subr.bf16.mxu0 %v5848_v39 }
 0xfe2   : >> { %5195 = vmatpush3.bf16.msra.mxu0 %v5194_v46 }
 0xfe5   : >> { %4598 = vmatmul.mubr.f32.vlgmr.msra.gmra.mrb[0].mxu0 %v3644_v47 }
0x10b5   : > { %2501 = sbr.rel (!%p2499_p8) target bundleno = 4036 (0xfc4), region = 590 }
0x10b8   : >> { %v2576_v49 = vpop.f32.mrb[0].mxu0 }
0x10b9   : >> { %v2580_v50 = vadd.f32 %v2576_v49, %v2505_v48  ;;  %v4599_v51 = vpop.f32.mrb[1].mxu0 }
0x10bb   : >> { %2581 = vst [vmem:[%s2504_s13] sm:$0x7] %v2580_v50 }
0x10bc LB: >> { %v5197_v4 = vpack.c.bf16 %v3646_v53, %v3645_v52  ;;  %v5851_v5 = vmov 0.0|0.0   ;;  %v5200_v9 = vpack.c.bf16 %v3648_v55, %v3647_v54  ;;  %vm5852_vm7 = vmmov 0   ;;  %s3662_s0 = sshll.u32 %s5819_s29, 3  ;;  %s3661_s13 = sshll.u32 %s5819_s29, 2  ;;  %s5819_s29 = sphi %s7042_s29, %s2604_s29  }
0x10bd   : >> { %5196 = vmatprep.subr.bf16.mxu0 %v5851_v5  ;;  %v5853_v10 = vmov 0.0   ;;  %v5203_v61 = vpack.c.bf16 %v3650_v63, %v3649_v60  ;;  %v5206_v62 = vpack.c.bf16 %v3652_v58, %v3651_v1  ;;  %v5209_v11 = vpack.c.bf16 %v3654_v2, %v3653_v59  ;;  %s3139_s1 = scalar_lea.vmem [#allocation5], %s3662_s0  ;;  %s2606_s2 = scalar_lea.vmem [#allocation6], %s3661_s13 }
0x10be   : >> { %5198 = vmatpush3.bf16.msra.mxu0 %v5197_v4  ;;  %4632 = vmatprep.mubr.msk.f32.mxu0 %vm5852_vm7, %v5853_v10  ;;  %v5212_v12 = vpack.c.bf16 %v3656_v56, %v3655_v3  ;;  %v5215_v13 = vpack.c.bf16 %v3658_v6, %v3657_v57  ;;  %v5218_v14 = vpack.c.bf16 %v3660_v8, %v3659_v7  ;;  %v3663_v15 = vld [vmem:[%s3139_s1 + $0x11] sm:$0x7]  ;;  %s2604_s29 = sadd.s32 1, %s5819_s29  }
0x10bf   : >> { %5199 = vmatprep.subr.bf16.mxu0 %v5851_v5  ;;  %p2601_p9 = scmp.ge.s32.totalorder %s2604_s29, 3  }
0x10c0   : > { %v3664_v20 = vld [vmem:[%s7283_s5 + $0x400] sm:$0xff] (%p2601_p9)  ;;  %v3665_v21 = vld [vmem:[%s7283_s5 + $0x408] sm:$0xff] (%p2601_p9)  ;;  %v3666_v22 = vld [vmem:[%s7283_s5 + $0x410] sm:$0xff] (%p2601_p9)  ;;  %s7100_s1 = smov (%p2601_p9), 0  }
0x10c1   : > { %v3667_v23 = vld [vmem:[%s7283_s5 + $0x418] sm:$0xff] (%p2601_p9)  ;;  %v3668_v24 = vld [vmem:[%s7283_s5 + $0x420] sm:$0xff] (%p2601_p9)  ;;  %v3669_v25 = vld [vmem:[%s7283_s5 + $0x428] sm:$0xff] (%p2601_p9) }
0x10c2   : >> { %5201 = vmatpush3.bf16.msra.mxu0 %v5200_v9  ;;  %v2607_v16 = vld [vmem:[%s2606_s2] sm:$0x7]  ;;  %v3670_v26 = vld [vmem:[%s7283_s5 + $0x430] sm:$0xff] (%p2601_p9)  ;;  %v3671_v27 = vld [vmem:[%s7283_s5 + $0x438] sm:$0xff] (%p2601_p9) }
0x10c3   : >> { %5202 = vmatprep.subr.bf16.mxu0 %v5851_v5  ;;  %v3672_v28 = vld [vmem:[%s7283_s5 + $0x440] sm:$0xff] (%p2601_p9)  ;;  %v3673_v29 = vld [vmem:[%s7283_s5 + $0x448] sm:$0xff] (%p2601_p9)  ;;  %v3674_v30 = vld [vmem:[%s7283_s5 + $0x450] sm:$0xff] (%p2601_p9) }
0x10c4   : > { %v3675_v31 = vld [vmem:[%s7283_s5 + $0x458] sm:$0xff] (%p2601_p9)  ;;  %v3676_v32 = vld [vmem:[%s7283_s5 + $0x460] sm:$0xff] (%p2601_p9)  ;;  %v3677_v33 = vld [vmem:[%s7283_s5 + $0x468] sm:$0xff] (%p2601_p9) }
0x10c5   : > { %v3678_v34 = vld [vmem:[%s7283_s5 + $0x470] sm:$0xff] (%p2601_p9)  ;;  %v3679_v35 = vld [vmem:[%s7283_s5 + $0x478] sm:$0xff] (%p2601_p9) }
0x10c6   : >> { %5204 = vmatpush3.bf16.msra.mxu0 %v5203_v61 }
0x10c7   : >> { %5205 = vmatprep.subr.bf16.mxu0 %v5851_v5 }
0x10ca   : >> { %5207 = vmatpush3.bf16.msra.mxu0 %v5206_v62 }
0x10cb   : >> { %5208 = vmatprep.subr.bf16.mxu0 %v5851_v5 }
0x10ce   : >> { %5210 = vmatpush3.bf16.msra.mxu0 %v5209_v11 }
0x10cf   : >> { %5211 = vmatprep.subr.bf16.mxu0 %v5851_v5 }
0x10d2   : >> { %5213 = vmatpush3.bf16.msra.mxu0 %v5212_v12 }
0x10d3   : >> { %5214 = vmatprep.subr.bf16.mxu0 %v5851_v5 }
0x10d6   : >> { %5216 = vmatpush3.bf16.msra.mxu0 %v5215_v13 }
0x10d7   : >> { %5217 = vmatprep.subr.bf16.mxu0 %v5851_v5 }
0x10da   : >> { %5219 = vmatpush3.bf16.msra.mxu0 %v5218_v14 }
0x10dd   : >> { %4633 = vmatmul.mubr.f32.vlgmr.msra.gmra.mrb[0].mxu0 %v3663_v15 }
0x11ad   : > { %2603 = sbr.rel (!%p2601_p9) target bundleno = 4284 (0x10bc), region = 601 }
0x11b0   : >> { %v2678_v17 = vpop.f32.mrb[0].mxu0 }
0x11b1   : >> { %v2682_v18 = vadd.f32 %v2678_v17, %v2607_v16  ;;  %v4634_v19 = vpop.f32.mrb[1].mxu0 }
0x11b3   : >> { %2683 = vst [vmem:[%s2606_s2] sm:$0x7] %v2682_v18 }
0x11b4 LB: >> { %v5221_v36 = vpack.c.bf16 %v3665_v21, %v3664_v20  ;;  %v5854_v37 = vmov 0.0|0.0   ;;  %v5224_v38 = vpack.c.bf16 %v3667_v23, %v3666_v22  ;;  %vm5855_vm8 = vmmov 0   ;;  %s3681_s13 = sshll.u32 %s5823_s1, 3  ;;  %s3680_s2 = sshll.u32 %s5823_s1, 2  ;;  %s5823_s1 = sphi %s7100_s1, %s2706_s1  }
0x11b5   : >> { %5220 = vmatprep.subr.bf16.mxu0 %v5854_v37  ;;  %v5856_v39 = vmov 0.0   ;;  %v5227_v40 = vpack.c.bf16 %v3669_v25, %v3668_v24  ;;  %v5230_v41 = vpack.c.bf16 %v3671_v27, %v3670_v26  ;;  %v5233_v42 = vpack.c.bf16 %v3673_v29, %v3672_v28  ;;  %s3144_s29 = scalar_lea.vmem [#allocation5], %s3681_s13  ;;  %s2708_s12 = scalar_lea.vmem [#allocation6], %s3680_s2 }
0x11b6   : >> { %5222 = vmatpush3.bf16.msra.mxu0 %v5221_v36  ;;  %4667 = vmatprep.mubr.msk.f32.mxu0 %vm5855_vm8, %v5856_v39  ;;  %v5236_v43 = vpack.c.bf16 %v3675_v31, %v3674_v30  ;;  %v5239_v44 = vpack.c.bf16 %v3677_v33, %v3676_v32  ;;  %v5242_v45 = vpack.c.bf16 %v3679_v35, %v3678_v34  ;;  %v3682_v0 = vld [vmem:[%s3144_s29 + $0x12] sm:$0x7]  ;;  %s2706_s1 = sadd.s32 1, %s5823_s1  }
0x11b7   : >> { %5223 = vmatprep.subr.bf16.mxu0 %v5854_v37  ;;  %p2703_p10 = scmp.ge.s32.totalorder %s2706_s1, 3  }
0x11b8   : > { %s5825_s30 = smov (%p2703_p10), 0  }
0x11ba   : >> { %5225 = vmatpush3.bf16.msra.mxu0 %v5224_v38  ;;  %v2709_v46 = vld [vmem:[%s2708_s12] sm:$0x7] }
0x11bb   : >> { %5226 = vmatprep.subr.bf16.mxu0 %v5854_v37 }
0x11be   : >> { %5228 = vmatpush3.bf16.msra.mxu0 %v5227_v40 }
0x11bf   : >> { %5229 = vmatprep.subr.bf16.mxu0 %v5854_v37 }
0x11c2   : >> { %5231 = vmatpush3.bf16.msra.mxu0 %v5230_v41 }
0x11c3   : >> { %5232 = vmatprep.subr.bf16.mxu0 %v5854_v37 }
0x11c6   : >> { %5234 = vmatpush3.bf16.msra.mxu0 %v5233_v42 }
0x11c7   : >> { %5235 = vmatprep.subr.bf16.mxu0 %v5854_v37 }
0x11ca   : >> { %5237 = vmatpush3.bf16.msra.mxu0 %v5236_v43 }
0x11cb   : >> { %5238 = vmatprep.subr.bf16.mxu0 %v5854_v37 }
0x11ce   : >> { %5240 = vmatpush3.bf16.msra.mxu0 %v5239_v44 }
0x11cf   : >> { %5241 = vmatprep.subr.bf16.mxu0 %v5854_v37 }
0x11d2   : >> { %5243 = vmatpush3.bf16.msra.mxu0 %v5242_v45 }
0x11d5   : >> { %4668 = vmatmul.mubr.f32.vlgmr.msra.gmra.mrb[0].mxu0 %v3682_v0 }
0x12a5   : > { %2705 = sbr.rel (!%p2703_p10) target bundleno = 4532 (0x11b4), region = 612 }
0x12a8   : >> { %v2780_v47 = vpop.f32.mrb[0].mxu0 }
0x12a9   : >> { %v2784_v48 = vadd.f32 %v2780_v47, %v2709_v46  ;;  %v4669_v49 = vpop.f32.mrb[1].mxu0 }
0x12ab   : >> { %2785 = vst [vmem:[%s2708_s12] sm:$0x7] %v2784_v48 }
0x12ac LB: >> { %s3683_s15 = sshll.u32 %s5827_s30, 2  ;;  %s2791_s30 = sadd.s32 1, %s5827_s30   ;;  %s5827_s30 = sphi %s5825_s30, %s2791_s30  }
0x12ad   : >> { %s2793_s14 = scalar_lea.vmem [#allocation6], %s3683_s15  ;;  %p2788_p11 = scmp.ge.s32.totalorder %s2791_s30, 3  }
0x12ae   : > { %v2809_v52 = vld [vmem:[%s7285_s7] sm:$0xff] (%p2788_p11)  ;;  %v2810_v53 = vld [vmem:[%s7285_s7 + $0x8] sm:$0xff] (%p2788_p11)  ;;  %v2811_v54 = vld [vmem:[%s7285_s7 + $0x10] sm:$0xff] (%p2788_p11)  ;;  %v5857_v55 = vmov (%p2788_p11), 0.0|0.0   ;;  %vm5858_vm9 = vmmov (%p2788_p11), 0   ;;  %v5859_v1 = vmov (%p2788_p11), 0.0  }
0x12af   : > { %2790 = sbr.rel (!%p2788_p11) target bundleno = 4780 (0x12ac), region = 623  ;;  %5244 = vmatprep.subr.bf16.mxu0 (%p2788_p11), %v5857_v55  ;;  %v5245_v60 = vpack.c.bf16 (%p2788_p11), %v2810_v53, %v2809_v52  ;;  %v2812_v63 = vld [vmem:[%s7285_s7 + $0x18] sm:$0xff] (%p2788_p11)  ;;  %4702 = vmatprep.mubr.msk.f32.mxu0 (%p2788_p11), %vm5858_vm9, %v5859_v1  ;;  %v2813_v59 = vld [vmem:[%s7285_s7 + $0x20] sm:$0xff] (%p2788_p11)  ;;  %v2814_v2 = vld [vmem:[%s7285_s7 + $0x28] sm:$0xff] (%p2788_p11)  ;;  %s3684_s12 = sshll.u32 (%p2788_p11), %s5942_s21, 4 }
0x12b0   : > { %5268 = vmatprep.subr.bf16.mxu1 (%p2788_p11), %v5857_v55  ;;  %4737 = vmatprep.mubr.msk.f32.mxu1 (%p2788_p11), %vm5858_vm9, %v5859_v1  ;;  %v5248_v58 = vpack.c.bf16 (%p2788_p11), %v2812_v63, %v2811_v54  ;;  %v2897_v56 = vld [vmem:[%s7287_s9] sm:$0xff] (%p2788_p11)  ;;  %v5251_v7 = vpack.c.bf16 (%p2788_p11), %v2814_v2, %v2813_v59  ;;  %v2898_v5 = vld [vmem:[%s7287_s9 + $0x8] sm:$0xff] (%p2788_p11)  ;;  %v2899_v9 = vld [vmem:[%s7287_s9 + $0x10] sm:$0xff] (%p2788_p11)  ;;  %s2998_s30 = sshll.u32 (%p2788_p11), %s5984_s24, 4  ;;  %s7233_s22 = scalar_lea.hbm (%p2788_p11), %s7289_s11, %s3684_s12  ;;  %s7235_s30 = int_to_ptr.vmem [resolvable:$true] %s2998_s30 }
0x12b1   : > { %5246 = vmatpush3.bf16.msra.mxu0 (%p2788_p11), %v5245_v60  ;;  %v2815_v10 = vld [vmem:[%s7285_s7 + $0x30] sm:$0xff] (%p2788_p11)  ;;  %v2816_v61 = vld [vmem:[%s7285_s7 + $0x38] sm:$0xff] (%p2788_p11)  ;;  %v5269_v11 = vpack.c.bf16 (%p2788_p11), %v2898_v5, %v2897_v56  ;;  %v2901_v16 = vld [vmem:[%s7287_s9 + $0x20] sm:$0xff] (%p2788_p11)  ;;  %s7299_s25 = sand.u32 (%p2788_p11), 1, %s5719_s18   ;;  %s5565_s0 = scalar_lea.vmem (%p2788_p11), %s7235_s30, 16 }
0x12b2   : >> { %v2794_v50 = vld [vmem:[%s2793_s14] sm:$0x7]  ;;  %5247 = vmatprep.subr.bf16.mxu0 (%p2788_p11), %v5857_v55  ;;  %v2900_v12 = vld [vmem:[%s7287_s9 + $0x18] sm:$0xff] (%p2788_p11)  ;;  %v5254_v15 = vpack.c.bf16 (%p2788_p11), %v2816_v61, %v2815_v10  ;;  %v2902_v17 = vld [vmem:[%s7287_s9 + $0x28] sm:$0xff] (%p2788_p11)  ;;  %s2986_s16 = scalar_lea.sflag (%p2788_p11), [#allocation9], %s7299_s25  ;;  %p5566_p12 = scmp.ne.s32.totalorder (%p2788_p11), %s7235_s30, %s5565_s0 }
0x12b3   : >> { %v2795_v51 = vmax.f32 %v2794_v50, 0.0  ;;  %5270 = vmatpush3.bf16.msra.mxu1 (%p2788_p11), %v5269_v11  ;;  %v5272_v14 = vpack.c.bf16 (%p2788_p11), %v2900_v12, %v2899_v9  ;;  %v2817_v18 = vld [vmem:[%s7285_s7 + $0x40] sm:$0xff] (%p2788_p11)  ;;  %v2818_v19 = vld [vmem:[%s7285_s7 + $0x48] sm:$0xff] (%p2788_p11)  ;;  %v5275_v20 = vpack.c.bf16 (%p2788_p11), %v2902_v17, %v2901_v16  ;;  %v2903_v22 = vld [vmem:[%s7287_s9 + $0x30] sm:$0xff] (%p2788_p11)  ;;  %s5860_s21 = smov (%p2788_p11), [#allocation8]  }
0x12b4   : > { %5271 = vmatprep.subr.bf16.mxu1 (%p2788_p11), %v5857_v55  ;;  %v5257_v21 = vpack.c.bf16 (%p2788_p11), %v2818_v19, %v2817_v18  ;;  %v2904_v23 = vld [vmem:[%s7287_s9 + $0x38] sm:$0xff] (%p2788_p11)  ;;  %v2819_v24 = vld [vmem:[%s7285_s7 + $0x50] sm:$0xff] (%p2788_p11)  ;;  %v2905_v28 = vld [vmem:[%s7287_s9 + $0x40] sm:$0xff] (%p2788_p11)  ;;  %p5567_p13 = pnand (%p2788_p11), %p5566_p12, %p5959_p5  ;;  %s5569_s1 = sshll.u32 (%p2788_p11), %s5860_s21, 4  ;;  %s5570_s1 = int_to_ptr.vmem [resolvable:$false] %s5569_s1 }
0x12b5   : >> { %2796 = vst [vmem:[%s2793_s14] sm:$0x7] %v2795_v51  ;;  %5249 = vmatpush3.bf16.msra.mxu0 (%p2788_p11), %v5248_v58  ;;  %v2820_v25 = vld [vmem:[%s7285_s7 + $0x58] sm:$0xff] (%p2788_p11)  ;;  %v5278_v26 = vpack.c.bf16 (%p2788_p11), %v2904_v23, %v2903_v22  ;;  %v2906_v29 = vld [vmem:[%s7287_s9 + $0x48] sm:$0xff] (%p2788_p11)  ;;  %v2821_v30 = vld [vmem:[%s7285_s7 + $0x60] sm:$0xff] (%p2788_p11)  ;;  %s5571_s13 = scalar_lea.vmem (%p2788_p11), %s5570_s1, 32  ;;  %p5572_p1 = scmp.lt.s32.totalorder (%p2788_p11), %s7235_s30, %s5570_s1 }
0x12b6   : > { %5250 = vmatprep.subr.bf16.mxu0 %v5857_v55  ;;  %v5260_v27 = vpack.c.bf16 %v2820_v25, %v2819_v24  ;;  %v2822_v31 = vld [vmem:[%s7285_s7 + $0x68] sm:$0xff]  ;;  %v5281_v32 = vpack.c.bf16 %v2906_v29, %v2905_v28  ;;  %v2907_v34 = vld [vmem:[%s7287_s9 + $0x50] sm:$0xff]  ;;  %v2908_v35 = vld [vmem:[%s7287_s9 + $0x58] sm:$0xff]  ;;  %p5568_p0 = pneg %p5567_p13  ;;  %p5573_p2 = scmp.lt.s32.totalorder %s5571_s13, %s5565_s0 }
0x12b7   : > { %5273 = vmatpush3.bf16.msra.mxu1 %v5272_v14  ;;  %v5263_v33 = vpack.c.bf16 %v2822_v31, %v2821_v30  ;;  %v2823_v36 = vld [vmem:[%s7285_s7 + $0x70] sm:$0xff]  ;;  %v2824_v37 = vld [vmem:[%s7285_s7 + $0x78] sm:$0xff]  ;;  %v5284_v38 = vpack.c.bf16 %v2908_v35, %v2907_v34  ;;  %v2909_v40 = vld [vmem:[%s7287_s9 + $0x60] sm:$0xff] }
0x12b8   : > { %5274 = vmatprep.subr.bf16.mxu1 %v5857_v55  ;;  %v5266_v39 = vpack.c.bf16 %v2824_v37, %v2823_v36  ;;  %v2910_v41 = vld [vmem:[%s7287_s9 + $0x68] sm:$0xff]  ;;  %v2911_v44 = vld [vmem:[%s7287_s9 + $0x70] sm:$0xff]  ;;  %v2912_v45 = vld [vmem:[%s7287_s9 + $0x78] sm:$0xff]  ;;  %p5574_p3 = por %p5573_p2, %p5572_p1 }
0x12b9   : > { %5252 = vmatpush3.bf16.msra.mxu0 %v5251_v7  ;;  %v5287_v42 = vpack.c.bf16 %v2910_v41, %v2909_v40  ;;  %v5290_v0 = vpack.c.bf16 %v2912_v45, %v2911_v44  ;;  %v2825_v46 = vld [vmem:[%s7286_s8] sm:$0x1] }
0x12ba   : > { %5253 = vmatprep.subr.bf16.mxu0 %v5857_v55  ;;  %v2913_v51 = vld [vmem:[%s7288_s10] sm:$0x1]  ;;  %p5575_p4 = pnand %p5574_p3, %p5568_p0 }
0x12bb   : > { %5276 = vmatpush3.bf16.msra.mxu1 %v5275_v20 }
0x12bc   : > { %v2797_v3 = vld [vmem:[#allocation6] ss:$2 sm:$0x1]  ;;  %v2799_v57 = vld [vmem:[#allocation6 + $0x1] ss:$2 sm:$0x1]  ;;  %5277 = vmatprep.subr.bf16.mxu1 %v5857_v55 }
0x12bd   : > { %v2801_v6 = vld [vmem:[#allocation6 + $0x4] ss:$2 sm:$0x1]  ;;  %v2803_v8 = vld [vmem:[#allocation6 + $0x5] ss:$2 sm:$0x1]  ;;  %v2804_v4 = vmax.f32 %v2797_v3, %v2799_v57  ;;  %5255 = vmatpush3.bf16.msra.mxu0 %v5254_v15 }
0x12be   : > { %v2805_v62 = vmax.f32 %v2801_v6, %v2803_v8  ;;  %5256 = vmatprep.subr.bf16.mxu0 %v5857_v55 }
0x12bf   : > { %5279 = vmatpush3.bf16.msra.mxu1 %v5278_v26 }
0x12c0   : > { %v2806_v13 = vmax.f32 %v2804_v4, %v2805_v62  ;;  %5280 = vmatprep.subr.bf16.mxu1 %v5857_v55 }
0x12c1   : > { %5258 = vmatpush3.bf16.msra.mxu0 %v5257_v21 }
0x12c2   : > { %2807 = vst [vmem:[#allocation7] sm:$0x1] %v2806_v13  ;;  %5259 = vmatprep.subr.bf16.mxu0 %v5857_v55 }
0x12c3   : > { %5282 = vmatpush3.bf16.msra.mxu1 %v5281_v32 }
0x12c4   : > { %5283 = vmatprep.subr.bf16.mxu1 %v5857_v55 }
0x12c5   : > { %5261 = vmatpush3.bf16.msra.mxu0 %v5260_v27 }
0x12c6   : > { %5262 = vmatprep.subr.bf16.mxu0 %v5857_v55 }
0x12c7   : > { %5285 = vmatpush3.bf16.msra.mxu1 %v5284_v38 }
0x12c8   : > { %5286 = vmatprep.subr.bf16.mxu1 %v5857_v55 }
0x12c9   : > { %5264 = vmatpush3.bf16.msra.mxu0 %v5263_v33  ;;  %v2808_v43 = vld [vmem:[#allocation7] sm:$0x1] }
0x12ca   : > { %5265 = vmatprep.subr.bf16.mxu0 %v5857_v55 }
0x12cb   : > { %5288 = vmatpush3.bf16.msra.mxu1 %v5287_v42 }
0x12cc   : > { %5289 = vmatprep.subr.bf16.mxu1 %v5857_v55 }
0x12cd   : > { %5267 = vmatpush3.bf16.msra.mxu0 %v5266_v39 }
0x12cf   : > { %5291 = vmatpush3.bf16.msra.mxu1 %v5290_v0 }
0x12d0   : > { %4703 = vmatmul.mubr.f32.vlgmr.msra.gmra.mrb[0].mxu0 %v2808_v43 }
0x13a3   : > { %v2892_v47 = vpop.f32.mrb[0].mxu0 }
0x13a4   : > { %v2893_v48 = vadd.f32 %v2892_v47, %v2825_v46  ;;  %v4704_v49 = vpop.f32.mrb[1].mxu0 }
0x13a6   : > { %v2896_v50 = vmax.f32 %v2893_v48, 0.0 }
0x13a8   : > { %4738 = vmatmul.mubr.f32.vlgmr.msra.gmra.mrb[0].mxu1 %v2896_v50 }
0x147b   : > { %v2980_v52 = vpop.f32.mrb[0].mxu1 }
0x147c   : > { %v2981_v53 = vadd.f32 %v2980_v52, %v2913_v51  ;;  %v4739_v54 = vpop.f32.mrb[1].mxu1 }
0x147e   : > { %2984 = vst [vmem:[%s5984_s24] sm:$0x1] %v2981_v53 }
0x147f   : > { %5578 = shalt.err (!%p5575_p4)
}
0x1480   : > { %s5579_s24 = scalar_lea.hbm %s7233_s22, 16  ;;  %s5583_s12 = scalar_lea.hbm %s7289_s11, 32 }
0x1481   : > { %p5580_p7 = scmp.ne.s32.totalorder %s7233_s22, %s5579_s24  ;;  %p5584_p10 = scmp.lt.u32.totalorder %s7233_s22, %s7289_s11 }
0x1482   : > { %p5585_p11 = scmp.lt.u32.totalorder %s5583_s12, %s5579_s24  ;;  %p5587_p13 = scmp.lt.u32.totalorder %s5579_s24, %s7233_s22 }
0x1483   : > { %p5581_p8 = pnand %p5580_p7, %p5959_p5 }
0x1484   : > { %p5586_p12 = por %p5585_p11, %p5584_p10 }
0x1485   : > { %p5582_p9 = pneg %p5581_p8 }
0x1486   : > { %p5588_p0 = por %p5587_p13, %p5586_p12 }
0x1488   : > { %p5589_p1 = pnand %p5588_p0, %p5582_p9 }
0x148a   : > { %5592 = shalt.err (!%p5589_p1)
}
0x148b   : > { %5293 = dma.vmem_to_hbm [thread:$0]  (%p5959_p5), %s7235_s30, 16, %s7233_s22, %s2986_s16  }
0x148c PF: > { %p5299_p2 = scmp.ge.s32.totalorder %s5727_s20, 2  ;;  %s3010_s25 = sand.u32 1, %s5715_s17  }
0x148d   : > { %s3011_s0 = scalar_lea.sflag [#allocation9], %s3010_s25 }
0x148e   : > { %p5296_p3 = pnand %p5299_p2, %p5963_p6 }
0x1490   : > { %5710 = dma.done.wait (!%p5296_p3), %s3011_s0, 16  }
0x1491   : > { %5712 = vsyncadd (!%p5296_p3), %s3011_s0, 4294967280  ;;  %p21_p4 = scmp.ge.s32.totalorder %s5946_s23, 4   ;;  %s7300_s17 = smov %s5719_s18 }
0x1492   : > { %s7301_s18 = smov %s5723_s19  ;;  %s7302_s19 = smov %s5957_s26 }
0x1493   : > { %s7303_s20 = smov %s5946_s23  ;;  %23 = sbr.rel (!%p21_p4) target bundleno = 7 (0x7), region = 634 }
0x149a   :  { %3015 = vsyncpa [#allocation9], 1 }
0x149b   :  { %3017 = vsyncpa [#allocation9 + $0x1], 1 }

</bundles_post_ra>
